<compile_context>
chip_gen: v7x
topology: tpu7x:2x2x1
jax: 0.10.0
libtpu: 0.0.40
codegen_flags: <defaults>
</compile_context>

<pallas_src>
import functools

import jax
import jax.numpy as jnp
import numpy as np
from jax import lax
from jax.experimental import pallas as pl
from jax.experimental.pallas import tpu as pltpu


def _mvdr_kernel(C, T_actual, ref_channel, diag_eps, eps, mask_eps,
                 has_mn, freq_on_lanes, *refs):
    """One (batch, freq-tile) grid step.

    Tile layouts:
      freq_on_lanes=True : spec blocks (1, C, T, TF), masks/out (1, T, TF)
                           (frequency lane-dense; time on sublanes, reduced).
      freq_on_lanes=False: spec blocks (1, C, TF, Tp), masks/out (1, TF, Tp)
                           (time lane-dense; frequency on sublanes).
    """
    if has_mn:
        sr_ref, si_ref, ms_ref, mn_ref, or_ref, oi_ref = refs
    else:
        sr_ref, si_ref, ms_ref, or_ref, oi_ref = refs
        mn_ref = None

    t_axis = 0 if freq_on_lanes else 1            # time axis within the 2-D tile
    ms = ms_ref[0]

    # --- mask normalization hoisted out of the (freq, time) domain:
    #     psd = (1 / (sum_t mask + eps)) * sum_t(mask * x xH); the 1/(.) factor
    #     is applied to the (TF,) reductions, never to the full tile.
    sum_s = jnp.sum(ms, axis=t_axis)                                  # (TF,)
    inv_s = pl.reciprocal(sum_s + mask_eps, approx=True)
    if has_mn:
        mn = mn_ref[0]
        inv_n = pl.reciprocal(jnp.sum(mn, axis=t_axis) + mask_eps, approx=True)
    else:
        mn = None
        # mask_n = 1 - mask_s  =>  sum_t mask_n = T - sum_t mask_s (T = unpadded)
        inv_n = pl.reciprocal((float(T_actual) - sum_s) + mask_eps, approx=True)

    tf = sum_s.shape[0]
    zero_f = jnp.zeros((tf,), jnp.float32)

    # --- Hermitian PSD matrices as lists of lane-dense (TF,) vectors:
    #     psd[c][e][f] = norm * sum_t m[f,t] * x[c,f,t] * conj(x[e,f,t])
    ps_r = [[None] * C for _ in range(C)]
    ps_i = [[None] * C for _ in range(C)]
    pn_r = [[None] * C for _ in range(C)]
    pn_i = [[None] * C for _ in range(C)]
    for c in range(C):
        xcr = sr_ref[0, c]        # read at use sites (bounded live ranges)
        xci = si_ref[0, c]
        for e in range(c, C):
            if e == c:
                xer, xei = xcr, xci
            else:
                xer = sr_ref[0, e]
                xei = si_ref[0, e]
            rr = xcr * xer + xci * xei
            s_r = jnp.sum(ms * rr, axis=t_axis)
            if has_mn:
                n_r = jnp.sum(mn * rr, axis=t_axis)
            else:
                n_r = jnp.sum(rr, axis=t_axis) - s_r
            ps_r[c][e] = s_r * inv_s
            pn_r[c][e] = n_r * inv_n
            if e == c:
                ps_i[c][e] = zero_f
                pn_i[c][e] = zero_f
            else:
                ii = xci * xer - xcr * xei
                s_i = jnp.sum(ms * ii, axis=t_axis)
                if has_mn:
                    n_i = jnp.sum(mn * ii, axis=t_axis)
                else:
                    n_i = jnp.sum(ii, axis=t_axis) - s_i
                ps_i[c][e] = s_i * inv_s
                pn_i[c][e] = n_i * inv_n
                # lower triangle by Hermitian symmetry
                ps_r[e][c] = ps_r[c][e]
                ps_i[e][c] = -ps_i[c][e]
                pn_r[e][c] = pn_r[c][e]
                pn_i[e][c] = -pn_i[c][e]

    # --- diagonal loading on psd_n: += (trace(psd_n).real*diag_eps + eps) * I
    tr_n = pn_r[0][0]
    for k in range(1, C):
        tr_n = tr_n + pn_r[k][k]
    load = tr_n * diag_eps + eps
    for k in range(C):
        pn_r[k][k] = pn_r[k][k] + load

    # --- numerator = psd_n^{-1} @ psd_s via fully-unrolled complex Gauss-Jordan
    Ar, Ai = pn_r, pn_i
    Br, Bi = ps_r, ps_i
    for k in range(C):
        pvr = Ar[k][k]
        pvi = Ai[k][k]
        inv_den = 1.0 / (pvr * pvr + pvi * pvi)   # exact (weight accuracy)
        ipr = pvr * inv_den
        ipi = -(pvi * inv_den)
        rAr = {}
        rAi = {}
        for j in range(k + 1, C):                 # columns <= k never read again
            rAr[j] = Ar[k][j] * ipr - Ai[k][j] * ipi
            rAi[j] = Ar[k][j] * ipi + Ai[k][j] * ipr
        rBr = [Br[k][j] * ipr - Bi[k][j] * ipi for j in range(C)]
        rBi = [Br[k][j] * ipi + Bi[k][j] * ipr for j in range(C)]
        for i in range(C):
            if i == k:
                continue
            cr = Ar[i][k]
            ci = Ai[i][k]
            for j in range(k + 1, C):
                Ar[i][j] = Ar[i][j] - (cr * rAr[j] - ci * rAi[j])
                Ai[i][j] = Ai[i][j] - (cr * rAi[j] + ci * rAr[j])
            for j in range(C):
                Br[i][j] = Br[i][j] - (cr * rBr[j] - ci * rBi[j])
                Bi[i][j] = Bi[i][j] - (cr * rBi[j] + ci * rBr[j])
        for j in range(k + 1, C):
            Ar[k][j] = rAr[j]
            Ai[k][j] = rAi[j]
        for j in range(C):
            Br[k][j] = rBr[j]
            Bi[k][j] = rBi[j]

    # --- ws = numerator / (trace(numerator) + eps); w[c] = ws[c, ref_channel]
    tr_r = Br[0][0]
    tr_i = Bi[0][0]
    for k in range(1, C):
        tr_r = tr_r + Br[k][k]
        tr_i = tr_i + Bi[k][k]
    tr_r = tr_r + eps
    inv_d2 = 1.0 / (tr_r * tr_r + tr_i * tr_i)    # exact
    wr = []
    wi = []
    for c in range(C):
        nr = Br[c][ref_channel]
        ni = Bi[c][ref_channel]
        wr.append((nr * tr_r + ni * tr_i) * inv_d2)   # (TF,)
        wi.append((ni * tr_r - nr * tr_i) * inv_d2)

    # --- apply beamforming: out[f, t] = sum_c conj(w[f, c]) * x[c, f, t]
    acc_r = None
    acc_i = None
    for c in range(C):
        xcr = sr_ref[0, c]
        xci = si_ref[0, c]
        if freq_on_lanes:
            wrc = wr[c][None, :]
            wic = wi[c][None, :]
        else:
            wrc = wr[c][:, None]
            wic = wi[c][:, None]
        pr = wrc * xcr + wic * xci
        pi = wrc * xci - wic * xcr
        acc_r = pr if acc_r is None else acc_r + pr
        acc_i = pi if acc_i is None else acc_i + pi

    or_ref[0] = acc_r
    oi_ref[0] = acc_i


def _round_up(n, m):
    return ((n + m - 1) // m) * m


def _tpu_vmem_capacity():
    try:
        info = pltpu.get_tpu_info()
        cap = int(getattr(info, "vmem_capacity_bytes", 0) or 0)
        if cap > 0:
            return cap
    except Exception:
        pass
    return 64 * 1024 * 1024        # conservative fallback (v7x per-TC VMEM)


def _choose_f_tile(C, F_, t_extent, B, align, vmem_cap):
    """Frequency tile: per-step working set fits well inside VMEM, the unrolled
    complex solve (~4*C^2 live (TF,) vectors) stays inside the vreg file, and
    for B == 1 the grid keeps >= 2 steps (v7x has 2 TensorCores)."""
    budget = vmem_cap // 4
    per_freq = (4 * C + 16) * t_extent * 4          # approx resident bytes / bin
    tf = max(align, budget // max(per_freq, 1))
    solve_cap = max(align, (96 * 1024) // (16 * C * C))
    tf = min(tf, solve_cap, 2048)
    if B == 1:
        half = (F_ // 2 // align) * align
        if half >= align:
            tf = min(tf, half)
    if tf >= F_:
        return F_
    tf = max(align, (tf // align) * align)
    if tf >= F_:
        return F_
    # balance tiles so the zero-padded F wastes as little as possible
    n_tiles = -(-F_ // tf)
    tf = _round_up(-(-F_ // n_tiles), align)
    if tf >= F_:
        return F_
    return tf


def mvdr_beamform(specgram, mask_s, mask_n=None, *,
                  ref_channel=0, diag_eps=1e-7, eps=1e-8, mask_eps=1e-15):
    """specgram: complex64 (B, C, F, T); mask_s/mask_n: float32 (B, F, T).
    Returns complex64 (B, F, T).  Equivalent to torchaudio.transforms.MVDR with
    solution='ref_channel', multi_mask=False, diag_loading=True, online=False."""
    B, C, F_, T = specgram.shape
    has_mn = mask_n is not None

    sr = jnp.real(specgram).astype(jnp.float32)
    si = jnp.imag(specgram).astype(jnp.float32)
    ms = mask_s.astype(jnp.float32)
    mn = mask_n.astype(jnp.float32) if has_mn else None

    vmem_cap = _tpu_vmem_capacity()
    freq_on_lanes = T < 128

    if freq_on_lanes:
        # Short time axis: put frequency on the 128-lane dim (lane-dense vregs and
        # unmasked stores); time rides on sublanes and is the reduction axis.
        sr = jnp.transpose(sr, (0, 1, 3, 2))          # (B, C, T, F)
        si = jnp.transpose(si, (0, 1, 3, 2))
        ms = jnp.transpose(ms, (0, 2, 1))             # (B, T, F)
        if has_mn:
            mn = jnp.transpose(mn, (0, 2, 1))
        align = 128
        tf = _choose_f_tile(C, F_, T, B, align, vmem_cap)
        Fp = F_ if tf == F_ else _round_up(F_, tf)
        pad_f = Fp - F_
        if pad_f:
            sr = jnp.pad(sr, ((0, 0), (0, 0), (0, 0), (0, pad_f)))
            si = jnp.pad(si, ((0, 0), (0, 0), (0, 0), (0, pad_f)))
            ms = jnp.pad(ms, ((0, 0), (0, 0), (0, pad_f)))
            if has_mn:
                mn = jnp.pad(mn, ((0, 0), (0, 0), (0, pad_f)))
        spec_x = pl.BlockSpec((1, C, T, tf), lambda b, f: (b, 0, 0, f))
        spec_m = pl.BlockSpec((1, T, tf), lambda b, f: (b, 0, f))
        out_shape_2d = (B, T, Fp)
    else:
        # Long time axis: native layout, time lane-dense (padded to a lane multiple).
        Tp = _round_up(T, 128)
        align = 8
        tf = _choose_f_tile(C, F_, Tp, B, align, vmem_cap)
        Fp = F_ if tf == F_ else _round_up(F_, tf)
        pad_f, pad_t = Fp - F_, Tp - T
        if pad_f or pad_t:
            sr = jnp.pad(sr, ((0, 0), (0, 0), (0, pad_f), (0, pad_t)))
            si = jnp.pad(si, ((0, 0), (0, 0), (0, pad_f), (0, pad_t)))
            ms = jnp.pad(ms, ((0, 0), (0, pad_f), (0, pad_t)))
            if has_mn:
                mn = jnp.pad(mn, ((0, 0), (0, pad_f), (0, pad_t)))
        spec_x = pl.BlockSpec((1, C, tf, Tp), lambda b, f: (b, 0, f, 0))
        spec_m = pl.BlockSpec((1, tf, Tp), lambda b, f: (b, f, 0))
        out_shape_2d = (B, Fp, Tp)

    inputs = [sr, si, ms] + ([mn] if has_mn else [])
    in_specs = [spec_x, spec_x, spec_m] + ([spec_m] if has_mn else [])

    kernel = functools.partial(_mvdr_kernel, C, T, ref_channel,
                               diag_eps, eps, mask_eps, has_mn, freq_on_lanes)

    out_re, out_im = pl.pallas_call(
        kernel,
        out_shape=(jax.ShapeDtypeStruct(out_shape_2d, jnp.float32),
                   jax.ShapeDtypeStruct(out_shape_2d, jnp.float32)),
        grid_spec=pltpu.PrefetchScalarGridSpec(
            num_scalar_prefetch=0,
            grid=(B, Fp // tf),
            in_specs=in_specs,
            out_specs=[spec_m, spec_m],
        ),
        compiler_params=pltpu.CompilerParams(
            dimension_semantics=("parallel", "parallel"),
            vmem_limit_bytes=min(int(vmem_cap * 0.6), 100 * 1024 * 1024),
            # Let XLA fuse the real/imag split, transpose and zero-padding
            # producers into the pallas_call operands (fewer HBM passes).
            allow_input_fusion=[True] * len(inputs),
        ),
    )(*inputs)

    if freq_on_lanes:
        out_re = jnp.transpose(out_re, (0, 2, 1))[:, :F_, :]
        out_im = jnp.transpose(out_im, (0, 2, 1))[:, :F_, :]
    else:
        out_re = out_re[:, :F_, :T]
        out_im = out_im[:, :F_, :T]
    # TODO(synk): lax.complex is one extra pass over the (single-channel) output.
    return lax.complex(out_re, out_im).astype(specgram.dtype)


def _numpy_reference(specgram, mask_s, mask_n=None, ref_channel=0):
    """Mirror of torchaudio MVDR forward (ref_channel solution) in numpy/complex128."""
    sp = np.asarray(specgram).astype(np.complex128)      # (B, C, F, T)
    ms = np.asarray(mask_s).astype(np.float64)           # (B, F, T)
    mn = (1.0 - ms) if mask_n is None else np.asarray(mask_n).astype(np.float64)
    B, C, F_, T = sp.shape
    spf = np.transpose(sp, (0, 2, 1, 3))                 # (B, F, C, T)

    def psd_np(mask):
        m = mask / (mask.sum(-1, keepdims=True) + 1e-15)
        return np.einsum('bfct,bfet->bfce', spf * m[:, :, None, :], spf.conj())

    psd_s = psd_np(ms)
    psd_n = psd_np(mn)
    eye = np.eye(C)
    tr = np.trace(psd_n, axis1=-2, axis2=-1).real
    psd_n = psd_n + (tr[..., None, None] * 1e-7 + 1e-8) * eye
    num = np.linalg.solve(psd_n, psd_s)
    trn = np.trace(num, axis1=-2, axis2=-1)
    ws = num / (trn[..., None, None] + 1e-8)
    w = ws[..., :, ref_channel]                          # (B, F, C)
    return np.einsum('bfc,bcft->bft', w.conj(), sp)


if __name__ == "__main__":
    key = jax.random.PRNGKey(0)
    k1, k2, k3, k4, k5, k6, k7 = jax.random.split(key, 7)

    # Case 1: short time axis -> frequency-on-lanes layout, mask_n defaulted to 1-mask_s.
    B, C, F_, T = 2, 4, 16, 8
    spec1 = lax.complex(jax.random.normal(k1, (B, C, F_, T), jnp.float32),
                        jax.random.normal(k2, (B, C, F_, T), jnp.float32))
    mask1 = jax.random.uniform(k3, (B, F_, T), jnp.float32)
    out1 = jax.block_until_ready(mvdr_beamform(spec1, mask1))
    ref1 = _numpy_reference(spec1, mask1)
    np.testing.assert_allclose(np.asarray(out1), ref1, rtol=1e-2, atol=1e-3)

    # Case 2: long time axis -> native layout (time lane-dense, padded), explicit
    # mask_n, tiled/parallel frequency grid.
    B2, C2, F2, T2 = 1, 2, 16, 160
    spec2 = lax.complex(jax.random.normal(k4, (B2, C2, F2, T2), jnp.float32),
                        jax.random.normal(k5, (B2, C2, F2, T2), jnp.float32))
    mask2_s = jax.random.uniform(k6, (B2, F2, T2), jnp.float32)
    mask2_n = jax.random.uniform(k7, (B2, F2, T2), jnp.float32)
    out2 = jax.block_until_ready(mvdr_beamform(spec2, mask2_s, mask2_n))
    ref2 = _numpy_reference(spec2, mask2_s, mask2_n)
    np.testing.assert_allclose(np.asarray(out2), ref2, rtol=1e-2, atol=1e-3)

    print("KERNEL_OK")
</pallas_src>

<mosaic_0001>
module attributes {stable_mosaic.version = 11 : i64} {
  func.func @_mvdr_kernel(%arg0: i32, %arg1: i32, %arg2: memref<1x4x8x16xf32, #tpu.memory_space<vmem>>, %arg3: memref<1x4x8x16xf32, #tpu.memory_space<vmem>>, %arg4: memref<1x8x16xf32, #tpu.memory_space<vmem>>, %arg5: memref<1x8x16xf32, #tpu.memory_space<vmem>>, %arg6: memref<1x8x16xf32, #tpu.memory_space<vmem>>) attributes {dimension_semantics = [#tpu.dimension_semantics<parallel>, #tpu.dimension_semantics<parallel>], iteration_bounds = array<i64: 2, 1>, scalar_prefetch = 0 : i64, scratch_operands = 0 : i64, tpu.core_type = #tpu.core_type<tc>, window_params = [{transform_indices = @transform_0, window_bounds = array<i64: 1, 4, 8, 16>}, {transform_indices = @transform_1, window_bounds = array<i64: 1, 4, 8, 16>}, {transform_indices = @transform_2, window_bounds = array<i64: 1, 8, 16>}, {transform_indices = @transform_3, window_bounds = array<i64: 1, 8, 16>}, {transform_indices = @transform_4, window_bounds = array<i64: 1, 8, 16>}]} {
    %c0 = arith.constant 0 : index
    %c0_0 = arith.constant 0 : index
    %c0_1 = arith.constant 0 : index
    %0 = vector.load %arg4[%c0, %c0_0, %c0_1] : memref<1x8x16xf32, #tpu.memory_space<vmem>>, vector<1x8x16xf32>
    %1 = vector.shape_cast %0 : vector<1x8x16xf32> to vector<8x16xf32>
    %cst = arith.constant dense<0.000000e+00> : vector<16xf32>
    %2 = vector.multi_reduction <add>, %1, %cst [0] : vector<8x16xf32> to vector<16xf32>
    %cst_2 = arith.constant 1.000000e-15 : f32
    %3 = vector.broadcast %cst_2 : f32 to vector<16xf32>
    %4 = arith.addf %2, %3 : vector<16xf32>
    %5 = tpu.reciprocal %4 {approx = true} : vector<16xf32> -> vector<16xf32>
    %cst_3 = arith.constant 8.000000e+00 : f32
    %6 = vector.broadcast %cst_3 : f32 to vector<16xf32>
    %7 = arith.subf %6, %2 : vector<16xf32>
    %cst_4 = arith.constant 1.000000e-15 : f32
    %8 = vector.broadcast %cst_4 : f32 to vector<16xf32>
    %9 = arith.addf %7, %8 : vector<16xf32>
    %10 = tpu.reciprocal %9 {approx = true} : vector<16xf32> -> vector<16xf32>
    %cst_5 = arith.constant 0.000000e+00 : f32
    %11 = vector.broadcast %cst_5 : f32 to vector<16xf32>
    %c0_6 = arith.constant 0 : index
    %c0_7 = arith.constant 0 : index
    %c0_8 = arith.constant 0 : index
    %c0_9 = arith.constant 0 : index
    %12 = vector.load %arg2[%c0_6, %c0_7, %c0_8, %c0_9] : memref<1x4x8x16xf32, #tpu.memory_space<vmem>>, vector<1x1x8x16xf32>
    %13 = vector.shape_cast %12 : vector<1x1x8x16xf32> to vector<8x16xf32>
    %c0_10 = arith.constant 0 : index
    %c0_11 = arith.constant 0 : index
    %c0_12 = arith.constant 0 : index
    %c0_13 = arith.constant 0 : index
    %14 = vector.load %arg3[%c0_10, %c0_11, %c0_12, %c0_13] : memref<1x4x8x16xf32, #tpu.memory_space<vmem>>, vector<1x1x8x16xf32>
    %15 = vector.shape_cast %14 : vector<1x1x8x16xf32> to vector<8x16xf32>
    %16 = arith.mulf %13, %13 : vector<8x16xf32>
    %17 = arith.mulf %15, %15 : vector<8x16xf32>
    %18 = arith.addf %16, %17 : vector<8x16xf32>
    %19 = arith.mulf %1, %18 : vector<8x16xf32>
    %cst_14 = arith.constant dense<0.000000e+00> : vector<16xf32>
    %20 = vector.multi_reduction <add>, %19, %cst_14 [0] : vector<8x16xf32> to vector<16xf32>
    %cst_15 = arith.constant dense<0.000000e+00> : vector<16xf32>
    %21 = vector.multi_reduction <add>, %18, %cst_15 [0] : vector<8x16xf32> to vector<16xf32>
    %22 = arith.subf %21, %20 : vector<16xf32>
    %23 = arith.mulf %20, %5 : vector<16xf32>
    %24 = arith.mulf %22, %10 : vector<16xf32>
    %c0_16 = arith.constant 0 : index
    %c1 = arith.constant 1 : index
    %c0_17 = arith.constant 0 : index
    %c0_18 = arith.constant 0 : index
    %25 = vector.load %arg2[%c0_16, %c1, %c0_17, %c0_18] : memref<1x4x8x16xf32, #tpu.memory_space<vmem>>, vector<1x1x8x16xf32>
    %26 = vector.shape_cast %25 : vector<1x1x8x16xf32> to vector<8x16xf32>
    %c0_19 = arith.constant 0 : index
    %c1_20 = arith.constant 1 : index
    %c0_21 = arith.constant 0 : index
    %c0_22 = arith.constant 0 : index
    %27 = vector.load %arg3[%c0_19, %c1_20, %c0_21, %c0_22] : memref<1x4x8x16xf32, #tpu.memory_space<vmem>>, vector<1x1x8x16xf32>
    %28 = vector.shape_cast %27 : vector<1x1x8x16xf32> to vector<8x16xf32>
    %29 = arith.mulf %13, %26 : vector<8x16xf32>
    %30 = arith.mulf %15, %28 : vector<8x16xf32>
    %31 = arith.addf %29, %30 : vector<8x16xf32>
    %32 = arith.mulf %1, %31 : vector<8x16xf32>
    %cst_23 = arith.constant dense<0.000000e+00> : vector<16xf32>
    %33 = vector.multi_reduction <add>, %32, %cst_23 [0] : vector<8x16xf32> to vector<16xf32>
    %cst_24 = arith.constant dense<0.000000e+00> : vector<16xf32>
    %34 = vector.multi_reduction <add>, %31, %cst_24 [0] : vector<8x16xf32> to vector<16xf32>
    %35 = arith.subf %34, %33 : vector<16xf32>
    %36 = arith.mulf %33, %5 : vector<16xf32>
    %37 = arith.mulf %35, %10 : vector<16xf32>
    %38 = arith.mulf %15, %26 : vector<8x16xf32>
    %39 = arith.mulf %13, %28 : vector<8x16xf32>
    %40 = arith.subf %38, %39 : vector<8x16xf32>
    %41 = arith.mulf %1, %40 : vector<8x16xf32>
    %cst_25 = arith.constant dense<0.000000e+00> : vector<16xf32>
    %42 = vector.multi_reduction <add>, %41, %cst_25 [0] : vector<8x16xf32> to vector<16xf32>
    %cst_26 = arith.constant dense<0.000000e+00> : vector<16xf32>
    %43 = vector.multi_reduction <add>, %40, %cst_26 [0] : vector<8x16xf32> to vector<16xf32>
    %44 = arith.subf %43, %42 : vector<16xf32>
    %45 = arith.mulf %42, %5 : vector<16xf32>
    %46 = arith.mulf %44, %10 : vector<16xf32>
    %cst_27 = arith.constant 0.000000e+00 : f32
    %47 = vector.broadcast %cst_27 : f32 to vector<16xf32>
    %48 = arith.subf %47, %45 : vector<16xf32>
    %cst_28 = arith.constant 0.000000e+00 : f32
    %49 = vector.broadcast %cst_28 : f32 to vector<16xf32>
    %50 = arith.subf %49, %46 : vector<16xf32>
    %c0_29 = arith.constant 0 : index
    %c2 = arith.constant 2 : index
    %c0_30 = arith.constant 0 : index
    %c0_31 = arith.constant 0 : index
    %51 = vector.load %arg2[%c0_29, %c2, %c0_30, %c0_31] : memref<1x4x8x16xf32, #tpu.memory_space<vmem>>, vector<1x1x8x16xf32>
    %52 = vector.shape_cast %51 : vector<1x1x8x16xf32> to vector<8x16xf32>
    %c0_32 = arith.constant 0 : index
    %c2_33 = arith.constant 2 : index
    %c0_34 = arith.constant 0 : index
    %c0_35 = arith.constant 0 : index
    %53 = vector.load %arg3[%c0_32, %c2_33, %c0_34, %c0_35] : memref<1x4x8x16xf32, #tpu.memory_space<vmem>>, vector<1x1x8x16xf32>
    %54 = vector.shape_cast %53 : vector<1x1x8x16xf32> to vector<8x16xf32>
    %55 = arith.mulf %13, %52 : vector<8x16xf32>
    %56 = arith.mulf %15, %54 : vector<8x16xf32>
    %57 = arith.addf %55, %56 : vector<8x16xf32>
    %58 = arith.mulf %1, %57 : vector<8x16xf32>
    %cst_36 = arith.constant dense<0.000000e+00> : vector<16xf32>
    %59 = vector.multi_reduction <add>, %58, %cst_36 [0] : vector<8x16xf32> to vector<16xf32>
    %cst_37 = arith.constant dense<0.000000e+00> : vector<16xf32>
    %60 = vector.multi_reduction <add>, %57, %cst_37 [0] : vector<8x16xf32> to vector<16xf32>
    %61 = arith.subf %60, %59 : vector<16xf32>
    %62 = arith.mulf %59, %5 : vector<16xf32>
    %63 = arith.mulf %61, %10 : vector<16xf32>
    %64 = arith.mulf %15, %52 : vector<8x16xf32>
    %65 = arith.mulf %13, %54 : vector<8x16xf32>
    %66 = arith.subf %64, %65 : vector<8x16xf32>
    %67 = arith.mulf %1, %66 : vector<8x16xf32>
    %cst_38 = arith.constant dense<0.000000e+00> : vector<16xf32>
    %68 = vector.multi_reduction <add>, %67, %cst_38 [0] : vector<8x16xf32> to vector<16xf32>
    %cst_39 = arith.constant dense<0.000000e+00> : vector<16xf32>
    %69 = vector.multi_reduction <add>, %66, %cst_39 [0] : vector<8x16xf32> to vector<16xf32>
    %70 = arith.subf %69, %68 : vector<16xf32>
    %71 = arith.mulf %68, %5 : vector<16xf32>
    %72 = arith.mulf %70, %10 : vector<16xf32>
    %cst_40 = arith.constant 0.000000e+00 : f32
    %73 = vector.broadcast %cst_40 : f32 to vector<16xf32>
    %74 = arith.subf %73, %71 : vector<16xf32>
    %cst_41 = arith.constant 0.000000e+00 : f32
    %75 = vector.broadcast %cst_41 : f32 to vector<16xf32>
    %76 = arith.subf %75, %72 : vector<16xf32>
    %c0_42 = arith.constant 0 : index
    %c3 = arith.constant 3 : index
    %c0_43 = arith.constant 0 : index
    %c0_44 = arith.constant 0 : index
    %77 = vector.load %arg2[%c0_42, %c3, %c0_43, %c0_44] : memref<1x4x8x16xf32, #tpu.memory_space<vmem>>, vector<1x1x8x16xf32>
    %78 = vector.shape_cast %77 : vector<1x1x8x16xf32> to vector<8x16xf32>
    %c0_45 = arith.constant 0 : index
    %c3_46 = arith.constant 3 : index
    %c0_47 = arith.constant 0 : index
    %c0_48 = arith.constant 0 : index
    %79 = vector.load %arg3[%c0_45, %c3_46, %c0_47, %c0_48] : memref<1x4x8x16xf32, #tpu.memory_space<vmem>>, vector<1x1x8x16xf32>
    %80 = vector.shape_cast %79 : vector<1x1x8x16xf32> to vector<8x16xf32>
    %81 = arith.mulf %13, %78 : vector<8x16xf32>
    %82 = arith.mulf %15, %80 : vector<8x16xf32>
    %83 = arith.addf %81, %82 : vector<8x16xf32>
    %84 = arith.mulf %1, %83 : vector<8x16xf32>
    %cst_49 = arith.constant dense<0.000000e+00> : vector<16xf32>
    %85 = vector.multi_reduction <add>, %84, %cst_49 [0] : vector<8x16xf32> to vector<16xf32>
    %cst_50 = arith.constant dense<0.000000e+00> : vector<16xf32>
    %86 = vector.multi_reduction <add>, %83, %cst_50 [0] : vector<8x16xf32> to vector<16xf32>
    %87 = arith.subf %86, %85 : vector<16xf32>
    %88 = arith.mulf %85, %5 : vector<16xf32>
    %89 = arith.mulf %87, %10 : vector<16xf32>
    %90 = arith.mulf %15, %78 : vector<8x16xf32>
    %91 = arith.mulf %13, %80 : vector<8x16xf32>
    %92 = arith.subf %90, %91 : vector<8x16xf32>
    %93 = arith.mulf %1, %92 : vector<8x16xf32>
    %cst_51 = arith.constant dense<0.000000e+00> : vector<16xf32>
    %94 = vector.multi_reduction <add>, %93, %cst_51 [0] : vector<8x16xf32> to vector<16xf32>
    %cst_52 = arith.constant dense<0.000000e+00> : vector<16xf32>
    %95 = vector.multi_reduction <add>, %92, %cst_52 [0] : vector<8x16xf32> to vector<16xf32>
    %96 = arith.subf %95, %94 : vector<16xf32>
    %97 = arith.mulf %94, %5 : vector<16xf32>
    %98 = arith.mulf %96, %10 : vector<16xf32>
    %cst_53 = arith.constant 0.000000e+00 : f32
    %99 = vector.broadcast %cst_53 : f32 to vector<16xf32>
    %100 = arith.subf %99, %97 : vector<16xf32>
    %cst_54 = arith.constant 0.000000e+00 : f32
    %101 = vector.broadcast %cst_54 : f32 to vector<16xf32>
    %102 = arith.subf %101, %98 : vector<16xf32>
    %c0_55 = arith.constant 0 : index
    %c1_56 = arith.constant 1 : index
    %c0_57 = arith.constant 0 : index
    %c0_58 = arith.constant 0 : index
    %103 = vector.load %arg2[%c0_55, %c1_56, %c0_57, %c0_58] : memref<1x4x8x16xf32, #tpu.memory_space<vmem>>, vector<1x1x8x16xf32>
    %104 = vector.shape_cast %103 : vector<1x1x8x16xf32> to vector<8x16xf32>
    %c0_59 = arith.constant 0 : index
    %c1_60 = arith.constant 1 : index
    %c0_61 = arith.constant 0 : index
    %c0_62 = arith.constant 0 : index
    %105 = vector.load %arg3[%c0_59, %c1_60, %c0_61, %c0_62] : memref<1x4x8x16xf32, #tpu.memory_space<vmem>>, vector<1x1x8x16xf32>
    %106 = vector.shape_cast %105 : vector<1x1x8x16xf32> to vector<8x16xf32>
    %107 = arith.mulf %104, %104 : vector<8x16xf32>
    %108 = arith.mulf %106, %106 : vector<8x16xf32>
    %109 = arith.addf %107, %108 : vector<8x16xf32>
    %110 = arith.mulf %1, %109 : vector<8x16xf32>
    %cst_63 = arith.constant dense<0.000000e+00> : vector<16xf32>
    %111 = vector.multi_reduction <add>, %110, %cst_63 [0] : vector<8x16xf32> to vector<16xf32>
    %cst_64 = arith.constant dense<0.000000e+00> : vector<16xf32>
    %112 = vector.multi_reduction <add>, %109, %cst_64 [0] : vector<8x16xf32> to vector<16xf32>
    %113 = arith.subf %112, %111 : vector<16xf32>
    %114 = arith.mulf %111, %5 : vector<16xf32>
    %115 = arith.mulf %113, %10 : vector<16xf32>
    %c0_65 = arith.constant 0 : index
    %c2_66 = arith.constant 2 : index
    %c0_67 = arith.constant 0 : index
    %c0_68 = arith.constant 0 : index
    %116 = vector.load %arg2[%c0_65, %c2_66, %c0_67, %c0_68] : memref<1x4x8x16xf32, #tpu.memory_space<vmem>>, vector<1x1x8x16xf32>
    %117 = vector.shape_cast %116 : vector<1x1x8x16xf32> to vector<8x16xf32>
    %c0_69 = arith.constant 0 : index
    %c2_70 = arith.constant 2 : index
    %c0_71 = arith.constant 0 : index
    %c0_72 = arith.constant 0 : index
    %118 = vector.load %arg3[%c0_69, %c2_70, %c0_71, %c0_72] : memref<1x4x8x16xf32, #tpu.memory_space<vmem>>, vector<1x1x8x16xf32>
    %119 = vector.shape_cast %118 : vector<1x1x8x16xf32> to vector<8x16xf32>
    %120 = arith.mulf %104, %117 : vector<8x16xf32>
    %121 = arith.mulf %106, %119 : vector<8x16xf32>
    %122 = arith.addf %120, %121 : vector<8x16xf32>
    %123 = arith.mulf %1, %122 : vector<8x16xf32>
    %cst_73 = arith.constant dense<0.000000e+00> : vector<16xf32>
    %124 = vector.multi_reduction <add>, %123, %cst_73 [0] : vector<8x16xf32> to vector<16xf32>
    %cst_74 = arith.constant dense<0.000000e+00> : vector<16xf32>
    %125 = vector.multi_reduction <add>, %122, %cst_74 [0] : vector<8x16xf32> to vector<16xf32>
    %126 = arith.subf %125, %124 : vector<16xf32>
    %127 = arith.mulf %124, %5 : vector<16xf32>
    %128 = arith.mulf %126, %10 : vector<16xf32>
    %129 = arith.mulf %106, %117 : vector<8x16xf32>
    %130 = arith.mulf %104, %119 : vector<8x16xf32>
    %131 = arith.subf %129, %130 : vector<8x16xf32>
    %132 = arith.mulf %1, %131 : vector<8x16xf32>
    %cst_75 = arith.constant dense<0.000000e+00> : vector<16xf32>
    %133 = vector.multi_reduction <add>, %132, %cst_75 [0] : vector<8x16xf32> to vector<16xf32>
    %cst_76 = arith.constant dense<0.000000e+00> : vector<16xf32>
    %134 = vector.multi_reduction <add>, %131, %cst_76 [0] : vector<8x16xf32> to vector<16xf32>
    %135 = arith.subf %134, %133 : vector<16xf32>
    %136 = arith.mulf %133, %5 : vector<16xf32>
    %137 = arith.mulf %135, %10 : vector<16xf32>
    %cst_77 = arith.constant 0.000000e+00 : f32
    %138 = vector.broadcast %cst_77 : f32 to vector<16xf32>
    %139 = arith.subf %138, %136 : vector<16xf32>
    %cst_78 = arith.constant 0.000000e+00 : f32
    %140 = vector.broadcast %cst_78 : f32 to vector<16xf32>
    %141 = arith.subf %140, %137 : vector<16xf32>
    %c0_79 = arith.constant 0 : index
    %c3_80 = arith.constant 3 : index
    %c0_81 = arith.constant 0 : index
    %c0_82 = arith.constant 0 : index
    %142 = vector.load %arg2[%c0_79, %c3_80, %c0_81, %c0_82] : memref<1x4x8x16xf32, #tpu.memory_space<vmem>>, vector<1x1x8x16xf32>
    %143 = vector.shape_cast %142 : vector<1x1x8x16xf32> to vector<8x16xf32>
    %c0_83 = arith.constant 0 : index
    %c3_84 = arith.constant 3 : index
    %c0_85 = arith.constant 0 : index
    %c0_86 = arith.constant 0 : index
    %144 = vector.load %arg3[%c0_83, %c3_84, %c0_85, %c0_86] : memref<1x4x8x16xf32, #tpu.memory_space<vmem>>, vector<1x1x8x16xf32>
    %145 = vector.shape_cast %144 : vector<1x1x8x16xf32> to vector<8x16xf32>
    %146 = arith.mulf %104, %143 : vector<8x16xf32>
    %147 = arith.mulf %106, %145 : vector<8x16xf32>
    %148 = arith.addf %146, %147 : vector<8x16xf32>
    %149 = arith.mulf %1, %148 : vector<8x16xf32>
    %cst_87 = arith.constant dense<0.000000e+00> : vector<16xf32>
    %150 = vector.multi_reduction <add>, %149, %cst_87 [0] : vector<8x16xf32> to vector<16xf32>
    %cst_88 = arith.constant dense<0.000000e+00> : vector<16xf32>
    %151 = vector.multi_reduction <add>, %148, %cst_88 [0] : vector<8x16xf32> to vector<16xf32>
    %152 = arith.subf %151, %150 : vector<16xf32>
    %153 = arith.mulf %150, %5 : vector<16xf32>
    %154 = arith.mulf %152, %10 : vector<16xf32>
    %155 = arith.mulf %106, %143 : vector<8x16xf32>
    %156 = arith.mulf %104, %145 : vector<8x16xf32>
    %157 = arith.subf %155, %156 : vector<8x16xf32>
    %158 = arith.mulf %1, %157 : vector<8x16xf32>
    %cst_89 = arith.constant dense<0.000000e+00> : vector<16xf32>
    %159 = vector.multi_reduction <add>, %158, %cst_89 [0] : vector<8x16xf32> to vector<16xf32>
    %cst_90 = arith.constant dense<0.000000e+00> : vector<16xf32>
    %160 = vector.multi_reduction <add>, %157, %cst_90 [0] : vector<8x16xf32> to vector<16xf32>
    %161 = arith.subf %160, %159 : vector<16xf32>
    %162 = arith.mulf %159, %5 : vector<16xf32>
    %163 = arith.mulf %161, %10 : vector<16xf32>
    %cst_91 = arith.constant 0.000000e+00 : f32
    %164 = vector.broadcast %cst_91 : f32 to vector<16xf32>
    %165 = arith.subf %164, %162 : vector<16xf32>
    %cst_92 = arith.constant 0.000000e+00 : f32
    %166 = vector.broadcast %cst_92 : f32 to vector<16xf32>
    %167 = arith.subf %166, %163 : vector<16xf32>
    %c0_93 = arith.constant 0 : index
    %c2_94 = arith.constant 2 : index
    %c0_95 = arith.constant 0 : index
    %c0_96 = arith.constant 0 : index
    %168 = vector.load %arg2[%c0_93, %c2_94, %c0_95, %c0_96] : memref<1x4x8x16xf32, #tpu.memory_space<vmem>>, vector<1x1x8x16xf32>
    %169 = vector.shape_cast %168 : vector<1x1x8x16xf32> to vector<8x16xf32>
    %c0_97 = arith.constant 0 : index
    %c2_98 = arith.constant 2 : index
    %c0_99 = arith.constant 0 : index
    %c0_100 = arith.constant 0 : index
    %170 = vector.load %arg3[%c0_97, %c2_98, %c0_99, %c0_100] : memref<1x4x8x16xf32, #tpu.memory_space<vmem>>, vector<1x1x8x16xf32>
    %171 = vector.shape_cast %170 : vector<1x1x8x16xf32> to vector<8x16xf32>
    %172 = arith.mulf %169, %169 : vector<8x16xf32>
    %173 = arith.mulf %171, %171 : vector<8x16xf32>
    %174 = arith.addf %172, %173 : vector<8x16xf32>
    %175 = arith.mulf %1, %174 : vector<8x16xf32>
    %cst_101 = arith.constant dense<0.000000e+00> : vector<16xf32>
    %176 = vector.multi_reduction <add>, %175, %cst_101 [0] : vector<8x16xf32> to vector<16xf32>
    %cst_102 = arith.constant dense<0.000000e+00> : vector<16xf32>
    %177 = vector.multi_reduction <add>, %174, %cst_102 [0] : vector<8x16xf32> to vector<16xf32>
    %178 = arith.subf %177, %176 : vector<16xf32>
    %179 = arith.mulf %176, %5 : vector<16xf32>
    %180 = arith.mulf %178, %10 : vector<16xf32>
    %c0_103 = arith.constant 0 : index
    %c3_104 = arith.constant 3 : index
    %c0_105 = arith.constant 0 : index
    %c0_106 = arith.constant 0 : index
    %181 = vector.load %arg2[%c0_103, %c3_104, %c0_105, %c0_106] : memref<1x4x8x16xf32, #tpu.memory_space<vmem>>, vector<1x1x8x16xf32>
    %182 = vector.shape_cast %181 : vector<1x1x8x16xf32> to vector<8x16xf32>
    %c0_107 = arith.constant 0 : index
    %c3_108 = arith.constant 3 : index
    %c0_109 = arith.constant 0 : index
    %c0_110 = arith.constant 0 : index
    %183 = vector.load %arg3[%c0_107, %c3_108, %c0_109, %c0_110] : memref<1x4x8x16xf32, #tpu.memory_space<vmem>>, vector<1x1x8x16xf32>
    %184 = vector.shape_cast %183 : vector<1x1x8x16xf32> to vector<8x16xf32>
    %185 = arith.mulf %169, %182 : vector<8x16xf32>
    %186 = arith.mulf %171, %184 : vector<8x16xf32>
    %187 = arith.addf %185, %186 : vector<8x16xf32>
    %188 = arith.mulf %1, %187 : vector<8x16xf32>
    %cst_111 = arith.constant dense<0.000000e+00> : vector<16xf32>
    %189 = vector.multi_reduction <add>, %188, %cst_111 [0] : vector<8x16xf32> to vector<16xf32>
    %cst_112 = arith.constant dense<0.000000e+00> : vector<16xf32>
    %190 = vector.multi_reduction <add>, %187, %cst_112 [0] : vector<8x16xf32> to vector<16xf32>
    %191 = arith.subf %190, %189 : vector<16xf32>
    %192 = arith.mulf %189, %5 : vector<16xf32>
    %193 = arith.mulf %191, %10 : vector<16xf32>
    %194 = arith.mulf %171, %182 : vector<8x16xf32>
    %195 = arith.mulf %169, %184 : vector<8x16xf32>
    %196 = arith.subf %194, %195 : vector<8x16xf32>
    %197 = arith.mulf %1, %196 : vector<8x16xf32>
    %cst_113 = arith.constant dense<0.000000e+00> : vector<16xf32>
    %198 = vector.multi_reduction <add>, %197, %cst_113 [0] : vector<8x16xf32> to vector<16xf32>
    %cst_114 = arith.constant dense<0.000000e+00> : vector<16xf32>
    %199 = vector.multi_reduction <add>, %196, %cst_114 [0] : vector<8x16xf32> to vector<16xf32>
    %200 = arith.subf %199, %198 : vector<16xf32>
    %201 = arith.mulf %198, %5 : vector<16xf32>
    %202 = arith.mulf %200, %10 : vector<16xf32>
    %cst_115 = arith.constant 0.000000e+00 : f32
    %203 = vector.broadcast %cst_115 : f32 to vector<16xf32>
    %204 = arith.subf %203, %201 : vector<16xf32>
    %cst_116 = arith.constant 0.000000e+00 : f32
    %205 = vector.broadcast %cst_116 : f32 to vector<16xf32>
    %206 = arith.subf %205, %202 : vector<16xf32>
    %c0_117 = arith.constant 0 : index
    %c3_118 = arith.constant 3 : index
    %c0_119 = arith.constant 0 : index
    %c0_120 = arith.constant 0 : index
    %207 = vector.load %arg2[%c0_117, %c3_118, %c0_119, %c0_120] : memref<1x4x8x16xf32, #tpu.memory_space<vmem>>, vector<1x1x8x16xf32>
    %208 = vector.shape_cast %207 : vector<1x1x8x16xf32> to vector<8x16xf32>
    %c0_121 = arith.constant 0 : index
    %c3_122 = arith.constant 3 : index
    %c0_123 = arith.constant 0 : index
    %c0_124 = arith.constant 0 : index
    %209 = vector.load %arg3[%c0_121, %c3_122, %c0_123, %c0_124] : memref<1x4x8x16xf32, #tpu.memory_space<vmem>>, vector<1x1x8x16xf32>
    %210 = vector.shape_cast %209 : vector<1x1x8x16xf32> to vector<8x16xf32>
    %211 = arith.mulf %208, %208 : vector<8x16xf32>
    %212 = arith.mulf %210, %210 : vector<8x16xf32>
    %213 = arith.addf %211, %212 : vector<8x16xf32>
    %214 = arith.mulf %1, %213 : vector<8x16xf32>
    %cst_125 = arith.constant dense<0.000000e+00> : vector<16xf32>
    %215 = vector.multi_reduction <add>, %214, %cst_125 [0] : vector<8x16xf32> to vector<16xf32>
    %cst_126 = arith.constant dense<0.000000e+00> : vector<16xf32>
    %216 = vector.multi_reduction <add>, %213, %cst_126 [0] : vector<8x16xf32> to vector<16xf32>
    %217 = arith.subf %216, %215 : vector<16xf32>
    %218 = arith.mulf %215, %5 : vector<16xf32>
    %219 = arith.mulf %217, %10 : vector<16xf32>
    %220 = arith.addf %24, %115 : vector<16xf32>
    %221 = arith.addf %220, %180 : vector<16xf32>
    %222 = arith.addf %221, %219 : vector<16xf32>
    %cst_127 = arith.constant 1.000000e-07 : f32
    %223 = vector.broadcast %cst_127 : f32 to vector<16xf32>
    %224 = arith.mulf %222, %223 : vector<16xf32>
    %cst_128 = arith.constant 9.99999993E-9 : f32
    %225 = vector.broadcast %cst_128 : f32 to vector<16xf32>
    %226 = arith.addf %224, %225 : vector<16xf32>
    %227 = arith.addf %24, %226 : vector<16xf32>
    %228 = arith.addf %115, %226 : vector<16xf32>
    %229 = arith.addf %180, %226 : vector<16xf32>
    %230 = arith.addf %219, %226 : vector<16xf32>
    %231 = arith.mulf %227, %227 : vector<16xf32>
    %232 = arith.mulf %11, %11 : vector<16xf32>
    %233 = arith.addf %231, %232 : vector<16xf32>
    %cst_129 = arith.constant 1.000000e+00 : f32
    %234 = vector.broadcast %cst_129 : f32 to vector<16xf32>
    %235 = arith.divf %234, %233 : vector<16xf32>
    %236 = arith.mulf %227, %235 : vector<16xf32>
    %237 = arith.mulf %11, %235 : vector<16xf32>
    %cst_130 = arith.constant 0.000000e+00 : f32
    %238 = vector.broadcast %cst_130 : f32 to vector<16xf32>
    %239 = arith.subf %238, %237 : vector<16xf32>
    %240 = arith.mulf %37, %236 : vector<16xf32>
    %241 = arith.mulf %46, %239 : vector<16xf32>
    %242 = arith.subf %240, %241 : vector<16xf32>
    %243 = arith.mulf %37, %239 : vector<16xf32>
    %244 = arith.mulf %46, %236 : vector<16xf32>
    %245 = arith.addf %243, %244 : vector<16xf32>
    %246 = arith.mulf %63, %236 : vector<16xf32>
    %247 = arith.mulf %72, %239 : vector<16xf32>
    %248 = arith.subf %246, %247 : vector<16xf32>
    %249 = arith.mulf %63, %239 : vector<16xf32>
    %250 = arith.mulf %72, %236 : vector<16xf32>
    %251 = arith.addf %249, %250 : vector<16xf32>
    %252 = arith.mulf %89, %236 : vector<16xf32>
    %253 = arith.mulf %98, %239 : vector<16xf32>
    %254 = arith.subf %252, %253 : vector<16xf32>
    %255 = arith.mulf %89, %239 : vector<16xf32>
    %256 = arith.mulf %98, %236 : vector<16xf32>
    %257 = arith.addf %255, %256 : vector<16xf32>
    %258 = arith.mulf %23, %236 : vector<16xf32>
    %259 = arith.mulf %11, %239 : vector<16xf32>
    %260 = arith.subf %258, %259 : vector<16xf32>
    %261 = arith.mulf %36, %236 : vector<16xf32>
    %262 = arith.mulf %45, %239 : vector<16xf32>
    %263 = arith.subf %261, %262 : vector<16xf32>
    %264 = arith.mulf %62, %236 : vector<16xf32>
    %265 = arith.mulf %71, %239 : vector<16xf32>
    %266 = arith.subf %264, %265 : vector<16xf32>
    %267 = arith.mulf %88, %236 : vector<16xf32>
    %268 = arith.mulf %97, %239 : vector<16xf32>
    %269 = arith.subf %267, %268 : vector<16xf32>
    %270 = arith.mulf %23, %239 : vector<16xf32>
    %271 = arith.mulf %11, %236 : vector<16xf32>
    %272 = arith.addf %270, %271 : vector<16xf32>
    %273 = arith.mulf %36, %239 : vector<16xf32>
    %274 = arith.mulf %45, %236 : vector<16xf32>
    %275 = arith.addf %273, %274 : vector<16xf32>
    %276 = arith.mulf %62, %239 : vector<16xf32>
    %277 = arith.mulf %71, %236 : vector<16xf32>
    %278 = arith.addf %276, %277 : vector<16xf32>
    %279 = arith.mulf %88, %239 : vector<16xf32>
    %280 = arith.mulf %97, %236 : vector<16xf32>
    %281 = arith.addf %279, %280 : vector<16xf32>
    %282 = arith.mulf %37, %242 : vector<16xf32>
    %283 = arith.mulf %50, %245 : vector<16xf32>
    %284 = arith.subf %282, %283 : vector<16xf32>
    %285 = arith.subf %228, %284 : vector<16xf32>
    %286 = arith.mulf %37, %245 : vector<16xf32>
    %287 = arith.mulf %50, %242 : vector<16xf32>
    %288 = arith.addf %286, %287 : vector<16xf32>
    %289 = arith.subf %11, %288 : vector<16xf32>
    %290 = arith.mulf %37, %248 : vector<16xf32>
    %291 = arith.mulf %50, %251 : vector<16xf32>
    %292 = arith.subf %290, %291 : vector<16xf32>
    %293 = arith.subf %128, %292 : vector<16xf32>
    %294 = arith.mulf %37, %251 : vector<16xf32>
    %295 = arith.mulf %50, %248 : vector<16xf32>
    %296 = arith.addf %294, %295 : vector<16xf32>
    %297 = arith.subf %137, %296 : vector<16xf32>
    %298 = arith.mulf %37, %254 : vector<16xf32>
    %299 = arith.mulf %50, %257 : vector<16xf32>
    %300 = arith.subf %298, %299 : vector<16xf32>
    %301 = arith.subf %154, %300 : vector<16xf32>
    %302 = arith.mulf %37, %257 : vector<16xf32>
    %303 = arith.mulf %50, %254 : vector<16xf32>
    %304 = arith.addf %302, %303 : vector<16xf32>
    %305 = arith.subf %163, %304 : vector<16xf32>
    %306 = arith.mulf %37, %260 : vector<16xf32>
    %307 = arith.mulf %50, %272 : vector<16xf32>
    %308 = arith.subf %306, %307 : vector<16xf32>
    %309 = arith.subf %36, %308 : vector<16xf32>
    %310 = arith.mulf %37, %272 : vector<16xf32>
    %311 = arith.mulf %50, %260 : vector<16xf32>
    %312 = arith.addf %310, %311 : vector<16xf32>
    %313 = arith.subf %48, %312 : vector<16xf32>
    %314 = arith.mulf %37, %263 : vector<16xf32>
    %315 = arith.mulf %50, %275 : vector<16xf32>
    %316 = arith.subf %314, %315 : vector<16xf32>
    %317 = arith.subf %114, %316 : vector<16xf32>
    %318 = arith.mulf %37, %275 : vector<16xf32>
    %319 = arith.mulf %50, %263 : vector<16xf32>
    %320 = arith.addf %318, %319 : vector<16xf32>
    %321 = arith.subf %11, %320 : vector<16xf32>
    %322 = arith.mulf %37, %266 : vector<16xf32>
    %323 = arith.mulf %50, %278 : vector<16xf32>
    %324 = arith.subf %322, %323 : vector<16xf32>
    %325 = arith.subf %127, %324 : vector<16xf32>
    %326 = arith.mulf %37, %278 : vector<16xf32>
    %327 = arith.mulf %50, %266 : vector<16xf32>
    %328 = arith.addf %326, %327 : vector<16xf32>
    %329 = arith.subf %136, %328 : vector<16xf32>
    %330 = arith.mulf %37, %269 : vector<16xf32>
    %331 = arith.mulf %50, %281 : vector<16xf32>
    %332 = arith.subf %330, %331 : vector<16xf32>
    %333 = arith.subf %153, %332 : vector<16xf32>
    %334 = arith.mulf %37, %281 : vector<16xf32>
    %335 = arith.mulf %50, %269 : vector<16xf32>
    %336 = arith.addf %334, %335 : vector<16xf32>
    %337 = arith.subf %162, %336 : vector<16xf32>
    %338 = arith.mulf %63, %242 : vector<16xf32>
    %339 = arith.mulf %76, %245 : vector<16xf32>
    %340 = arith.subf %338, %339 : vector<16xf32>
    %341 = arith.subf %128, %340 : vector<16xf32>
    %342 = arith.mulf %63, %245 : vector<16xf32>
    %343 = arith.mulf %76, %242 : vector<16xf32>
    %344 = arith.addf %342, %343 : vector<16xf32>
    %345 = arith.subf %141, %344 : vector<16xf32>
    %346 = arith.mulf %63, %248 : vector<16xf32>
    %347 = arith.mulf %76, %251 : vector<16xf32>
    %348 = arith.subf %346, %347 : vector<16xf32>
    %349 = arith.subf %229, %348 : vector<16xf32>
    %350 = arith.mulf %63, %251 : vector<16xf32>
    %351 = arith.mulf %76, %248 : vector<16xf32>
    %352 = arith.addf %350, %351 : vector<16xf32>
    %353 = arith.subf %11, %352 : vector<16xf32>
    %354 = arith.mulf %63, %254 : vector<16xf32>
    %355 = arith.mulf %76, %257 : vector<16xf32>
    %356 = arith.subf %354, %355 : vector<16xf32>
    %357 = arith.subf %193, %356 : vector<16xf32>
    %358 = arith.mulf %63, %257 : vector<16xf32>
    %359 = arith.mulf %76, %254 : vector<16xf32>
    %360 = arith.addf %358, %359 : vector<16xf32>
    %361 = arith.subf %202, %360 : vector<16xf32>
    %362 = arith.mulf %63, %260 : vector<16xf32>
    %363 = arith.mulf %76, %272 : vector<16xf32>
    %364 = arith.subf %362, %363 : vector<16xf32>
    %365 = arith.subf %62, %364 : vector<16xf32>
    %366 = arith.mulf %63, %272 : vector<16xf32>
    %367 = arith.mulf %76, %260 : vector<16xf32>
    %368 = arith.addf %366, %367 : vector<16xf32>
    %369 = arith.subf %74, %368 : vector<16xf32>
    %370 = arith.mulf %63, %263 : vector<16xf32>
    %371 = arith.mulf %76, %275 : vector<16xf32>
    %372 = arith.subf %370, %371 : vector<16xf32>
    %373 = arith.subf %127, %372 : vector<16xf32>
    %374 = arith.mulf %63, %275 : vector<16xf32>
    %375 = arith.mulf %76, %263 : vector<16xf32>
    %376 = arith.addf %374, %375 : vector<16xf32>
    %377 = arith.subf %139, %376 : vector<16xf32>
    %378 = arith.mulf %63, %266 : vector<16xf32>
    %379 = arith.mulf %76, %278 : vector<16xf32>
    %380 = arith.subf %378, %379 : vector<16xf32>
    %381 = arith.subf %179, %380 : vector<16xf32>
    %382 = arith.mulf %63, %278 : vector<16xf32>
    %383 = arith.mulf %76, %266 : vector<16xf32>
    %384 = arith.addf %382, %383 : vector<16xf32>
    %385 = arith.subf %11, %384 : vector<16xf32>
    %386 = arith.mulf %63, %269 : vector<16xf32>
    %387 = arith.mulf %76, %281 : vector<16xf32>
    %388 = arith.subf %386, %387 : vector<16xf32>
    %389 = arith.subf %192, %388 : vector<16xf32>
    %390 = arith.mulf %63, %281 : vector<16xf32>
    %391 = arith.mulf %76, %269 : vector<16xf32>
    %392 = arith.addf %390, %391 : vector<16xf32>
    %393 = arith.subf %201, %392 : vector<16xf32>
    %394 = arith.mulf %89, %242 : vector<16xf32>
    %395 = arith.mulf %102, %245 : vector<16xf32>
    %396 = arith.subf %394, %395 : vector<16xf32>
    %397 = arith.subf %154, %396 : vector<16xf32>
    %398 = arith.mulf %89, %245 : vector<16xf32>
    %399 = arith.mulf %102, %242 : vector<16xf32>
    %400 = arith.addf %398, %399 : vector<16xf32>
    %401 = arith.subf %167, %400 : vector<16xf32>
    %402 = arith.mulf %89, %248 : vector<16xf32>
    %403 = arith.mulf %102, %251 : vector<16xf32>
    %404 = arith.subf %402, %403 : vector<16xf32>
    %405 = arith.subf %193, %404 : vector<16xf32>
    %406 = arith.mulf %89, %251 : vector<16xf32>
    %407 = arith.mulf %102, %248 : vector<16xf32>
    %408 = arith.addf %406, %407 : vector<16xf32>
    %409 = arith.subf %206, %408 : vector<16xf32>
    %410 = arith.mulf %89, %254 : vector<16xf32>
    %411 = arith.mulf %102, %257 : vector<16xf32>
    %412 = arith.subf %410, %411 : vector<16xf32>
    %413 = arith.subf %230, %412 : vector<16xf32>
    %414 = arith.mulf %89, %257 : vector<16xf32>
    %415 = arith.mulf %102, %254 : vector<16xf32>
    %416 = arith.addf %414, %415 : vector<16xf32>
    %417 = arith.subf %11, %416 : vector<16xf32>
    %418 = arith.mulf %89, %260 : vector<16xf32>
    %419 = arith.mulf %102, %272 : vector<16xf32>
    %420 = arith.subf %418, %419 : vector<16xf32>
    %421 = arith.subf %88, %420 : vector<16xf32>
    %422 = arith.mulf %89, %272 : vector<16xf32>
    %423 = arith.mulf %102, %260 : vector<16xf32>
    %424 = arith.addf %422, %423 : vector<16xf32>
    %425 = arith.subf %100, %424 : vector<16xf32>
    %426 = arith.mulf %89, %263 : vector<16xf32>
    %427 = arith.mulf %102, %275 : vector<16xf32>
    %428 = arith.subf %426, %427 : vector<16xf32>
    %429 = arith.subf %153, %428 : vector<16xf32>
    %430 = arith.mulf %89, %275 : vector<16xf32>
    %431 = arith.mulf %102, %263 : vector<16xf32>
    %432 = arith.addf %430, %431 : vector<16xf32>
    %433 = arith.subf %165, %432 : vector<16xf32>
    %434 = arith.mulf %89, %266 : vector<16xf32>
    %435 = arith.mulf %102, %278 : vector<16xf32>
    %436 = arith.subf %434, %435 : vector<16xf32>
    %437 = arith.subf %192, %436 : vector<16xf32>
    %438 = arith.mulf %89, %278 : vector<16xf32>
    %439 = arith.mulf %102, %266 : vector<16xf32>
    %440 = arith.addf %438, %439 : vector<16xf32>
    %441 = arith.subf %204, %440 : vector<16xf32>
    %442 = arith.mulf %89, %269 : vector<16xf32>
    %443 = arith.mulf %102, %281 : vector<16xf32>
    %444 = arith.subf %442, %443 : vector<16xf32>
    %445 = arith.subf %218, %444 : vector<16xf32>
    %446 = arith.mulf %89, %281 : vector<16xf32>
    %447 = arith.mulf %102, %269 : vector<16xf32>
    %448 = arith.addf %446, %447 : vector<16xf32>
    %449 = arith.subf %11, %448 : vector<16xf32>
    %450 = arith.mulf %285, %285 : vector<16xf32>
    %451 = arith.mulf %289, %289 : vector<16xf32>
    %452 = arith.addf %450, %451 : vector<16xf32>
    %cst_131 = arith.constant 1.000000e+00 : f32
    %453 = vector.broadcast %cst_131 : f32 to vector<16xf32>
    %454 = arith.divf %453, %452 : vector<16xf32>
    %455 = arith.mulf %285, %454 : vector<16xf32>
    %456 = arith.mulf %289, %454 : vector<16xf32>
    %cst_132 = arith.constant 0.000000e+00 : f32
    %457 = vector.broadcast %cst_132 : f32 to vector<16xf32>
    %458 = arith.subf %457, %456 : vector<16xf32>
    %459 = arith.mulf %293, %455 : vector<16xf32>
    %460 = arith.mulf %297, %458 : vector<16xf32>
    %461 = arith.subf %459, %460 : vector<16xf32>
    %462 = arith.mulf %293, %458 : vector<16xf32>
    %463 = arith.mulf %297, %455 : vector<16xf32>
    %464 = arith.addf %462, %463 : vector<16xf32>
    %465 = arith.mulf %301, %455 : vector<16xf32>
    %466 = arith.mulf %305, %458 : vector<16xf32>
    %467 = arith.subf %465, %466 : vector<16xf32>
    %468 = arith.mulf %301, %458 : vector<16xf32>
    %469 = arith.mulf %305, %455 : vector<16xf32>
    %470 = arith.addf %468, %469 : vector<16xf32>
    %471 = arith.mulf %309, %455 : vector<16xf32>
    %472 = arith.mulf %313, %458 : vector<16xf32>
    %473 = arith.subf %471, %472 : vector<16xf32>
    %474 = arith.mulf %317, %455 : vector<16xf32>
    %475 = arith.mulf %321, %458 : vector<16xf32>
    %476 = arith.subf %474, %475 : vector<16xf32>
    %477 = arith.mulf %325, %455 : vector<16xf32>
    %478 = arith.mulf %329, %458 : vector<16xf32>
    %479 = arith.subf %477, %478 : vector<16xf32>
    %480 = arith.mulf %333, %455 : vector<16xf32>
    %481 = arith.mulf %337, %458 : vector<16xf32>
    %482 = arith.subf %480, %481 : vector<16xf32>
    %483 = arith.mulf %309, %458 : vector<16xf32>
    %484 = arith.mulf %313, %455 : vector<16xf32>
    %485 = arith.addf %483, %484 : vector<16xf32>
    %486 = arith.mulf %317, %458 : vector<16xf32>
    %487 = arith.mulf %321, %455 : vector<16xf32>
    %488 = arith.addf %486, %487 : vector<16xf32>
    %489 = arith.mulf %325, %458 : vector<16xf32>
    %490 = arith.mulf %329, %455 : vector<16xf32>
    %491 = arith.addf %489, %490 : vector<16xf32>
    %492 = arith.mulf %333, %458 : vector<16xf32>
    %493 = arith.mulf %337, %455 : vector<16xf32>
    %494 = arith.addf %492, %493 : vector<16xf32>
    %495 = arith.mulf %242, %461 : vector<16xf32>
    %496 = arith.mulf %245, %464 : vector<16xf32>
    %497 = arith.subf %495, %496 : vector<16xf32>
    %498 = arith.subf %248, %497 : vector<16xf32>
    %499 = arith.mulf %242, %464 : vector<16xf32>
    %500 = arith.mulf %245, %461 : vector<16xf32>
    %501 = arith.addf %499, %500 : vector<16xf32>
    %502 = arith.subf %251, %501 : vector<16xf32>
    %503 = arith.mulf %242, %467 : vector<16xf32>
    %504 = arith.mulf %245, %470 : vector<16xf32>
    %505 = arith.subf %503, %504 : vector<16xf32>
    %506 = arith.subf %254, %505 : vector<16xf32>
    %507 = arith.mulf %242, %470 : vector<16xf32>
    %508 = arith.mulf %245, %467 : vector<16xf32>
    %509 = arith.addf %507, %508 : vector<16xf32>
    %510 = arith.subf %257, %509 : vector<16xf32>
    %511 = arith.mulf %242, %473 : vector<16xf32>
    %512 = arith.mulf %245, %485 : vector<16xf32>
    %513 = arith.subf %511, %512 : vector<16xf32>
    %514 = arith.subf %260, %513 : vector<16xf32>
    %515 = arith.mulf %242, %485 : vector<16xf32>
    %516 = arith.mulf %245, %473 : vector<16xf32>
    %517 = arith.addf %515, %516 : vector<16xf32>
    %518 = arith.subf %272, %517 : vector<16xf32>
    %519 = arith.mulf %341, %461 : vector<16xf32>
    %520 = arith.mulf %345, %464 : vector<16xf32>
    %521 = arith.subf %519, %520 : vector<16xf32>
    %522 = arith.subf %349, %521 : vector<16xf32>
    %523 = arith.mulf %341, %464 : vector<16xf32>
    %524 = arith.mulf %345, %461 : vector<16xf32>
    %525 = arith.addf %523, %524 : vector<16xf32>
    %526 = arith.subf %353, %525 : vector<16xf32>
    %527 = arith.mulf %341, %467 : vector<16xf32>
    %528 = arith.mulf %345, %470 : vector<16xf32>
    %529 = arith.subf %527, %528 : vector<16xf32>
    %530 = arith.subf %357, %529 : vector<16xf32>
    %531 = arith.mulf %341, %470 : vector<16xf32>
    %532 = arith.mulf %345, %467 : vector<16xf32>
    %533 = arith.addf %531, %532 : vector<16xf32>
    %534 = arith.subf %361, %533 : vector<16xf32>
    %535 = arith.mulf %341, %473 : vector<16xf32>
    %536 = arith.mulf %345, %485 : vector<16xf32>
    %537 = arith.subf %535, %536 : vector<16xf32>
    %538 = arith.subf %365, %537 : vector<16xf32>
    %539 = arith.mulf %341, %485 : vector<16xf32>
    %540 = arith.mulf %345, %473 : vector<16xf32>
    %541 = arith.addf %539, %540 : vector<16xf32>
    %542 = arith.subf %369, %541 : vector<16xf32>
    %543 = arith.mulf %341, %476 : vector<16xf32>
    %544 = arith.mulf %345, %488 : vector<16xf32>
    %545 = arith.subf %543, %544 : vector<16xf32>
    %546 = arith.subf %373, %545 : vector<16xf32>
    %547 = arith.mulf %341, %488 : vector<16xf32>
    %548 = arith.mulf %345, %476 : vector<16xf32>
    %549 = arith.addf %547, %548 : vector<16xf32>
    %550 = arith.subf %377, %549 : vector<16xf32>
    %551 = arith.mulf %341, %479 : vector<16xf32>
    %552 = arith.mulf %345, %491 : vector<16xf32>
    %553 = arith.subf %551, %552 : vector<16xf32>
    %554 = arith.subf %381, %553 : vector<16xf32>
    %555 = arith.mulf %341, %491 : vector<16xf32>
    %556 = arith.mulf %345, %479 : vector<16xf32>
    %557 = arith.addf %555, %556 : vector<16xf32>
    %558 = arith.subf %385, %557 : vector<16xf32>
    %559 = arith.mulf %341, %482 : vector<16xf32>
    %560 = arith.mulf %345, %494 : vector<16xf32>
    %561 = arith.subf %559, %560 : vector<16xf32>
    %562 = arith.subf %389, %561 : vector<16xf32>
    %563 = arith.mulf %341, %494 : vector<16xf32>
    %564 = arith.mulf %345, %482 : vector<16xf32>
    %565 = arith.addf %563, %564 : vector<16xf32>
    %566 = arith.subf %393, %565 : vector<16xf32>
    %567 = arith.mulf %397, %461 : vector<16xf32>
    %568 = arith.mulf %401, %464 : vector<16xf32>
    %569 = arith.subf %567, %568 : vector<16xf32>
    %570 = arith.subf %405, %569 : vector<16xf32>
    %571 = arith.mulf %397, %464 : vector<16xf32>
    %572 = arith.mulf %401, %461 : vector<16xf32>
    %573 = arith.addf %571, %572 : vector<16xf32>
    %574 = arith.subf %409, %573 : vector<16xf32>
    %575 = arith.mulf %397, %467 : vector<16xf32>
    %576 = arith.mulf %401, %470 : vector<16xf32>
    %577 = arith.subf %575, %576 : vector<16xf32>
    %578 = arith.subf %413, %577 : vector<16xf32>
    %579 = arith.mulf %397, %470 : vector<16xf32>
    %580 = arith.mulf %401, %467 : vector<16xf32>
    %581 = arith.addf %579, %580 : vector<16xf32>
    %582 = arith.subf %417, %581 : vector<16xf32>
    %583 = arith.mulf %397, %473 : vector<16xf32>
    %584 = arith.mulf %401, %485 : vector<16xf32>
    %585 = arith.subf %583, %584 : vector<16xf32>
    %586 = arith.subf %421, %585 : vector<16xf32>
    %587 = arith.mulf %397, %485 : vector<16xf32>
    %588 = arith.mulf %401, %473 : vector<16xf32>
    %589 = arith.addf %587, %588 : vector<16xf32>
    %590 = arith.subf %425, %589 : vector<16xf32>
    %591 = arith.mulf %397, %476 : vector<16xf32>
    %592 = arith.mulf %401, %488 : vector<16xf32>
    %593 = arith.subf %591, %592 : vector<16xf32>
    %594 = arith.subf %429, %593 : vector<16xf32>
    %595 = arith.mulf %397, %488 : vector<16xf32>
    %596 = arith.mulf %401, %476 : vector<16xf32>
    %597 = arith.addf %595, %596 : vector<16xf32>
    %598 = arith.subf %433, %597 : vector<16xf32>
    %599 = arith.mulf %397, %479 : vector<16xf32>
    %600 = arith.mulf %401, %491 : vector<16xf32>
    %601 = arith.subf %599, %600 : vector<16xf32>
    %602 = arith.subf %437, %601 : vector<16xf32>
    %603 = arith.mulf %397, %491 : vector<16xf32>
    %604 = arith.mulf %401, %479 : vector<16xf32>
    %605 = arith.addf %603, %604 : vector<16xf32>
    %606 = arith.subf %441, %605 : vector<16xf32>
    %607 = arith.mulf %397, %482 : vector<16xf32>
    %608 = arith.mulf %401, %494 : vector<16xf32>
    %609 = arith.subf %607, %608 : vector<16xf32>
    %610 = arith.subf %445, %609 : vector<16xf32>
    %611 = arith.mulf %397, %494 : vector<16xf32>
    %612 = arith.mulf %401, %482 : vector<16xf32>
    %613 = arith.addf %611, %612 : vector<16xf32>
    %614 = arith.subf %449, %613 : vector<16xf32>
    %615 = arith.mulf %522, %522 : vector<16xf32>
    %616 = arith.mulf %526, %526 : vector<16xf32>
    %617 = arith.addf %615, %616 : vector<16xf32>
    %cst_133 = arith.constant 1.000000e+00 : f32
    %618 = vector.broadcast %cst_133 : f32 to vector<16xf32>
    %619 = arith.divf %618, %617 : vector<16xf32>
    %620 = arith.mulf %522, %619 : vector<16xf32>
    %621 = arith.mulf %526, %619 : vector<16xf32>
    %cst_134 = arith.constant 0.000000e+00 : f32
    %622 = vector.broadcast %cst_134 : f32 to vector<16xf32>
    %623 = arith.subf %622, %621 : vector<16xf32>
    %624 = arith.mulf %530, %620 : vector<16xf32>
    %625 = arith.mulf %534, %623 : vector<16xf32>
    %626 = arith.subf %624, %625 : vector<16xf32>
    %627 = arith.mulf %530, %623 : vector<16xf32>
    %628 = arith.mulf %534, %620 : vector<16xf32>
    %629 = arith.addf %627, %628 : vector<16xf32>
    %630 = arith.mulf %538, %620 : vector<16xf32>
    %631 = arith.mulf %542, %623 : vector<16xf32>
    %632 = arith.subf %630, %631 : vector<16xf32>
    %633 = arith.mulf %546, %620 : vector<16xf32>
    %634 = arith.mulf %550, %623 : vector<16xf32>
    %635 = arith.subf %633, %634 : vector<16xf32>
    %636 = arith.mulf %554, %620 : vector<16xf32>
    %637 = arith.mulf %558, %623 : vector<16xf32>
    %638 = arith.subf %636, %637 : vector<16xf32>
    %639 = arith.mulf %562, %620 : vector<16xf32>
    %640 = arith.mulf %566, %623 : vector<16xf32>
    %641 = arith.subf %639, %640 : vector<16xf32>
    %642 = arith.mulf %538, %623 : vector<16xf32>
    %643 = arith.mulf %542, %620 : vector<16xf32>
    %644 = arith.addf %642, %643 : vector<16xf32>
    %645 = arith.mulf %546, %623 : vector<16xf32>
    %646 = arith.mulf %550, %620 : vector<16xf32>
    %647 = arith.addf %645, %646 : vector<16xf32>
    %648 = arith.mulf %554, %623 : vector<16xf32>
    %649 = arith.mulf %558, %620 : vector<16xf32>
    %650 = arith.addf %648, %649 : vector<16xf32>
    %651 = arith.mulf %562, %623 : vector<16xf32>
    %652 = arith.mulf %566, %620 : vector<16xf32>
    %653 = arith.addf %651, %652 : vector<16xf32>
    %654 = arith.mulf %498, %626 : vector<16xf32>
    %655 = arith.mulf %502, %629 : vector<16xf32>
    %656 = arith.subf %654, %655 : vector<16xf32>
    %657 = arith.subf %506, %656 : vector<16xf32>
    %658 = arith.mulf %498, %629 : vector<16xf32>
    %659 = arith.mulf %502, %626 : vector<16xf32>
    %660 = arith.addf %658, %659 : vector<16xf32>
    %661 = arith.subf %510, %660 : vector<16xf32>
    %662 = arith.mulf %498, %632 : vector<16xf32>
    %663 = arith.mulf %502, %644 : vector<16xf32>
    %664 = arith.subf %662, %663 : vector<16xf32>
    %665 = arith.subf %514, %664 : vector<16xf32>
    %666 = arith.mulf %498, %644 : vector<16xf32>
    %667 = arith.mulf %502, %632 : vector<16xf32>
    %668 = arith.addf %666, %667 : vector<16xf32>
    %669 = arith.subf %518, %668 : vector<16xf32>
    %670 = arith.mulf %461, %626 : vector<16xf32>
    %671 = arith.mulf %464, %629 : vector<16xf32>
    %672 = arith.subf %670, %671 : vector<16xf32>
    %673 = arith.subf %467, %672 : vector<16xf32>
    %674 = arith.mulf %461, %629 : vector<16xf32>
    %675 = arith.mulf %464, %626 : vector<16xf32>
    %676 = arith.addf %674, %675 : vector<16xf32>
    %677 = arith.subf %470, %676 : vector<16xf32>
    %678 = arith.mulf %461, %632 : vector<16xf32>
    %679 = arith.mulf %464, %644 : vector<16xf32>
    %680 = arith.subf %678, %679 : vector<16xf32>
    %681 = arith.subf %473, %680 : vector<16xf32>
    %682 = arith.mulf %461, %644 : vector<16xf32>
    %683 = arith.mulf %464, %632 : vector<16xf32>
    %684 = arith.addf %682, %683 : vector<16xf32>
    %685 = arith.subf %485, %684 : vector<16xf32>
    %686 = arith.mulf %461, %635 : vector<16xf32>
    %687 = arith.mulf %464, %647 : vector<16xf32>
    %688 = arith.subf %686, %687 : vector<16xf32>
    %689 = arith.subf %476, %688 : vector<16xf32>
    %690 = arith.mulf %461, %647 : vector<16xf32>
    %691 = arith.mulf %464, %635 : vector<16xf32>
    %692 = arith.addf %690, %691 : vector<16xf32>
    %693 = arith.subf %488, %692 : vector<16xf32>
    %694 = arith.mulf %570, %626 : vector<16xf32>
    %695 = arith.mulf %574, %629 : vector<16xf32>
    %696 = arith.subf %694, %695 : vector<16xf32>
    %697 = arith.subf %578, %696 : vector<16xf32>
    %698 = arith.mulf %570, %629 : vector<16xf32>
    %699 = arith.mulf %574, %626 : vector<16xf32>
    %700 = arith.addf %698, %699 : vector<16xf32>
    %701 = arith.subf %582, %700 : vector<16xf32>
    %702 = arith.mulf %570, %632 : vector<16xf32>
    %703 = arith.mulf %574, %644 : vector<16xf32>
    %704 = arith.subf %702, %703 : vector<16xf32>
    %705 = arith.subf %586, %704 : vector<16xf32>
    %706 = arith.mulf %570, %644 : vector<16xf32>
    %707 = arith.mulf %574, %632 : vector<16xf32>
    %708 = arith.addf %706, %707 : vector<16xf32>
    %709 = arith.subf %590, %708 : vector<16xf32>
    %710 = arith.mulf %570, %635 : vector<16xf32>
    %711 = arith.mulf %574, %647 : vector<16xf32>
    %712 = arith.subf %710, %711 : vector<16xf32>
    %713 = arith.subf %594, %712 : vector<16xf32>
    %714 = arith.mulf %570, %647 : vector<16xf32>
    %715 = arith.mulf %574, %635 : vector<16xf32>
    %716 = arith.addf %714, %715 : vector<16xf32>
    %717 = arith.subf %598, %716 : vector<16xf32>
    %718 = arith.mulf %570, %638 : vector<16xf32>
    %719 = arith.mulf %574, %650 : vector<16xf32>
    %720 = arith.subf %718, %719 : vector<16xf32>
    %721 = arith.subf %602, %720 : vector<16xf32>
    %722 = arith.mulf %570, %650 : vector<16xf32>
    %723 = arith.mulf %574, %638 : vector<16xf32>
    %724 = arith.addf %722, %723 : vector<16xf32>
    %725 = arith.subf %606, %724 : vector<16xf32>
    %726 = arith.mulf %570, %641 : vector<16xf32>
    %727 = arith.mulf %574, %653 : vector<16xf32>
    %728 = arith.subf %726, %727 : vector<16xf32>
    %729 = arith.subf %610, %728 : vector<16xf32>
    %730 = arith.mulf %570, %653 : vector<16xf32>
    %731 = arith.mulf %574, %641 : vector<16xf32>
    %732 = arith.addf %730, %731 : vector<16xf32>
    %733 = arith.subf %614, %732 : vector<16xf32>
    %734 = arith.mulf %697, %697 : vector<16xf32>
    %735 = arith.mulf %701, %701 : vector<16xf32>
    %736 = arith.addf %734, %735 : vector<16xf32>
    %cst_135 = arith.constant 1.000000e+00 : f32
    %737 = vector.broadcast %cst_135 : f32 to vector<16xf32>
    %738 = arith.divf %737, %736 : vector<16xf32>
    %739 = arith.mulf %697, %738 : vector<16xf32>
    %740 = arith.mulf %701, %738 : vector<16xf32>
    %cst_136 = arith.constant 0.000000e+00 : f32
    %741 = vector.broadcast %cst_136 : f32 to vector<16xf32>
    %742 = arith.subf %741, %740 : vector<16xf32>
    %743 = arith.mulf %705, %739 : vector<16xf32>
    %744 = arith.mulf %709, %742 : vector<16xf32>
    %745 = arith.subf %743, %744 : vector<16xf32>
    %746 = arith.mulf %713, %739 : vector<16xf32>
    %747 = arith.mulf %717, %742 : vector<16xf32>
    %748 = arith.subf %746, %747 : vector<16xf32>
    %749 = arith.mulf %721, %739 : vector<16xf32>
    %750 = arith.mulf %725, %742 : vector<16xf32>
    %751 = arith.subf %749, %750 : vector<16xf32>
    %752 = arith.mulf %729, %739 : vector<16xf32>
    %753 = arith.mulf %733, %742 : vector<16xf32>
    %754 = arith.subf %752, %753 : vector<16xf32>
    %755 = arith.mulf %705, %742 : vector<16xf32>
    %756 = arith.mulf %709, %739 : vector<16xf32>
    %757 = arith.addf %755, %756 : vector<16xf32>
    %758 = arith.mulf %713, %742 : vector<16xf32>
    %759 = arith.mulf %717, %739 : vector<16xf32>
    %760 = arith.addf %758, %759 : vector<16xf32>
    %761 = arith.mulf %721, %742 : vector<16xf32>
    %762 = arith.mulf %725, %739 : vector<16xf32>
    %763 = arith.addf %761, %762 : vector<16xf32>
    %764 = arith.mulf %729, %742 : vector<16xf32>
    %765 = arith.mulf %733, %739 : vector<16xf32>
    %766 = arith.addf %764, %765 : vector<16xf32>
    %767 = arith.mulf %657, %745 : vector<16xf32>
    %768 = arith.mulf %661, %757 : vector<16xf32>
    %769 = arith.subf %767, %768 : vector<16xf32>
    %770 = arith.subf %665, %769 : vector<16xf32>
    %771 = arith.mulf %657, %757 : vector<16xf32>
    %772 = arith.mulf %661, %745 : vector<16xf32>
    %773 = arith.addf %771, %772 : vector<16xf32>
    %774 = arith.subf %669, %773 : vector<16xf32>
    %775 = arith.mulf %673, %745 : vector<16xf32>
    %776 = arith.mulf %677, %757 : vector<16xf32>
    %777 = arith.subf %775, %776 : vector<16xf32>
    %778 = arith.subf %681, %777 : vector<16xf32>
    %779 = arith.mulf %673, %757 : vector<16xf32>
    %780 = arith.mulf %677, %745 : vector<16xf32>
    %781 = arith.addf %779, %780 : vector<16xf32>
    %782 = arith.subf %685, %781 : vector<16xf32>
    %783 = arith.mulf %673, %748 : vector<16xf32>
    %784 = arith.mulf %677, %760 : vector<16xf32>
    %785 = arith.subf %783, %784 : vector<16xf32>
    %786 = arith.subf %689, %785 : vector<16xf32>
    %787 = arith.mulf %673, %760 : vector<16xf32>
    %788 = arith.mulf %677, %748 : vector<16xf32>
    %789 = arith.addf %787, %788 : vector<16xf32>
    %790 = arith.subf %693, %789 : vector<16xf32>
    %791 = arith.mulf %626, %745 : vector<16xf32>
    %792 = arith.mulf %629, %757 : vector<16xf32>
    %793 = arith.subf %791, %792 : vector<16xf32>
    %794 = arith.subf %632, %793 : vector<16xf32>
    %795 = arith.mulf %626, %757 : vector<16xf32>
    %796 = arith.mulf %629, %745 : vector<16xf32>
    %797 = arith.addf %795, %796 : vector<16xf32>
    %798 = arith.subf %644, %797 : vector<16xf32>
    %799 = arith.mulf %626, %751 : vector<16xf32>
    %800 = arith.mulf %629, %763 : vector<16xf32>
    %801 = arith.subf %799, %800 : vector<16xf32>
    %802 = arith.subf %638, %801 : vector<16xf32>
    %803 = arith.mulf %626, %763 : vector<16xf32>
    %804 = arith.mulf %629, %751 : vector<16xf32>
    %805 = arith.addf %803, %804 : vector<16xf32>
    %806 = arith.subf %650, %805 : vector<16xf32>
    %807 = arith.addf %770, %786 : vector<16xf32>
    %808 = arith.addf %774, %790 : vector<16xf32>
    %809 = arith.addf %807, %802 : vector<16xf32>
    %810 = arith.addf %808, %806 : vector<16xf32>
    %811 = arith.addf %809, %754 : vector<16xf32>
    %812 = arith.addf %810, %766 : vector<16xf32>
    %cst_137 = arith.constant 9.99999993E-9 : f32
    %813 = vector.broadcast %cst_137 : f32 to vector<16xf32>
    %814 = arith.addf %811, %813 : vector<16xf32>
    %815 = arith.mulf %814, %814 : vector<16xf32>
    %816 = arith.mulf %812, %812 : vector<16xf32>
    %817 = arith.addf %815, %816 : vector<16xf32>
    %cst_138 = arith.constant 1.000000e+00 : f32
    %818 = vector.broadcast %cst_138 : f32 to vector<16xf32>
    %819 = arith.divf %818, %817 : vector<16xf32>
    %820 = arith.mulf %770, %814 : vector<16xf32>
    %821 = arith.mulf %774, %812 : vector<16xf32>
    %822 = arith.addf %820, %821 : vector<16xf32>
    %823 = arith.mulf %822, %819 : vector<16xf32>
    %824 = arith.mulf %774, %814 : vector<16xf32>
    %825 = arith.mulf %770, %812 : vector<16xf32>
    %826 = arith.subf %824, %825 : vector<16xf32>
    %827 = arith.mulf %826, %819 : vector<16xf32>
    %828 = arith.mulf %778, %814 : vector<16xf32>
    %829 = arith.mulf %782, %812 : vector<16xf32>
    %830 = arith.addf %828, %829 : vector<16xf32>
    %831 = arith.mulf %830, %819 : vector<16xf32>
    %832 = arith.mulf %782, %814 : vector<16xf32>
    %833 = arith.mulf %778, %812 : vector<16xf32>
    %834 = arith.subf %832, %833 : vector<16xf32>
    %835 = arith.mulf %834, %819 : vector<16xf32>
    %836 = arith.mulf %794, %814 : vector<16xf32>
    %837 = arith.mulf %798, %812 : vector<16xf32>
    %838 = arith.addf %836, %837 : vector<16xf32>
    %839 = arith.mulf %838, %819 : vector<16xf32>
    %840 = arith.mulf %798, %814 : vector<16xf32>
    %841 = arith.mulf %794, %812 : vector<16xf32>
    %842 = arith.subf %840, %841 : vector<16xf32>
    %843 = arith.mulf %842, %819 : vector<16xf32>
    %844 = arith.mulf %745, %814 : vector<16xf32>
    %845 = arith.mulf %757, %812 : vector<16xf32>
    %846 = arith.addf %844, %845 : vector<16xf32>
    %847 = arith.mulf %846, %819 : vector<16xf32>
    %848 = arith.mulf %757, %814 : vector<16xf32>
    %849 = arith.mulf %745, %812 : vector<16xf32>
    %850 = arith.subf %848, %849 : vector<16xf32>
    %851 = arith.mulf %850, %819 : vector<16xf32>
    %c0_139 = arith.constant 0 : index
    %c0_140 = arith.constant 0 : index
    %c0_141 = arith.constant 0 : index
    %c0_142 = arith.constant 0 : index
    %852 = vector.load %arg2[%c0_139, %c0_140, %c0_141, %c0_142] : memref<1x4x8x16xf32, #tpu.memory_space<vmem>>, vector<1x1x8x16xf32>
    %853 = vector.shape_cast %852 : vector<1x1x8x16xf32> to vector<8x16xf32>
    %c0_143 = arith.constant 0 : index
    %c0_144 = arith.constant 0 : index
    %c0_145 = arith.constant 0 : index
    %c0_146 = arith.constant 0 : index
    %854 = vector.load %arg3[%c0_143, %c0_144, %c0_145, %c0_146] : memref<1x4x8x16xf32, #tpu.memory_space<vmem>>, vector<1x1x8x16xf32>
    %855 = vector.shape_cast %854 : vector<1x1x8x16xf32> to vector<8x16xf32>
    %856 = vector.shape_cast %823 : vector<16xf32> to vector<1x16xf32>
    %857 = vector.shape_cast %827 : vector<16xf32> to vector<1x16xf32>
    %858 = vector.broadcast %856 : vector<1x16xf32> to vector<8x16xf32>
    %859 = arith.mulf %858, %853 : vector<8x16xf32>
    %860 = vector.broadcast %857 : vector<1x16xf32> to vector<8x16xf32>
    %861 = arith.mulf %860, %855 : vector<8x16xf32>
    %862 = arith.addf %859, %861 : vector<8x16xf32>
    %863 = vector.broadcast %856 : vector<1x16xf32> to vector<8x16xf32>
    %864 = arith.mulf %863, %855 : vector<8x16xf32>
    %865 = vector.broadcast %857 : vector<1x16xf32> to vector<8x16xf32>
    %866 = arith.mulf %865, %853 : vector<8x16xf32>
    %867 = arith.subf %864, %866 : vector<8x16xf32>
    %c0_147 = arith.constant 0 : index
    %c1_148 = arith.constant 1 : index
    %c0_149 = arith.constant 0 : index
    %c0_150 = arith.constant 0 : index
    %868 = vector.load %arg2[%c0_147, %c1_148, %c0_149, %c0_150] : memref<1x4x8x16xf32, #tpu.memory_space<vmem>>, vector<1x1x8x16xf32>
    %869 = vector.shape_cast %868 : vector<1x1x8x16xf32> to vector<8x16xf32>
    %c0_151 = arith.constant 0 : index
    %c1_152 = arith.constant 1 : index
    %c0_153 = arith.constant 0 : index
    %c0_154 = arith.constant 0 : index
    %870 = vector.load %arg3[%c0_151, %c1_152, %c0_153, %c0_154] : memref<1x4x8x16xf32, #tpu.memory_space<vmem>>, vector<1x1x8x16xf32>
    %871 = vector.shape_cast %870 : vector<1x1x8x16xf32> to vector<8x16xf32>
    %872 = vector.shape_cast %831 : vector<16xf32> to vector<1x16xf32>
    %873 = vector.shape_cast %835 : vector<16xf32> to vector<1x16xf32>
    %874 = vector.broadcast %872 : vector<1x16xf32> to vector<8x16xf32>
    %875 = arith.mulf %874, %869 : vector<8x16xf32>
    %876 = vector.broadcast %873 : vector<1x16xf32> to vector<8x16xf32>
    %877 = arith.mulf %876, %871 : vector<8x16xf32>
    %878 = arith.addf %875, %877 : vector<8x16xf32>
    %879 = vector.broadcast %872 : vector<1x16xf32> to vector<8x16xf32>
    %880 = arith.mulf %879, %871 : vector<8x16xf32>
    %881 = vector.broadcast %873 : vector<1x16xf32> to vector<8x16xf32>
    %882 = arith.mulf %881, %869 : vector<8x16xf32>
    %883 = arith.subf %880, %882 : vector<8x16xf32>
    %884 = arith.addf %862, %878 : vector<8x16xf32>
    %885 = arith.addf %867, %883 : vector<8x16xf32>
    %c0_155 = arith.constant 0 : index
    %c2_156 = arith.constant 2 : index
    %c0_157 = arith.constant 0 : index
    %c0_158 = arith.constant 0 : index
    %886 = vector.load %arg2[%c0_155, %c2_156, %c0_157, %c0_158] : memref<1x4x8x16xf32, #tpu.memory_space<vmem>>, vector<1x1x8x16xf32>
    %887 = vector.shape_cast %886 : vector<1x1x8x16xf32> to vector<8x16xf32>
    %c0_159 = arith.constant 0 : index
    %c2_160 = arith.constant 2 : index
    %c0_161 = arith.constant 0 : index
    %c0_162 = arith.constant 0 : index
    %888 = vector.load %arg3[%c0_159, %c2_160, %c0_161, %c0_162] : memref<1x4x8x16xf32, #tpu.memory_space<vmem>>, vector<1x1x8x16xf32>
    %889 = vector.shape_cast %888 : vector<1x1x8x16xf32> to vector<8x16xf32>
    %890 = vector.shape_cast %839 : vector<16xf32> to vector<1x16xf32>
    %891 = vector.shape_cast %843 : vector<16xf32> to vector<1x16xf32>
    %892 = vector.broadcast %890 : vector<1x16xf32> to vector<8x16xf32>
    %893 = arith.mulf %892, %887 : vector<8x16xf32>
    %894 = vector.broadcast %891 : vector<1x16xf32> to vector<8x16xf32>
    %895 = arith.mulf %894, %889 : vector<8x16xf32>
    %896 = arith.addf %893, %895 : vector<8x16xf32>
    %897 = vector.broadcast %890 : vector<1x16xf32> to vector<8x16xf32>
    %898 = arith.mulf %897, %889 : vector<8x16xf32>
    %899 = vector.broadcast %891 : vector<1x16xf32> to vector<8x16xf32>
    %900 = arith.mulf %899, %887 : vector<8x16xf32>
    %901 = arith.subf %898, %900 : vector<8x16xf32>
    %902 = arith.addf %884, %896 : vector<8x16xf32>
    %903 = arith.addf %885, %901 : vector<8x16xf32>
    %c0_163 = arith.constant 0 : index
    %c3_164 = arith.constant 3 : index
    %c0_165 = arith.constant 0 : index
    %c0_166 = arith.constant 0 : index
    %904 = vector.load %arg2[%c0_163, %c3_164, %c0_165, %c0_166] : memref<1x4x8x16xf32, #tpu.memory_space<vmem>>, vector<1x1x8x16xf32>
    %905 = vector.shape_cast %904 : vector<1x1x8x16xf32> to vector<8x16xf32>
    %c0_167 = arith.constant 0 : index
    %c3_168 = arith.constant 3 : index
    %c0_169 = arith.constant 0 : index
    %c0_170 = arith.constant 0 : index
    %906 = vector.load %arg3[%c0_167, %c3_168, %c0_169, %c0_170] : memref<1x4x8x16xf32, #tpu.memory_space<vmem>>, vector<1x1x8x16xf32>
    %907 = vector.shape_cast %906 : vector<1x1x8x16xf32> to vector<8x16xf32>
    %908 = vector.shape_cast %847 : vector<16xf32> to vector<1x16xf32>
    %909 = vector.shape_cast %851 : vector<16xf32> to vector<1x16xf32>
    %910 = vector.broadcast %908 : vector<1x16xf32> to vector<8x16xf32>
    %911 = arith.mulf %910, %905 : vector<8x16xf32>
    %912 = vector.broadcast %909 : vector<1x16xf32> to vector<8x16xf32>
    %913 = arith.mulf %912, %907 : vector<8x16xf32>
    %914 = arith.addf %911, %913 : vector<8x16xf32>
    %915 = vector.broadcast %908 : vector<1x16xf32> to vector<8x16xf32>
    %916 = arith.mulf %915, %907 : vector<8x16xf32>
    %917 = vector.broadcast %909 : vector<1x16xf32> to vector<8x16xf32>
    %918 = arith.mulf %917, %905 : vector<8x16xf32>
    %919 = arith.subf %916, %918 : vector<8x16xf32>
    %920 = arith.addf %902, %914 : vector<8x16xf32>
    %921 = arith.addf %903, %919 : vector<8x16xf32>
    %c0_171 = arith.constant 0 : index
    %c0_172 = arith.constant 0 : index
    %c0_173 = arith.constant 0 : index
    %922 = vector.load %arg5[%c0_171, %c0_172, %c0_173] : memref<1x8x16xf32, #tpu.memory_space<vmem>>, vector<1x8x16xf32>
    %923 = vector.shape_cast %922 : vector<1x8x16xf32> to vector<8x16xf32>
    %924 = vector.shape_cast %920 : vector<8x16xf32> to vector<1x8x16xf32>
    tpu.vector_store %arg5[%c0_171, %c0_172, %c0_173], %924 {strides = array<i32>} : memref<1x8x16xf32, #tpu.memory_space<vmem>>, vector<1x8x16xf32>,
    %c0_174 = arith.constant 0 : index
    %c0_175 = arith.constant 0 : index
    %c0_176 = arith.constant 0 : index
    %925 = vector.load %arg6[%c0_174, %c0_175, %c0_176] : memref<1x8x16xf32, #tpu.memory_space<vmem>>, vector<1x8x16xf32>
    %926 = vector.shape_cast %925 : vector<1x8x16xf32> to vector<8x16xf32>
    %927 = vector.shape_cast %921 : vector<8x16xf32> to vector<1x8x16xf32>
    tpu.vector_store %arg6[%c0_174, %c0_175, %c0_176], %927 {strides = array<i32>} : memref<1x8x16xf32, #tpu.memory_space<vmem>>, vector<1x8x16xf32>,
    return
  }
  func.func @transform_0(%arg0: i32, %arg1: i32) -> (i32, i32, i32, i32) {
    %c0_i32 = arith.constant 0 : i32
    %c0_i32_0 = arith.constant 0 : i32
    %c0_i32_1 = arith.constant 0 : i32
    return %arg0, %c0_i32, %c0_i32_0, %arg1 : i32, i32, i32, i32
  }
  func.func @transform_1(%arg0: i32, %arg1: i32) -> (i32, i32, i32, i32) {
    %c0_i32 = arith.constant 0 : i32
    %c0_i32_0 = arith.constant 0 : i32
    %c0_i32_1 = arith.constant 0 : i32
    return %arg0, %c0_i32, %c0_i32_0, %arg1 : i32, i32, i32, i32
  }
  func.func @transform_2(%arg0: i32, %arg1: i32) -> (i32, i32, i32) {
    %c0_i32 = arith.constant 0 : i32
    %c0_i32_0 = arith.constant 0 : i32
    return %arg0, %c0_i32, %arg1 : i32, i32, i32
  }
  func.func @transform_3(%arg0: i32, %arg1: i32) -> (i32, i32, i32) {
    %c0_i32 = arith.constant 0 : i32
    %c0_i32_0 = arith.constant 0 : i32
    return %arg0, %c0_i32, %arg1 : i32, i32, i32
  }
  func.func @transform_4(%arg0: i32, %arg1: i32) -> (i32, i32, i32) {
    %c0_i32 = arith.constant 0 : i32
    %c0_i32_0 = arith.constant 0 : i32
    return %arg0, %c0_i32, %arg1 : i32, i32, i32
  }
}

</mosaic_0001>

<bundles_post_ra>
// kernel: tpu_custom_call.1
= control target key start
LH: loop header
LB: loop body
LE: loop exit
PB: predicated region body
PF: predicated region fallthrough
CT: control target
= control target key end

     0   :  { %s3425_s0 = inlined_call_operand.hbm [shape: f32[2,4,8,16], index: 0, kind: input, shape index: {}]   ;;  %s3426_s1 = inlined_call_operand.hbm [shape: f32[2,4,8,16], index: 1, kind: input, shape index: {}]   ;;  %s3427_s2 = inlined_call_operand.hbm [shape: f32[2,8,16], index: 2, kind: input, shape index: {}]   ;;  %s3428_s3 = inlined_call_operand.hbm [shape: f32[2,8,16], index: 3, kind: output, shape index: {0}]   ;;  %s3429_s4 = inlined_call_operand.hbm [shape: f32[2,8,16], index: 4, kind: output, shape index: {1}]  }
   0x1   :  { %3475 = sst [smem:[#allocation46_spill]] %s3425_s0 }
   0x2   :  { %3476 = sst [smem:[#allocation47_spill]] %s3426_s1 }
   0x3   :  { %10 = vsyncpa [#allocation3], 0 }
   0x4   :  { %12 = vsyncpa [#allocation3 + $0x1], 0 }
   0x5   :  { %13 = vsyncpa [#allocation6], 0 }
   0x6   :  { %15 = vsyncpa [#allocation6 + $0x1], 0 }
   0x7   :  { %16 = vsyncpa [#allocation4], 0 }
   0x8   :  { %18 = vsyncpa [#allocation4 + $0x1], 0 }
   0x9   :  { %19 = vsyncpa [#allocation10], 0 }
   0xa   :  { %21 = vsyncpa [#allocation10 + $0x1], 0  ;;  %s1927_s15 = smov 0   ;;  %s1929_s16 = smov 0  }
   0xb   :  { %s1931_s17 = smov 0   ;;  %s1933_s18 = smov 0  }
   0xc   :  { %s1935_s19 = smov 0   ;;  %s1937_s20 = smov 0  }
   0xd LB: > { %3477 = sst [smem:[#allocation15_spill]] %s1873_s15  ;;  %s1958_s21 = sadd.s32 4294967295, %s1893_s20   ;;  %s1893_s20 = sphi %s1937_s20, %s27_s20   ;;  %s1889_s19 = sphi %s1935_s19, %s3598_s19   ;;  %s1885_s18 = sphi %s1933_s18, %s3597_s18   ;;  %s1881_s17 = sphi %s1931_s17, %s3593_s17   ;;  %s1877_s16 = sphi %s1929_s16, %s3596_s16   ;;  %s1873_s15 = sphi %s1927_s15, %s3595_s15  }
   0xe   : > { %3478 = sst [smem:[#allocation16_spill]] %s1881_s17  ;;  %s1553_s22 = sadd.s32 4294967294, %s1893_s20  }
   0xf   : > { %3479 = sst [smem:[#allocation17_spill]] %s1893_s20  ;;  %s39_s23 = sadd.s32 1, %s1889_s19 }
  0x10   : > { %s48_s24 = sadd.s32 1, %s1881_s17  ;;  %p41_p0 = scmp.ge.s32.totalorder %s39_s23, 2 }
  0x11   : > { %p55_p1 = scmp.ne.s32.totalorder %s1881_s17, %s1877_s16  ;;  %p56_p2 = scmp.eq.s32.totalorder %s1893_s20, 0 }
  0x12   : > { %p61_p3 = scmp.ne.s32.totalorder %s1877_s16, %s1873_s15  ;;  %s3600_s23 = smov (%p41_p0, %s39_s23), 0 }
  0x13   : > { %3480 = sst [smem:[#allocation18_spill]] %s3600_s23  ;;  %p1970_p4 = por %p56_p2, %p55_p1 }
  0x14   : > { %p62_p5 = scmp.eq.s32.totalorder %s1958_s21, 0  ;;  %s43_s26 = ssub.s32 %s1889_s19, %s3600_s23 }
  0x15   : > { %p143_p6 = scmp.eq.s32.totalorder %s1958_s21, 1  ;;  %p46_p7 = scmp.eq.s32.totalorder %s43_s26, 0 }
  0x16   : > { %p1978_p8 = por %p62_p5, %p61_p3  ;;  %p149_p10 = scmp.eq.s32.totalorder %s1553_s22, 1 }
  0x17   : > { %p1982_p9 = por %p143_p6, %p55_p1  ;;  %p1611_p13 = scmp.lt.s32.totalorder %s1893_s20, 2 }
  0x18   : > { %s3482_s27 = scalar_select %p1978_p8, 1, 0 }
  0x19   : > { %s3483_s28 = scalar_select %p1982_p9, 1, 0 }
  0x1a   : > { %s1987_s29 = scalar_select %p46_p7, %s1881_s17, %s48_s24  }
  0x1b   : > { %p1989_p11 = por %p149_p10, %p61_p3  ;;  %s1996_s5 = sand.u32 1, %s1881_s17  }
  0x1c   : > { %3484 = sst [smem:[#allocation19_spill]] %s1987_s29  ;;  %s3430_s6 = sshll.u32 %s1996_s5, 5 }
  0x1d   : > { %s3485_s30 = scalar_select %p1989_p11, 1, 0 }
  0x1e   : > { %s1582_s7 = sshll.u32 %s1889_s19, 9  ;;  %p2002_p0 = pnand %p1611_p13, %p1970_p4 }
  0x1f   : > { %3486 = sst [smem:[#allocation20_spill]] %s3485_s30  ;;  %s219_s9 = sand.u32 1, %s1893_s20  }
  0x20   : > { %s3487_s8 = scalar_select %p2002_p0, 1, 0 }
  0x21   : > { %s3488_s1 = sld [smem:[#allocation47_spill]]  ;;  %s223_s13 = scalar_lea.vmem [#allocation5], %s3430_s6 }
  0x22   : > { %s231_s14 = sshll.u32 %s223_s13, 4  ;;  %s2020_s22 = scalar_lea.sflag [#allocation6], %s219_s9  ;;  %s2017_s14 = int_to_ptr.vmem [resolvable:$true] %s231_s14 }
  0x23   : > { %p2026_p4 = pneg %p2002_p0 }
  0x27   : > { %s2012_s12 = scalar_lea.hbm %s3488_s1, %s1582_s7  ;;  %s1690_s11 = scalar_lea.hbm %s3488_s1, 1024 }
  0x28   : > { %s1685_s24 = scalar_lea.hbm %s2012_s12, 512  ;;  %p1691_p7 = scmp.lt.u32.totalorder %s2012_s12, %s3488_s1 }
  0x29   : > { %p1686_p3 = scmp.ne.s32.totalorder %s2012_s12, %s1685_s24  ;;  %p1692_p10 = scmp.lt.u32.totalorder %s1690_s11, %s1685_s24 }
  0x2a   : > { %p1694_p12 = scmp.lt.u32.totalorder %s1685_s24, %s2012_s12 }
  0x2b   : > { %p1688_p5 = pnand %p2026_p4, %p1686_p3  ;;  %p1693_p13 = por %p1692_p10, %p1691_p7 }
  0x2d   : > { %p1689_p6 = pneg %p1688_p5  ;;  %p1695_p1 = por %p1694_p12, %p1693_p13 }
  0x2f   : > { %p1696_p2 = pnand %p1695_p1, %p1689_p6 }
  0x31   : > { %1699 = shalt.err (!%p1696_p2)
}
  0x32   : > { %s1700_s9 = scalar_lea.vmem %s2017_s14, 512  ;;  %s1895_s26 = smov [#allocation5]  }
  0x33   : > { %p1701_p3 = scmp.ne.s32.totalorder %s2017_s14, %s1700_s9  ;;  %s1705_s10 = sshll.u32 %s1895_s26, 4  ;;  %s1706_s10 = int_to_ptr.vmem [resolvable:$false] %s1705_s10 }
  0x34   : > { %s1707_s6 = scalar_lea.vmem %s1706_s10, 1024  ;;  %p1708_p9 = scmp.lt.s32.totalorder %s2017_s14, %s1706_s10 }
  0x35   : > { %p1703_p5 = pnand %p1701_p3, %p2026_p4  ;;  %p1709_p8 = scmp.lt.s32.totalorder %s1707_s6, %s1700_s9 }
  0x37   : > { %p1704_p11 = pneg %p1703_p5  ;;  %p1710_p7 = por %p1709_p8, %p1708_p9 }
  0x39   : > { %p1711_p10 = pnand %p1710_p7, %p1704_p11 }
  0x3b   : > { %1714 = shalt.err (!%p1711_p10)
}
  0x3c   : > { %s3434_s24 = smov 128   ;;  %s3435_s11 = smov 8  }
  0x3d   : > { %1600 = dma.hbm_to_vmem [thread:$0]  (!%p2002_p0), %s2012_s12, 512, %s2017_s14, %s2020_s22, %s3434_s24, %s3434_s24, %s3435_s11  }
  0x3e   : > { %p3490_p8 = scmp.lt.s32.totalorder %s1893_s20, 3  ;;  %p3491_p9 = scmp.ge.s32.totalorder %s1893_s20, 1 }
  0x3f   : > { %s3493_s0 = sld [smem:[#allocation46_spill]]  ;;  %s3494_s6 = sshll.u32 %s1996_s5, 5 }
  0x40   : > { %p2057_p11 = pnand %p3491_p9, %p3490_p8  ;;  %s201_s1 = scalar_lea.vmem [#allocation2], %s3494_s6 }
  0x41   : > { %s209_s23 = sshll.u32 %s201_s1, 4  ;;  %s1562_s12 = sshll.u32 %s1996_s5, 3  ;;  %s2071_s23 = int_to_ptr.vmem [resolvable:$true] %s209_s23 }
  0x42   : > { %s3492_s13 = scalar_select %p2057_p11, 1, 0 }
  0x43   : > { %s198_s14 = scalar_lea.sflag [#allocation3], %s1996_s5 }
  0x45   : > { %s2066_s10 = scalar_lea.hbm %s3493_s0, %s1582_s7  ;;  %s1720_s7 = scalar_lea.hbm %s3493_s0, 1024 }
  0x46   : > { %s1715_s24 = scalar_lea.hbm %s2066_s10, 512  ;;  %p1721_p6 = scmp.lt.u32.totalorder %s2066_s10, %s3493_s0 }
  0x47   : > { %p1716_p12 = scmp.ne.s32.totalorder %s2066_s10, %s1715_s24  ;;  %p1722_p13 = scmp.lt.u32.totalorder %s1720_s7, %s1715_s24 }
  0x48   : > { %p1724_p5 = scmp.lt.u32.totalorder %s1715_s24, %s2066_s10 }
  0x49   : > { %p1718_p1 = pnand %p1716_p12, %p2026_p4  ;;  %p1723_p3 = por %p1722_p13, %p1721_p6 }
  0x4b   : > { %p1719_p2 = pneg %p1718_p1  ;;  %p1725_p7 = por %p1724_p5, %p1723_p3 }
  0x4d   : > { %p1726_p10 = pnand %p1725_p7, %p1719_p2 }
  0x4f   : > { %1729 = shalt.err (!%p1726_p10)
}
  0x50   : > { %s1730_s1 = scalar_lea.vmem %s2071_s23, 512  ;;  %s1898_s11 = smov [#allocation2]  }
  0x51   : > { %p1731_p8 = scmp.ne.s32.totalorder %s2071_s23, %s1730_s1  ;;  %s1735_s6 = sshll.u32 %s1898_s11, 4  ;;  %s1736_s6 = int_to_ptr.vmem [resolvable:$false] %s1735_s6 }
  0x52   : > { %s1737_s29 = scalar_lea.vmem %s1736_s6, 1024  ;;  %p1738_p1 = scmp.lt.s32.totalorder %s2071_s23, %s1736_s6 }
  0x53   : > { %p1733_p9 = pnand %p1731_p8, %p2026_p4  ;;  %p1739_p11 = scmp.lt.s32.totalorder %s1737_s29, %s1730_s1 }
  0x55   : > { %p1734_p12 = pneg %p1733_p9  ;;  %p1740_p6 = por %p1739_p11, %p1738_p1 }
  0x57   : > { %p1741_p13 = pnand %p1740_p6, %p1734_p12 }
  0x59   : > { %1744 = shalt.err (!%p1741_p13)
}
  0x5a   : > { %s3495_s24 = smov 8   ;;  %s3496_s9 = smov 128  }
  0x5b   : > { %1597 = dma.hbm_to_vmem [thread:$0]  (!%p2002_p0), %s2066_s10, 512, %s2071_s23, %s198_s14, %s3496_s9, %s3496_s9, %s3495_s24  }
  0x5c   : > { %s1563_s7 = sshll.u32 %s1889_s19, 7  ;;  %s245_s26 = scalar_lea.vmem [#allocation7], %s1562_s12 }
  0x5d   : > { %s253_s1 = sshll.u32 %s245_s26, 4  ;;  %s251_s29 = scalar_lea.hbm %s3427_s2, %s1563_s7  ;;  %s254_s1 = int_to_ptr.vmem [resolvable:$true] %s253_s1 }
  0x5e   : > { %s1745_s0 = scalar_lea.hbm %s251_s29, 128  ;;  %s1750_s30 = scalar_lea.hbm %s3427_s2, 256 }
  0x5f   : > { %p1746_p11 = scmp.ne.s32.totalorder %s251_s29, %s1745_s0  ;;  %p1751_p5 = scmp.lt.u32.totalorder %s251_s29, %s3427_s2 }
  0x60   : > { %p1752_p7 = scmp.lt.u32.totalorder %s1750_s30, %s1745_s0  ;;  %p1754_p8 = scmp.lt.u32.totalorder %s1745_s0, %s251_s29 }
  0x61   : > { %p1748_p2 = pnand %p1746_p11, %p2026_p4 }
  0x62   : > { %p1753_p10 = por %p1752_p7, %p1751_p5 }
  0x63   : > { %p1749_p3 = pneg %p1748_p2 }
  0x64   : > { %p1755_p9 = por %p1754_p8, %p1753_p10 }
  0x66   : > { %p1756_p12 = pnand %p1755_p9, %p1749_p3 }
  0x68   : > { %1759 = shalt.err (!%p1756_p12)
}
  0x69   : > { %s1760_s5 = scalar_lea.vmem %s254_s1, 128  ;;  %s1899_s10 = smov [#allocation7]  }
  0x6a   : > { %p1761_p1 = scmp.ne.s32.totalorder %s254_s1, %s1760_s5  ;;  %s1765_s12 = sshll.u32 %s1899_s10, 4  ;;  %s1766_s12 = int_to_ptr.vmem [resolvable:$false] %s1765_s12 }
  0x6b   : > { %s1767_s17 = scalar_lea.vmem %s1766_s12, 256  ;;  %p1768_p11 = scmp.lt.s32.totalorder %s254_s1, %s1766_s12 }
  0x6c   : > { %p1763_p6 = pnand %p1761_p1, %p2026_p4  ;;  %p1769_p2 = scmp.lt.s32.totalorder %s1767_s17, %s1760_s5 }
  0x6e   : > { %p1764_p13 = pneg %p1763_p6  ;;  %p1770_p0 = por %p1769_p2, %p1768_p11 }
  0x70   : > { %p1771_p5 = pnand %p1770_p0, %p1764_p13 }
  0x72   : > { %1774 = shalt.err (!%p1771_p5)
}
  0x73   : > { %p3497_p7 = scmp.ne.s32.totalorder %s3487_s8, 0  ;;  %p3498_p3 = scmp.ne.s32.totalorder %s3492_s13, 0 }
  0x75   : > { %1603 = dma.hbm_to_vmem [thread:$0]  (!%p3497_p7), %s251_s29, 128, %s254_s1, %s2020_s22  }
  0x76   : > { %262 = sbr.rel (%p3498_p3) target bundleno = 451 (0x1c3), region = 32 }
  0x7d   : > { %s2122_s0 = sand.u32 1, %s1877_s16   ;;  %p3499_p4 = scmp.ne.s32.totalorder %s3482_s27, 0 }
  0x7e   : > { %s1565_s15 = sshll.u32 %s2122_s0, 5  ;;  %s265_s20 = scalar_lea.sflag [#allocation3], %s2122_s0 }
  0x7f   : > { %s2126_s30 = scalar_lea.vmem [#allocation2], %s1565_s15 }
  0x80   : > { %1856 = dma.done.wait (%p3499_p4), %s265_s20, 512  }
  0x81   : > { %1858 = vsyncadd (%p3499_p4), %s265_s20, 4294966784  ;;  %s273_s8 = sand.u32 1, %s1958_s21   ;;  %s2133_s25 = scalar_lea.vmem [#allocation5], %s1565_s15 }
  0x82   : > { %s274_s22 = scalar_lea.sflag [#allocation6], %s273_s8 }
  0x83   : > { %1860 = dma.done.wait (%p3499_p4), %s274_s22, 640  }
  0x84   : > { %1862 = vsyncadd (%p3499_p4), %s274_s22, 4294966656  ;;  %s2140_s13 = sshll.u32 %s2122_s0, 3  ;;  %vm327_vm0 = vcmask 130048   ;;  %v2146_v1 = vld [vmem:[%s2126_s30] sm:$0xff]  ;;  %v2168_v24 = vld [vmem:[%s2126_s30 + $0x8] sm:$0xff]  ;;  %s1578_s21 = sshll.u32 %s1885_s18, 7 }
  0x85   : > { %s286_s14 = scalar_lea.vmem [#allocation7], %s2140_s13  ;;  %v2149_v2 = vld [vmem:[%s2133_s25] sm:$0xff]  ;;  %v342_v4 = vmul.f32 %v2146_v1, %v2146_v1  ;;  %v2171_v25 = vld [vmem:[%s2133_s25 + $0x8] sm:$0xff]  ;;  %v507_v26 = vmul.f32 %v2168_v24, %v2168_v24  ;;  %v2186_v38 = vld [vmem:[%s2126_s30 + $0x10] sm:$0xff]  ;;  %v367_v46 = vmul.f32 %v2168_v24, %v2146_v1  ;;  %s318_s27 = scalar_lea.vmem [#allocation8], %s2140_s13 }
  0x86   : > { %v2143_v0 = vld [vmem:[%s286_s14] sm:$0xff]  ;;  %v343_v5 = vmul.f32 %v2149_v2, %v2149_v2  ;;  %v508_v27 = vmul.f32 %v2171_v25, %v2171_v25  ;;  %v2190_v40 = vld [vmem:[%s2133_s25 + $0x10] sm:$0xff]  ;;  %v616_v42 = vmul.f32 %v2186_v38, %v2186_v38  ;;  %v368_v47 = vmul.f32 %v2171_v25, %v2149_v2  ;;  %s1378_s24 = sshll.u32 %s318_s27, 4  ;;  %s325_s9 = scalar_lea.vmem [#allocation9], %s2140_s13  ;;  %s3347_s24 = int_to_ptr.vmem [resolvable:$true] %s1378_s24 }
  0x87   : > { %v328_v3 = vsel %vm327_vm0, %v2143_v0, 0.0  ;;  %v617_v45 = vmul.f32 %v2190_v40, %v2190_v40  ;;  %v388_v52 = vmul.f32 %v2168_v24, %v2149_v2  ;;  %v389_v56 = vmul.f32 %v2171_v25, %v2146_v1  ;;  %s1392_s7 = sshll.u32 %s325_s9, 4  ;;  %s3345_s11 = scalar_lea.hbm %s3428_s3, %s1578_s21  ;;  %s3354_s7 = int_to_ptr.vmem [resolvable:$true] %s1392_s7 }
  0x88   : > { %v329_v6 = vrot.slane %v328_v3, 4  ;;  %v344_v7 = vadd.f32 %v343_v5, %v342_v4  ;;  %v509_v28 = vadd.f32 %v508_v27, %v507_v26  ;;  %v369_v55 = vadd.f32 %v368_v47, %v367_v46  ;;  %v2210_v5 = vld [vmem:[%s2126_s30 + $0x18] sm:$0xff]  ;;  %s3352_s29 = scalar_lea.hbm %s3429_s4, %s1578_s21  ;;  %s1359_s23 = scalar_lea.sflag [#allocation4], %s2122_s0 }
  0x89   : > { %v618_v48 = vadd.f32 %v617_v45, %v616_v42  ;;  %v390_v4 = vsub.f32 %v388_v52, %v389_v56  ;;  %v436_v52 = vmul.f32 %v2186_v38, %v2149_v2  ;;  %s1775_s5 = scalar_lea.vmem %s3347_s24, 128  ;;  %p3586_p10 = scmp.ne.s32.totalorder %s3483_s28, 0 }
  0x8a   : > { %v330_v8 = vadd.f32 %v329_v6, %v328_v3  ;;  %v345_v9 = vmul.f32 %v344_v7, %v2143_v0  ;;  %v510_v29 = vmul.f32 %v509_v28, %v2143_v0  ;;  %v353_v39 = vsel %vm327_vm0, %v344_v7, 0.0  ;;  %p1776_p0 = scmp.ne.s32.totalorder %s3347_s24, %s1775_s5  ;;  %s1900_s10 = smov [#allocation8]  }
  0x8b   : > { %v518_v41 = vsel %vm327_vm0, %v509_v28, 0.0  ;;  %v354_v43 = vrot.slane %v353_v39, 4  ;;  %v619_v51 = vmul.f32 %v618_v48, %v2143_v0  ;;  %v627_v53 = vsel %vm327_vm0, %v618_v48, 0.0  ;;  %s1779_s12 = sshll.u32 %s1900_s10, 4  ;;  %s1780_s12 = int_to_ptr.vmem [resolvable:$false] %s1779_s12 }
  0x8c   : > { %v331_v10 = vrot.slane %v330_v8, 2  ;;  %v346_v11 = vsel %vm327_vm0, %v345_v9, 0.0  ;;  %v511_v30 = vsel %vm327_vm0, %v510_v29, 0.0  ;;  %v519_v44 = vrot.slane %v518_v41, 4  ;;  %p1777_p8 = pnand %p1776_p0, %p3586_p10  ;;  %s1781_s17 = scalar_lea.vmem %s1780_s12, 256 }
  0x8d   : > { %v347_v13 = vrot.slane %v346_v11, 4  ;;  %v512_v31 = vrot.slane %v511_v30, 4  ;;  %v355_v49 = vadd.f32 %v354_v43, %v353_v39  ;;  %v620_v57 = vsel %vm327_vm0, %v619_v51, 0.0  ;;  %p1782_p12 = scmp.lt.s32.totalorder %s3347_s24, %s1780_s12  ;;  %p1783_p1 = scmp.lt.s32.totalorder %s1781_s17, %s1775_s5 }
  0x8e   : > { %v332_v12 = vadd.f32 %v331_v10, %v330_v8  ;;  %v520_v50 = vadd.f32 %v519_v44, %v518_v41  ;;  %v621_v59 = vrot.slane %v620_v57, 4  ;;  %v628_v61 = vrot.slane %v627_v53, 4  ;;  %v2213_v8 = vld [vmem:[%s2133_s25 + $0x18] sm:$0xff]  ;;  %p1778_p9 = pneg %p1777_p8 }
  0x8f   : > { %v348_v15 = vadd.f32 %v347_v13, %v346_v11  ;;  %v513_v32 = vadd.f32 %v512_v31, %v511_v30  ;;  %v356_v58 = vrot.slane %v355_v49, 2  ;;  %v370_v3 = vmul.f32 %v369_v55, %v2143_v0  ;;  %p1784_p6 = por %p1783_p1, %p1782_p12 }
  0x90   : > { %v333_v14 = vrot.slane %v332_v12, 1  ;;  %v521_v60 = vrot.slane %v520_v50, 2  ;;  %v622_v62 = vadd.f32 %v621_v59, %v620_v57  ;;  %v629_v6 = vadd.f32 %v628_v61, %v627_v53 }
  0x91   : > { %v349_v17 = vrot.slane %v348_v15, 2  ;;  %v514_v33 = vrot.slane %v513_v32, 2  ;;  %v357_v7 = vadd.f32 %v356_v58, %v355_v49  ;;  %v378_v10 = vsel %vm327_vm0, %v369_v55, 0.0  ;;  %p1785_p13 = pnand %p1784_p6, %p1778_p9 }
  0x92   : > { %v334_v16 = vadd.f32 %v333_v14, %v332_v12  ;;  %v623_v9 = vrot.slane %v622_v62, 2  ;;  %v522_v11 = vadd.f32 %v521_v60, %v520_v50  ;;  %v630_v12 = vrot.slane %v629_v6, 2 }
  0x93   : > { %v350_v19 = vadd.f32 %v349_v17, %v348_v15  ;;  %v515_v34 = vadd.f32 %v514_v33, %v513_v32  ;;  %v415_v13 = vmul.f32 %v2186_v38, %v2146_v1  ;;  %v416_v14 = vmul.f32 %v2190_v40, %v2149_v2 }
  0x94   : > { %v335_v18 = vadd.f32 1e-15, %v334_v16  ;;  %v337_v54 = vsub.f32 8.0, %v334_v16  ;;  %v624_v15 = vadd.f32 %v623_v9, %v622_v62  ;;  %v681_v16 = vmul.f32 %v2210_v5, %v2210_v5 }
  0x95   : > { %v351_v20 = vrot.slane %v350_v19, 1  ;;  %v516_v35 = vrot.slane %v515_v34, 1  ;;  %v371_v17 = vsel %vm327_vm0, %v370_v3, 0.0  ;;  %v379_v26 = vrot.slane %v378_v10, 4 }
  0x96   : > { %1663 = vrcp.f32 %v335_v18  ;;  %v338_v63 = vadd.f32 1e-15, %v337_v54  ;;  %v391_v18 = vmul.f32 %v390_v4, %v2143_v0  ;;  %v399_v27 = vsel %vm327_vm0, %v390_v4, 0.0 }
  0x97   : > { %v2159_v21 = vadd.f32 %v351_v20, %v350_v19  ;;  %v2179_v36 = vadd.f32 %v516_v35, %v515_v34  ;;  %v682_v19 = vmul.f32 %v2213_v8, %v2213_v8  ;;  %v358_v20 = vrot.slane %v357_v7, 1 }
  0x98   : > { %1665 = vrcp.f32 %v338_v63  ;;  %v625_v28 = vrot.slane %v624_v15, 1  ;;  %v523_v29 = vrot.slane %v522_v11, 1  ;;  %v631_v30 = vadd.f32 %v630_v12, %v629_v6 }
  0x99   : > { %v372_v31 = vrot.slane %v371_v17, 4  ;;  %v683_v33 = vadd.f32 %v682_v19, %v681_v16  ;;  %v392_v34 = vsel %vm327_vm0, %v391_v18, 0.0  ;;  %v400_v35 = vrot.slane %v399_v27, 4 }
  0x9a   : > { %v626_v32 = vadd.f32 %v625_v28, %v624_v15  ;;  %v359_v39 = vadd.f32 %v358_v20, %v357_v7  ;;  %v380_v41 = vadd.f32 %v379_v26, %v378_v10  ;;  %v417_v42 = vadd.f32 %v416_v14, %v415_v13 }
  0x9b   : > { %v524_v44 = vadd.f32 %v523_v29, %v522_v11  ;;  %v632_v45 = vrot.slane %v631_v30, 1  ;;  %v684_v46 = vmul.f32 %v683_v33, %v2143_v0  ;;  %v692_v47 = vsel %vm327_vm0, %v683_v33, 0.0 }
  0x9c   : > { %v373_v48 = vadd.f32 %v372_v31, %v371_v17  ;;  %v393_v49 = vrot.slane %v392_v34, 4  ;;  %v693_v50 = vrot.slane %v692_v47, 4  ;;  %v401_v51 = vadd.f32 %v400_v35, %v399_v27 }
  0x9d   : > { %v437_v53 = vmul.f32 %v2190_v40, %v2146_v1  ;;  %v685_v54 = vsel %vm327_vm0, %v684_v46, 0.0  ;;  %v360_v55 = vsub.f32 %v359_v39, %v2159_v21  ;;  %v381_v56 = vrot.slane %v380_v41, 2 }
  0x9e   : > { %v418_v57 = vmul.f32 %v417_v42, %v2143_v0  ;;  %v525_v59 = vsub.f32 %v524_v44, %v2179_v36  ;;  %v633_v60 = vadd.f32 %v632_v45, %v631_v30  ;;  %v686_v61 = vrot.slane %v685_v54, 4 }
  0x9f   : > { %v694_v62 = vadd.f32 %v693_v50, %v692_v47  ;;  %v374_v63 = vrot.slane %v373_v48, 2  ;;  %v394_v3 = vadd.f32 %v393_v49, %v392_v34  ;;  %v463_v4 = vmul.f32 %v2210_v5, %v2146_v1 }
  0xa0   : > { %v2161_v22 = vpop.eup %1663  ;;  %v464_v6 = vmul.f32 %v2213_v8, %v2149_v2  ;;  %v402_v7 = vrot.slane %v401_v51, 2  ;;  %v687_v9 = vadd.f32 %v686_v61, %v685_v54  ;;  %v484_v12 = vmul.f32 %v2210_v5, %v2149_v2 }
  0xa1   : > { %v2165_v23 = vmul.f32 %v2161_v22, %v2159_v21  ;;  %v2183_v37 = vmul.f32 %v2161_v22, %v2179_v36  ;;  %v2229_v43 = vmul.f32 %v2161_v22, %v626_v32  ;;  %v438_v21 = vsub.f32 %v436_v52, %v437_v53 }
  0xa2   : > { %v2240_v58 = vpop.eup %1665  ;;  %v695_v10 = vrot.slane %v694_v62, 2  ;;  %v419_v36 = vsel %vm327_vm0, %v418_v57, 0.0  ;;  %v485_v13 = vmul.f32 %v2213_v8, %v2146_v1  ;;  %v634_v15 = vsub.f32 %v633_v60, %v626_v32 }
  0xa3   : > { %3500 = vst [vmem:[#allocation21_spill] sm:$0xff] %v2240_v58  ;;  %v2248_v11 = vmul.f32 %v2240_v58, %v360_v55  ;;  %v2256_v14 = vmul.f32 %v2240_v58, %v525_v59  ;;  %v688_v16 = vrot.slane %v687_v9, 2  ;;  %v375_v18 = vadd.f32 %v374_v63, %v373_v48 }
  0xa4   : > { %v696_v17 = vadd.f32 %v695_v10, %v694_v62  ;;  %v382_v19 = vadd.f32 %v381_v56, %v380_v41  ;;  %v465_v20 = vadd.f32 %v464_v6, %v463_v4  ;;  %v395_v26 = vrot.slane %v394_v3, 2 }
  0xa5   : > { %v439_v27 = vmul.f32 %v438_v21, %v2143_v0  ;;  %v689_v28 = vadd.f32 %v688_v16, %v687_v9  ;;  %v403_v30 = vadd.f32 %v402_v7, %v401_v51  ;;  %v420_v31 = vrot.slane %v419_v36, 4 }
  0xa6   : > { %v697_v29 = vrot.slane %v696_v17, 1  ;;  %v426_v2 = vsel %vm327_vm0, %v417_v42, 0.0  ;;  %v486_v33 = vsub.f32 %v484_v12, %v485_v13  ;;  %v2261_v1 = vmul.f32 %v2240_v58, %v634_v15 }
  0xa7   : > { %v690_v34 = vrot.slane %v689_v28, 1  ;;  %v702_v35 = vadd.f32 %v2256_v14, %v2248_v11  ;;  %v383_v39 = vrot.slane %v382_v19, 1  ;;  %v466_v41 = vmul.f32 %v465_v20, %v2143_v0 }
  0xa8   : > { %3501 = vst [vmem:[#allocation22_spill] sm:$0xff] %v2261_v1  ;;  %v698_v32 = vadd.f32 %v697_v29, %v696_v17  ;;  %v376_v44 = vrot.slane %v375_v18, 1  ;;  %v440_v45 = vsel %vm327_vm0, %v439_v27, 0.0  ;;  %v447_v46 = vsel %vm327_vm0, %v438_v21, 0.0 }
  0xa9   : > { %v691_v47 = vadd.f32 %v690_v34, %v689_v28  ;;  %v396_v48 = vadd.f32 %v395_v26, %v394_v3  ;;  %v404_v42 = vrot.slane %v403_v30, 1  ;;  %v427_v49 = vrot.slane %v426_v2, 4 }
  0xaa   : > { %v487_v50 = vmul.f32 %v486_v33, %v2143_v0  ;;  %v421_v51 = vadd.f32 %v420_v31, %v419_v36  ;;  %v703_v54 = vadd.f32 %v702_v35, %v2261_v1  ;;  %v441_v55 = vrot.slane %v440_v45, 4 }
  0xab   : > { %v699_v52 = vsub.f32 %v698_v32, %v691_v47  ;;  %v2270_v53 = vmul.f32 %v2161_v22, %v691_v47  ;;  %v448_v56 = vrot.slane %v447_v46, 4  ;;  %v467_v57 = vsel %vm327_vm0, %v466_v41, 0.0 }
  0xac   : > { %v528_v59 = vmul.f32 %v2186_v38, %v2168_v24  ;;  %v529_v60 = vmul.f32 %v2190_v40, %v2171_v25  ;;  %v549_v61 = vmul.f32 %v2186_v38, %v2171_v25  ;;  %v550_v62 = vmul.f32 %v2190_v40, %v2168_v24 }
  0xad   : > { %3502 = vst [vmem:[#allocation23_spill] sm:$0xff] %v2270_v53  ;;  %v701_v63 = vmul.f32 %v2240_v58, %v699_v52  ;;  %v377_v3 = vadd.f32 %v376_v44, %v375_v18  ;;  %v384_v4 = vadd.f32 %v383_v39, %v382_v19  ;;  %v397_v6 = vrot.slane %v396_v48, 1 }
  0xae   : > { %v488_v7 = vsel %vm327_vm0, %v487_v50, 0.0  ;;  %v2284_v21 = vadd.f32 %v404_v42, %v403_v30  ;;  %v422_v9 = vrot.slane %v421_v51, 2  ;;  %v428_v10 = vadd.f32 %v427_v49, %v426_v2 }
  0xaf   : > { %v704_v36 = vadd.f32 %v703_v54, %v701_v63  ;;  %v442_v12 = vadd.f32 %v441_v55, %v440_v45  ;;  %v449_v13 = vadd.f32 %v448_v56, %v447_v46  ;;  %v468_v15 = vrot.slane %v467_v57, 4 }
  0xb0   : > { %v474_v16 = vsel %vm327_vm0, %v465_v20, 0.0  ;;  %v489_v17 = vrot.slane %v488_v7, 4  ;;  %v2287_v26 = vadd.f32 %v529_v60, %v528_v59  ;;  %v2289_v27 = vsub.f32 %v549_v61, %v550_v62 }
  0xb1   : > { %v705_v18 = vmul.f32 1e-07, %v704_v36  ;;  %v572_v19 = vmul.f32 %v2210_v5, %v2168_v24  ;;  %v573_v28 = vmul.f32 %v2213_v8, %v2171_v25  ;;  %v593_v29 = vmul.f32 %v2210_v5, %v2171_v25 }
  0xb2   : > { %v594_v30 = vmul.f32 %v2213_v8, %v2168_v24  ;;  %v429_v31 = vrot.slane %v428_v10, 2  ;;  %v475_v20 = vrot.slane %v474_v16, 4  ;;  %v495_v2 = vsel %vm327_vm0, %v486_v33, 0.0 }
  0xb3   : > { %v2300_v34 = vadd.f32 1e-08, %v705_v18  ;;  %v423_v32 = vadd.f32 %v422_v9, %v421_v51  ;;  %v443_v35 = vrot.slane %v442_v12, 2  ;;  %v450_v39 = vrot.slane %v449_v13, 2 }
  0xb4   : > { %v469_v41 = vadd.f32 %v468_v15, %v467_v57  ;;  %v531_v44 = vmul.f32 %v2287_v26, %v2143_v0  ;;  %v552_v45 = vmul.f32 %v2289_v27, %v2143_v0  ;;  %v490_v33 = vadd.f32 %v489_v17, %v488_v7 }
  0xb5   : > { %3503 = vst [vmem:[#allocation24_spill] sm:$0xff] %v2300_v34  ;;  %v2308_v25 = vadd.f32 %v2300_v34, %v2248_v11  ;;  %v2311_v24 = vadd.f32 %v2300_v34, %v701_v63  ;;  %v496_v46 = vrot.slane %v495_v2, 4  ;;  %v2313_v47 = vadd.f32 %v573_v28, %v572_v19 }
  0xb6   : > { %v2315_v42 = vsub.f32 %v593_v29, %v594_v30  ;;  %v398_v49 = vadd.f32 %v397_v6, %v396_v48  ;;  %v430_v50 = vadd.f32 %v429_v31, %v428_v10  ;;  %v476_v51 = vadd.f32 %v475_v20, %v474_v16 }
  0xb7   : > { %3504 = vst [vmem:[#allocation25_spill] sm:$0xff] %v2311_v24  ;;  %v711_v52 = vmul.f32 %v2308_v25, %v2308_v25  ;;  %v385_v54 = vsub.f32 %v384_v4, %v377_v3  ;;  %v424_v55 = vrot.slane %v423_v32, 1  ;;  %v444_v56 = vadd.f32 %v443_v35, %v442_v12 }
  0xb8   : > { %v451_v11 = vadd.f32 %v450_v39, %v449_v13  ;;  %v470_v57 = vrot.slane %v469_v41, 2  ;;  %v532_v59 = vsel %vm327_vm0, %v531_v44, 0.0  ;;  %v553_v60 = vsel %vm327_vm0, %v552_v45, 0.0 }
  0xb9   : > { %1667 = vrcp.f32 %v711_v52  ;;  %v491_v61 = vrot.slane %v490_v33, 2  ;;  %v497_v62 = vadd.f32 %v496_v46, %v495_v2  ;;  %v575_v48 = vmul.f32 %v2313_v47, %v2143_v0 }
  0xba   : > { %v596_v63 = vmul.f32 %v2315_v42, %v2143_v0  ;;  %v2326_v6 = vmul.f32 %v2161_v22, %v377_v3  ;;  %v406_v4 = vsub.f32 %v2284_v21, %v398_v49  ;;  %v431_v7 = vrot.slane %v430_v50, 1 }
  0xbb   : > { %v477_v9 = vrot.slane %v476_v51, 2  ;;  %v445_v10 = vrot.slane %v444_v56, 1  ;;  %v452_v36 = vrot.slane %v451_v11, 1  ;;  %v533_v12 = vrot.slane %v532_v59, 4 }
  0xbc   : > { %v554_v13 = vrot.slane %v553_v60, 4  ;;  %v2330_v15 = vmul.f32 %v2240_v58, %v385_v54  ;;  %v2333_v16 = vmul.f32 %v2161_v22, %v398_v49  ;;  %v2335_v17 = vadd.f32 %v424_v55, %v423_v32 }
  0xbd   : > { %v471_v18 = vadd.f32 %v470_v57, %v469_v41  ;;  %v492_v19 = vadd.f32 %v491_v61, %v490_v33  ;;  %v498_v3 = vrot.slane %v497_v62, 2  ;;  %v576_v28 = vsel %vm327_vm0, %v575_v48, 0.0 }
  0xbe   : > { %v597_v21 = vsel %vm327_vm0, %v596_v63, 0.0  ;;  %v2339_v29 = vadd.f32 %v431_v7, %v430_v50  ;;  %v478_v30 = vadd.f32 %v477_v9, %v476_v51  ;;  %v637_v31 = vmul.f32 %v2210_v5, %v2186_v38 }
  0xbf   : > { %v638_v20 = vmul.f32 %v2213_v8, %v2190_v40  ;;  %v2345_v2 = vadd.f32 %v445_v10, %v444_v56  ;;  %v2347_v32 = vadd.f32 %v452_v36, %v451_v11  ;;  %v534_v35 = vadd.f32 %v533_v12, %v532_v59 }
  0xc0   : > { %v555_v39 = vadd.f32 %v554_v13, %v553_v60  ;;  %v2350_v41 = vmul.f32 %v2240_v58, %v406_v4  ;;  %v472_v44 = vrot.slane %v471_v18, 1  ;;  %v577_v45 = vrot.slane %v576_v28, 4 }
  0xc1   : > { %v598_v33 = vrot.slane %v597_v21, 4  ;;  %v2355_v49 = vmul.f32 %v2161_v22, %v2335_v17  ;;  %v493_v50 = vrot.slane %v492_v19, 1  ;;  %v499_v51 = vadd.f32 %v498_v3, %v497_v62 }
  0xc2   : > { %v2358_v54 = vsub.f32 0.0, %v2350_v41  ;;  %v479_v56 = vrot.slane %v478_v30, 1  ;;  %v2362_v11 = vadd.f32 %v638_v20, %v637_v31  ;;  %v2368_v59 = vmul.f32 %v2161_v22, %v2345_v2 }
  0xc3   : > { %v1668_v52 = vpop.eup %1667  ;;  %v535_v60 = vrot.slane %v534_v35, 2  ;;  %v556_v61 = vrot.slane %v555_v39, 2  ;;  %v2370_v62 = vadd.f32 %v472_v44, %v471_v18  ;;  %v578_v48 = vadd.f32 %v577_v45, %v576_v28 }
  0xc4   : > { %v599_v63 = vadd.f32 %v598_v33, %v597_v21  ;;  %v716_v4 = vmul.f32 0.0, %v1668_v52  ;;  %v2372_v7 = vadd.f32 %v493_v50, %v492_v19  ;;  %v500_v9 = vrot.slane %v499_v51, 1 }
  0xc5   : > { %v658_v10 = vmul.f32 %v2210_v5, %v2190_v40  ;;  %v659_v36 = vmul.f32 %v2213_v8, %v2186_v38  ;;  %v2378_v12 = vadd.f32 %v479_v56, %v478_v30  ;;  %v539_v13 = vsel %vm327_vm0, %v2287_v26, 0.0 }
  0xc6   : > { %v560_v18 = vsel %vm327_vm0, %v2289_v27, 0.0  ;;  %v640_v3 = vmul.f32 %v2362_v11, %v2143_v0  ;;  %v2388_v19 = vmul.f32 %v2161_v22, %v2370_v62  ;;  %v2392_v40 = vmul.f32 %v2161_v22, %v2372_v7 }
  0xc7   : > { %v536_v38 = vadd.f32 %v535_v60, %v534_v35  ;;  %v557_v5 = vadd.f32 %v556_v61, %v555_v39  ;;  %v579_v8 = vrot.slane %v578_v48, 2  ;;  %v600_v28 = vrot.slane %v599_v63, 2 }
  0xc8   : > { %3505 = vst [vmem:[#allocation26_spill] sm:$0xff] %v2388_v19  ;;  %3506 = vst [vmem:[#allocation27_spill] sm:$0xff] %v2392_v40  ;;  %v2395_v26 = vmul.f32 %v1668_v52, %v2308_v25  ;;  %v2397_v21 = vsub.f32 0.0, %v716_v4  ;;  %v2399_v27 = vadd.f32 %v500_v9, %v499_v51  ;;  %v540_v30 = vrot.slane %v539_v13, 4 }
  0xc9   : > { %v561_v31 = vrot.slane %v560_v18, 4  ;;  %v2401_v20 = vsub.f32 %v658_v10, %v659_v36  ;;  %v2405_v44 = vsel %vm327_vm0, %v2313_v47, 0.0  ;;  %v641_v35 = vsel %vm327_vm0, %v640_v3, 0.0 }
  0xca   : > { %v736_v39 = vmul.f32 %v2395_v26, %v2165_v23  ;;  %v737_v25 = vmul.f32 0.0, %v2397_v21  ;;  %v537_v45 = vrot.slane %v536_v38, 1  ;;  %v558_v33 = vrot.slane %v557_v5, 1 }
  0xcb   : > { %v745_v50 = vmul.f32 %v2395_v26, %v2388_v19  ;;  %v746_v51 = vmul.f32 %v2397_v21, %v2392_v40  ;;  %v580_v52 = vadd.f32 %v579_v8, %v578_v48  ;;  %v601_v56 = vadd.f32 %v600_v28, %v599_v63 }
  0xcc   : > { %v748_v47 = vmul.f32 %v2397_v21, %v2165_v23  ;;  %v749_v60 = vmul.f32 0.0, %v2395_v26  ;;  %v642_v61 = vrot.slane %v641_v35, 4  ;;  %v661_v4 = vmul.f32 %v2401_v20, %v2143_v0 }
  0xcd   : > { %v739_v9 = vmul.f32 %v2395_v26, %v2326_v6  ;;  %v2422_v10 = vsub.f32 %v745_v50, %v746_v51  ;;  %v2424_v36 = vsub.f32 %v736_v39, %v737_v25  ;;  %v740_v48 = vmul.f32 %v2397_v21, %v2333_v16 }
  0xce   : > { %v757_v63 = vmul.f32 %v2397_v21, %v2388_v19  ;;  %v758_v23 = vmul.f32 %v2395_v26, %v2392_v40  ;;  %v742_v3 = vmul.f32 %v2395_v26, %v2355_v49  ;;  %v743_v0 = vmul.f32 %v2397_v21, %v2368_v59 }
  0xcf   : > { %v751_v8 = vmul.f32 %v2397_v21, %v2326_v6  ;;  %v752_v28 = vmul.f32 %v2395_v26, %v2333_v16  ;;  %v2440_v39 = vadd.f32 %v749_v60, %v748_v47  ;;  %v754_v25 = vmul.f32 %v2397_v21, %v2355_v49 }
  0xd0   : > { %v755_v50 = vmul.f32 %v2395_v26, %v2368_v59  ;;  %v2446_v51 = vadd.f32 %v758_v23, %v757_v63  ;;  %v502_v55 = vsub.f32 %v2399_v27, %v2372_v7  ;;  %v541_v57 = vadd.f32 %v540_v30, %v539_v13 }
  0xd1   : > { %3507 = vst [vmem:[#allocation28_spill] sm:$0xff] %v2440_v39  ;;  %v581_v46 = vrot.slane %v580_v52, 1  ;;  %v584_v24 = vrot.slane %v2405_v44, 4  ;;  %v2451_v1 = vadd.f32 %v537_v45, %v536_v38  ;;  %v562_v53 = vadd.f32 %v561_v31, %v560_v18 }
  0xd2   : > { %v662_v47 = vsel %vm327_vm0, %v661_v4, 0.0  ;;  %v2454_v60 = vsub.f32 %v739_v9, %v740_v48  ;;  %v2456_v19 = vadd.f32 %v558_v33, %v557_v5  ;;  %v602_v40 = vrot.slane %v601_v56, 1 }
  0xd3   : > { %v643_v34 = vadd.f32 %v642_v61, %v641_v35  ;;  %v2458_v63 = vadd.f32 %v752_v28, %v751_v8  ;;  %v2460_v23 = vsub.f32 %v742_v3, %v743_v0  ;;  %v2462_v7 = vadd.f32 %v755_v50, %v754_v25 }
  0xd4   : > { %v784_v13 = vmul.f32 %v2424_v36, %v2330_v15  ;;  %v785_v18 = vmul.f32 %v2440_v39, %v2358_v54  ;;  %v2470_v38 = vmul.f32 %v2161_v22, %v2451_v1  ;;  %v2472_v5 = vadd.f32 %v581_v46, %v580_v52 }
  0xd5   : > { %3508 = vst [vmem:[#allocation29_spill] sm:$0xff] %v2460_v23  ;;  %v663_v27 = vrot.slane %v662_v47, 4  ;;  %v788_v30 = vmul.f32 %v2440_v39, %v2330_v15  ;;  %v2478_v31 = vmul.f32 %v2161_v22, %v2456_v19  ;;  %v789_v45 = vmul.f32 %v2424_v36, %v2358_v54 }
  0xd6   : > { %3509 = vst [vmem:[#allocation30_spill] sm:$0xff] %v2470_v38  ;;  %v786_v35 = vsub.f32 %v784_v13, %v785_v18  ;;  %v792_v33 = vmul.f32 %v2454_v60, %v2330_v15  ;;  %v2486_v61 = vmul.f32 %v2161_v22, %v2472_v5  ;;  %v2488_v46 = vadd.f32 %v602_v40, %v601_v56 }
  0xd7   : > { %v644_v52 = vrot.slane %v643_v34, 2  ;;  %v793_v4 = vmul.f32 %v2458_v63, %v2358_v54  ;;  %v790_v48 = vadd.f32 %v789_v45, %v788_v30  ;;  %v800_v3 = vmul.f32 %v2460_v23, %v2330_v15 }
  0xd8   : > { %3510 = vst [vmem:[#allocation31_spill] sm:$0xff] %v2486_v61  ;;  %v2493_v9 = vsub.f32 %v2326_v6, %v786_v35  ;;  %v801_v0 = vmul.f32 %v2462_v7, %v2358_v54  ;;  %v664_v8 = vadd.f32 %v663_v27, %v662_v47  ;;  %v804_v40 = vmul.f32 %v2462_v7, %v2330_v15 }
  0xd9   : > { %v794_v28 = vsub.f32 %v792_v33, %v793_v4  ;;  %v805_v56 = vmul.f32 %v2460_v23, %v2358_v54  ;;  %v3511_v25 = vsub.f32 0.0, %v2333_v16  ;;  %v808_v13 = vmul.f32 %v2422_v10, %v2330_v15 }
  0xda   : > { %v802_v6 = vsub.f32 %v800_v3, %v801_v0  ;;  %v809_v18 = vmul.f32 %v2446_v51, %v2358_v54  ;;  %v542_v30 = vrot.slane %v541_v57, 2  ;;  %v812_v35 = vmul.f32 %v2446_v51, %v2330_v15 }
  0xdb   : > { %v2505_v50 = vsub.f32 %v3511_v25, %v790_v48  ;;  %v2512_v47 = vsub.f32 %v2183_v37, %v794_v28  ;;  %v806_v27 = vadd.f32 %v805_v56, %v804_v40  ;;  %v2518_v16 = vmul.f32 %v2161_v22, %v2488_v46 }
  0xdc   : > { %v2521_v45 = vsub.f32 %v2470_v38, %v802_v6  ;;  %v810_v33 = vsub.f32 %v808_v13, %v809_v18  ;;  %v813_v4 = vmul.f32 %v2422_v10, %v2358_v54  ;;  %v2526_v48 = vadd.f32 %v584_v24, %v2405_v44 }
  0xdd   : > { %v645_v37 = vadd.f32 %v644_v52, %v643_v34  ;;  %v665_v3 = vrot.slane %v664_v8, 2  ;;  %v2529_v0 = vsub.f32 %v2478_v31, %v806_v27  ;;  %v3512_v28 = vsub.f32 %v2347_v32, %v2345_v2 }
  0xde   : > { %v563_v56 = vrot.slane %v562_v53, 2  ;;  %v2538_v25 = vsub.f32 %v2486_v61, %v810_v33  ;;  %v814_v6 = vadd.f32 %v813_v4, %v812_v35  ;;  %v3514_v24 = vsub.f32 %v2339_v29, %v2335_v17 }
  0xdf   : > { %v2535_v40 = vmul.f32 %v2240_v58, %v3512_v28  ;;  %v457_v44 = vsub.f32 0.0, %v2368_v59  ;;  %v604_v52 = vsel %vm327_vm0, %v2315_v42, 0.0  ;;  %v481_v32 = vsub.f32 %v2378_v12, %v2370_v62 }
  0xe0   : > { %3513 = vst [vmem:[#allocation32_spill] sm:$0xff] %v2538_v25  ;;  %v2544_v34 = vmul.f32 %v2240_v58, %v3514_v24  ;;  %v2555_v13 = vmul.f32 %v2240_v58, %v502_v55  ;;  %v2558_v18 = vsub.f32 %v2518_v16, %v814_v6  ;;  %v2560_v17 = vadd.f32 %v542_v30, %v541_v57 }
  0xe1   : > { %v2550_v2 = vsub.f32 0.0, %v2535_v40  ;;  %v586_v29 = vrot.slane %v2526_v48, 2  ;;  %v646_v59 = vrot.slane %v645_v37, 1  ;;  %v666_v27 = vadd.f32 %v665_v3, %v664_v8 }
  0xe2   : > { %3515 = vst [vmem:[#allocation33_spill] sm:$0xff] %v2558_v18  ;;  %v564_v35 = vadd.f32 %v563_v56, %v562_v53  ;;  %v605_v42 = vrot.slane %v604_v52, 4  ;;  %v648_v33 = vsel %vm327_vm0, %v2362_v11, 0.0  ;;  %v840_v62 = vmul.f32 %v2424_v36, %v2544_v34 }
  0xe3   : > { %v669_v55 = vsel %vm327_vm0, %v2401_v20, 0.0  ;;  %v841_v12 = vmul.f32 %v2440_v39, %v2550_v2  ;;  %v844_v57 = vmul.f32 %v2440_v39, %v2544_v34  ;;  %v845_v8 = vmul.f32 %v2424_v36, %v2550_v2 }
  0xe4   : > { %v718_v53 = vmul.f32 %v2395_v26, %v2330_v15  ;;  %v719_v11 = vmul.f32 %v2397_v21, %v2350_v41  ;;  %v721_v30 = vmul.f32 %v2397_v21, %v2330_v15  ;;  %v722_v20 = vmul.f32 %v2395_v26, %v2350_v41 }
  0xe5   : > { %v2583_v4 = vadd.f32 %v646_v59, %v645_v37  ;;  %v667_v3 = vrot.slane %v666_v27, 1  ;;  %v842_v28 = vsub.f32 %v840_v62, %v841_v12  ;;  %v846_v56 = vadd.f32 %v845_v8, %v844_v57 }
  0xe6   : > { %v606_v6 = vadd.f32 %v605_v42, %v604_v52  ;;  %v649_v24 = vrot.slane %v648_v33, 4  ;;  %v856_v61 = vmul.f32 %v2460_v23, %v2544_v34  ;;  %v857_v38 = vmul.f32 %v2462_v7, %v2550_v2 }
  0xe7   : > { %v2591_v18 = vmul.f32 %v2161_v22, %v2583_v4  ;;  %v670_v25 = vrot.slane %v669_v55, 4  ;;  %v2594_v41 = vsub.f32 %v2355_v49, %v842_v28  ;;  %v2596_v37 = vsub.f32 %v457_v44, %v846_v56 }
  0xe8   : > { %v2598_v59 = vsub.f32 %v718_v53, %v719_v11  ;;  %v2600_v52 = vadd.f32 %v722_v20, %v721_v30  ;;  %v858_v42 = vsub.f32 %v856_v61, %v857_v38  ;;  %v864_v62 = vmul.f32 %v2422_v10, %v2544_v34 }
  0xe9   : > { %3516 = vst [vmem:[#allocation34_spill] sm:$0xff] %v2591_v18  ;;  %3517 = vst [vmem:[#allocation35_spill] sm:$0xff] %v2594_v41  ;;  %v2604_v12 = vadd.f32 %v667_v3, %v666_v27  ;;  %v865_v57 = vmul.f32 %v2446_v51, %v2550_v2  ;;  %v868_v8 = vmul.f32 %v2446_v51, %v2544_v34  ;;  %v565_v44 = vrot.slane %v564_v35, 1 }
  0xea   : > { %3518 = vst [vmem:[#allocation36_spill] sm:$0xff] %v2596_v37  ;;  %3519 = vst [vmem:[#allocation37_spill] sm:$0xff] %v2598_v59  ;;  %v869_v49 = vmul.f32 %v2422_v10, %v2550_v2  ;;  %v607_v53 = vrot.slane %v606_v6, 2  ;;  %v650_v11 = vadd.f32 %v649_v24, %v648_v33  ;;  %v2613_v30 = vsub.f32 %v2229_v43, %v858_v42 }
  0xeb   : > { %3520 = vst [vmem:[#allocation38_spill] sm:$0xff] %v2600_v52  ;;  %3521 = vst [vmem:[#allocation39_spill] sm:$0xff] %v2604_v12  ;;  %v671_v38 = vadd.f32 %v670_v25, %v669_v55  ;;  %v2617_v61 = vmul.f32 %v2161_v22, %v2604_v12  ;;  %v866_v27 = vsub.f32 %v864_v62, %v865_v57  ;;  %v2638_v56 = vsub.f32 0.0, %v2555_v13 }
  0xec   : > { %3522 = vst [vmem:[#allocation40_spill] sm:$0xff] %v2613_v30  ;;  %v2619_v20 = vadd.f32 %v869_v49, %v868_v8  ;;  %v760_v3 = vmul.f32 %v2598_v59, %v2330_v15  ;;  %v761_v28 = vmul.f32 %v2600_v52, %v2358_v54  ;;  %v764_v33 = vmul.f32 %v2600_v52, %v2330_v15 }
  0xed   : > { %v765_v43 = vmul.f32 %v2598_v59, %v2358_v54  ;;  %v2630_v25 = vmul.f32 %v2240_v58, %v481_v32  ;;  %v2633_v22 = vsub.f32 %v2591_v18, %v866_v27  ;;  %v544_v24 = vrot.slane %v2560_v17, 1  ;;  %v3525_v32 = vld [vmem:[#allocation24_spill] sm:$0xff] }
  0xee   : > { %3523 = vst [vmem:[#allocation41_spill] sm:$0xff] %v2619_v20  ;;  %v566_v42 = vadd.f32 %v565_v44, %v564_v35  ;;  %v587_v62 = vadd.f32 %v586_v29, %v2526_v48  ;;  %v608_v57 = vadd.f32 %v607_v53, %v606_v6  ;;  %v651_v8 = vrot.slane %v650_v11, 2  ;;  %v3526_v20 = vld [vmem:[#allocation27_spill] sm:$0xff] }
  0xef   : > { %3524 = vst [vmem:[#allocation42_spill] sm:$0xff] %v2633_v22  ;;  %v672_v49 = vrot.slane %v671_v38, 2  ;;  %v708_v30 = vadd.f32 %v3525_v32, %v2256_v14  ;;  %v762_v37 = vsub.f32 %v760_v3, %v761_v28  ;;  %v766_v27 = vadd.f32 %v765_v43, %v764_v33 }
  0xf0   : > { %v896_v22 = vmul.f32 %v2424_v36, %v2630_v25  ;;  %v897_v55 = vmul.f32 %v2440_v39, %v2638_v56  ;;  %v505_v18 = vsub.f32 0.0, %v3526_v20  ;;  %v900_v35 = vmul.f32 %v2440_v39, %v2630_v25  ;;  %v3527_v20 = vld [vmem:[#allocation26_spill] sm:$0xff] }
  0xf1   : > { %v901_v48 = vmul.f32 %v2424_v36, %v2638_v56  ;;  %v545_v29 = vadd.f32 %v544_v24, %v2560_v17  ;;  %v588_v6 = vrot.slane %v587_v62, 1  ;;  %v567_v44 = vsub.f32 %v566_v42, %v2456_v19 }
  0xf2   : > { %v898_v14 = vsub.f32 %v896_v22, %v897_v55  ;;  %v609_v53 = vrot.slane %v608_v57, 1  ;;  %v652_v3 = vadd.f32 %v651_v8, %v650_v11  ;;  %v673_v33 = vadd.f32 %v672_v49, %v671_v38 }
  0xf3   : > { %v902_v28 = vadd.f32 %v901_v48, %v900_v35  ;;  %v2655_v43 = vsub.f32 %v708_v30, %v762_v37  ;;  %v2657_v41 = vsub.f32 0.0, %v766_v27  ;;  %v724_v39 = vmul.f32 %v2395_v26, %v2544_v34 }
  0xf4   : > { %v2660_v23 = vsub.f32 %v3527_v20, %v898_v14  ;;  %v728_v17 = vmul.f32 %v2395_v26, %v2535_v40  ;;  %v730_v19 = vmul.f32 %v2395_v26, %v2630_v25  ;;  %v725_v37 = vmul.f32 %v2397_v21, %v2535_v40 }
  0xf5   : > { %v2668_v22 = vsub.f32 %v505_v18, %v902_v28  ;;  %v727_v11 = vmul.f32 %v2397_v21, %v2544_v34  ;;  %v920_v30 = vmul.f32 %v2422_v10, %v2630_v25  ;;  %v921_v38 = vmul.f32 %v2446_v51, %v2638_v56 }
  0xf6   : > { %3528 = vst [vmem:[#allocation24_spill] sm:$0xff] %v2660_v23  ;;  %v731_v55 = vmul.f32 %v2397_v21, %v2555_v13  ;;  %v734_v24 = vmul.f32 %v2395_v26, %v2555_v13  ;;  %v924_v18 = vmul.f32 %v2446_v51, %v2630_v25  ;;  %v925_v40 = vmul.f32 %v2422_v10, %v2638_v56  ;;  %v3532_v10 = vld [vmem:[#allocation23_spill] sm:$0xff] }
  0xf7   : > { %3529 = vst [vmem:[#allocation27_spill] sm:$0xff] %v2668_v22  ;;  %v733_v42 = vmul.f32 %v2397_v21, %v2630_v25  ;;  %v922_v8 = vsub.f32 %v920_v30, %v921_v38  ;;  %v928_v49 = vmul.f32 %v2655_v43, %v2655_v43  ;;  %v929_v27 = vmul.f32 %v2657_v41, %v2657_v41 }
  0xf8   : > { %v546_v35 = vsub.f32 %v545_v29, %v2451_v1  ;;  %v589_v48 = vadd.f32 %v588_v6, %v587_v62  ;;  %v610_v26 = vadd.f32 %v609_v53, %v608_v57  ;;  %v2693_v13 = vadd.f32 %v925_v40, %v924_v18 }
  0xf9   : > { %v2695_v51 = vsub.f32 %v724_v39, %v725_v37  ;;  %v2697_v14 = vadd.f32 %v728_v17, %v727_v11  ;;  %v2700_v28 = vsub.f32 %v3532_v10, %v922_v8  ;;  %v930_v21 = vadd.f32 %v929_v27, %v928_v49 }
  0xfa   : > { %v653_v20 = vrot.slane %v652_v3, 1  ;;  %v674_v30 = vrot.slane %v673_v33, 1  ;;  %v569_v38 = vmul.f32 %v2240_v58, %v567_v44  ;;  %v2703_v22 = vsub.f32 %v730_v19, %v731_v55 }
  0xfb   : > { %3530 = vst [vmem:[#allocation26_spill] sm:$0xff] %v2695_v51  ;;  %3531 = vst [vmem:[#allocation43_spill] sm:$0xff] %v2697_v14  ;;  %v2705_v23 = vadd.f32 %v734_v24, %v733_v42  ;;  %1669 = vrcp.f32 %v930_v21  ;;  %v548_v1 = vmul.f32 %v2240_v58, %v546_v35  ;;  %v590_v62 = vsub.f32 %v589_v48, %v2472_v5 }
  0xfc   : > { %3533 = vst [vmem:[#allocation23_spill] sm:$0xff] %v2700_v28  ;;  %v571_v57 = vsub.f32 0.0, %v569_v38  ;;  %v611_v29 = vsub.f32 %v610_v26, %v2488_v46  ;;  %v768_v6 = vmul.f32 %v2695_v51, %v2330_v15  ;;  %v769_v44 = vmul.f32 %v2697_v14, %v2358_v54 }
  0xfd   : > { %3534 = vst [vmem:[#allocation44_spill] sm:$0xff] %v2705_v23  ;;  %v2715_v53 = vadd.f32 %v653_v20, %v652_v3  ;;  %v2717_v17 = vadd.f32 %v674_v30, %v673_v33  ;;  %v772_v19 = vmul.f32 %v2697_v14, %v2330_v15  ;;  %v773_v37 = vmul.f32 %v2695_v51, %v2358_v54 }
  0xfe   : > { %v776_v5 = vmul.f32 %v2703_v22, %v2330_v15  ;;  %v777_v46 = vmul.f32 %v2705_v23, %v2358_v54  ;;  %v796_v11 = vmul.f32 %v2458_v63, %v2330_v15  ;;  %v797_v3 = vmul.f32 %v2454_v60, %v2358_v54 }
  0xff   : > { %3535 = vst [vmem:[#allocation45_spill] sm:$0xff] %v2717_v17  ;;  %v780_v33 = vmul.f32 %v2705_v23, %v2330_v15  ;;  %v781_v55 = vmul.f32 %v2703_v22, %v2358_v54  ;;  %v816_v24 = vmul.f32 %v2598_v59, %v2544_v34  ;;  %v817_v18 = vmul.f32 %v2600_v52, %v2550_v2  ;;  %v3536_v54 = vld [vmem:[#allocation22_spill] sm:$0xff] }
 0x100   : > { %v2740_v40 = vmul.f32 %v2240_v58, %v611_v29  ;;  %v770_v42 = vsub.f32 %v768_v6, %v769_v44  ;;  %v820_v8 = vmul.f32 %v2600_v52, %v2544_v34  ;;  %v821_v49 = vmul.f32 %v2598_v59, %v2550_v2 }
 0x101   : > { %v2747_v15 = vmul.f32 %v2240_v58, %v590_v62  ;;  %v824_v27 = vmul.f32 %v2695_v51, %v2544_v34  ;;  %v825_v35 = vmul.f32 %v2697_v14, %v2550_v2  ;;  %v774_v26 = vadd.f32 %v773_v37, %v772_v19 }
 0x102   : > { %v778_v10 = vsub.f32 %v776_v5, %v777_v46  ;;  %v798_v21 = vadd.f32 %v797_v3, %v796_v11  ;;  %v782_v62 = vadd.f32 %v781_v55, %v780_v33  ;;  %v818_v29 = vsub.f32 %v816_v24, %v817_v18 }
 0x103   : > { %v709_v39 = vadd.f32 %v3525_v32, %v3536_v54  ;;  %v771_v58 = vsub.f32 %v548_v1, %v770_v42  ;;  %v822_v28 = vadd.f32 %v821_v49, %v820_v8  ;;  %v826_v48 = vsub.f32 %v824_v27, %v825_v35 }
 0x104   : > { %v828_v19 = vmul.f32 %v2697_v14, %v2544_v34  ;;  %v829_v37 = vmul.f32 %v2695_v51, %v2550_v2  ;;  %v775_v46 = vsub.f32 %v569_v38, %v774_v26  ;;  %v2768_v11 = vsub.f32 %v2747_v15, %v778_v10  ;;  %v3537_v10 = vld [vmem:[#allocation32_spill] sm:$0xff] }
 0x105   : > { %v1670_v6 = vpop.eup %1669  ;;  %v799_v3 = vsub.f32 0.0, %v798_v21  ;;  %v2774_v32 = vsub.f32 %v2740_v40, %v782_v62  ;;  %v2776_v55 = vsub.f32 %v548_v1, %v818_v29  ;;  %v848_v24 = vmul.f32 %v2454_v60, %v2544_v34 }
 0x106   : > { %v934_v5 = vmul.f32 %v1670_v6, %v2657_v41  ;;  %v2771_v33 = vmul.f32 %v1670_v6, %v2655_v43  ;;  %v849_v18 = vmul.f32 %v2458_v63, %v2550_v2  ;;  %v2790_v8 = vsub.f32 %v571_v57, %v822_v28 }
 0x107   : > { %v2792_v1 = vsub.f32 %v709_v39, %v826_v48  ;;  %v2794_v49 = vadd.f32 %v829_v37, %v828_v19  ;;  %v852_v54 = vmul.f32 %v2458_v63, %v2544_v34  ;;  %v853_v39 = vmul.f32 %v2454_v60, %v2550_v2  ;;  %v3538_v48 = vld [vmem:[#allocation29_spill] sm:$0xff] }
 0x108   : > { %v2782_v41 = vsub.f32 0.0, %v934_v5  ;;  %v948_v38 = vmul.f32 %v2771_v33, %v2493_v9  ;;  %v951_v43 = vmul.f32 %v2771_v33, %v2512_v47  ;;  %v954_v42 = vmul.f32 %v2771_v33, %v2521_v45  ;;  %v3539_v37 = vld [vmem:[#allocation33_spill] sm:$0xff] }
 0x109   : > { %v957_v21 = vmul.f32 %v2771_v33, %v3537_v10  ;;  %v850_v28 = vsub.f32 %v848_v24, %v849_v18  ;;  %v860_v57 = vmul.f32 %v2462_v7, %v2544_v34  ;;  %v861_v62 = vmul.f32 %v3538_v48, %v2550_v2 }
 0x10a   : > { %v949_v27 = vmul.f32 %v2782_v41, %v2505_v50  ;;  %v952_v35 = vmul.f32 %v2782_v41, %v799_v3  ;;  %v955_v26 = vmul.f32 %v2782_v41, %v2529_v0  ;;  %v958_v5 = vmul.f32 %v2782_v41, %v3539_v37 }
 0x10b   : > { %v960_v24 = vmul.f32 %v2782_v41, %v2493_v9  ;;  %v961_v18 = vmul.f32 %v2771_v33, %v2505_v50  ;;  %v963_v30 = vmul.f32 %v2782_v41, %v2512_v47  ;;  %v964_v20 = vmul.f32 %v2771_v33, %v799_v3  ;;  %v3540_v3 = vld [vmem:[#allocation30_spill] sm:$0xff] }
 0x10c   : > { %v2811_v29 = vsub.f32 %v948_v38, %v949_v27  ;;  %v2813_v6 = vsub.f32 %v951_v43, %v952_v35  ;;  %v2815_v19 = vsub.f32 %v954_v42, %v955_v26  ;;  %v2826_v38 = vsub.f32 %v957_v21, %v958_v5 }
 0x10d   : > { %v966_v43 = vmul.f32 %v2782_v41, %v2521_v45  ;;  %v967_v42 = vmul.f32 %v2771_v33, %v2529_v0  ;;  %v969_v27 = vmul.f32 %v2782_v41, %v3537_v10  ;;  %v854_v9 = vadd.f32 %v853_v39, %v852_v54 }
 0x10e   : > { %v2834_v35 = vadd.f32 %v961_v18, %v960_v24  ;;  %v2836_v50 = vadd.f32 %v964_v20, %v963_v30  ;;  %v970_v47 = vmul.f32 %v2771_v33, %v3539_v37  ;;  %v851_v26 = vsub.f32 %v3540_v3, %v850_v28 }
 0x10f   : > { %v2841_v21 = vadd.f32 %v861_v62, %v860_v57  ;;  %v2845_v45 = vmul.f32 %v2598_v59, %v2630_v25  ;;  %v2847_v0 = vadd.f32 %v967_v42, %v966_v43  ;;  %v2851_v54 = vmul.f32 %v2600_v52, %v2638_v56 }
 0x110   : > { %v876_v20 = vmul.f32 %v2600_v52, %v2630_v25  ;;  %v877_v30 = vmul.f32 %v2598_v59, %v2638_v56  ;;  %v2857_v10 = vadd.f32 %v970_v47, %v969_v27  ;;  %v936_v28 = vmul.f32 %v2771_v33, %v771_v58 }
 0x111   : > { %v937_v39 = vmul.f32 %v2782_v41, %v775_v46  ;;  %v940_v57 = vmul.f32 %v2771_v33, %v775_v46  ;;  %v988_v62 = vmul.f32 %v2811_v29, %v2598_v59  ;;  %v939_v37 = vmul.f32 %v2782_v41, %v771_v58 }
 0x112   : > { %v989_v5 = vmul.f32 %v2834_v35, %v2600_v52  ;;  %v992_v24 = vmul.f32 %v2834_v35, %v2598_v59  ;;  %v993_v18 = vmul.f32 %v2811_v29, %v2600_v52  ;;  %v904_v43 = vmul.f32 %v2454_v60, %v2630_v25 }
 0x113   : > { %v905_v46 = vmul.f32 %v2458_v63, %v2638_v56  ;;  %v908_v42 = vmul.f32 %v2458_v63, %v2630_v25  ;;  %v909_v58 = vmul.f32 %v2454_v60, %v2638_v56  ;;  %v912_v27 = vmul.f32 %v3538_v48, %v2630_v25 }
 0x114   : > { %v913_v47 = vmul.f32 %v2462_v7, %v2638_v56  ;;  %v990_v3 = vsub.f32 %v988_v62, %v989_v5  ;;  %v2883_v44 = vadd.f32 %v993_v18, %v992_v24  ;;  %v3542_v52 = vsub.f32 0.0, %v2478_v31 }
 0x115   : > { %v916_v14 = vmul.f32 %v2462_v7, %v2630_v25  ;;  %v917_v63 = vmul.f32 %v3538_v48, %v2638_v56  ;;  %v2891_v51 = vsub.f32 %v936_v28, %v937_v39  ;;  %v863_v60 = vsub.f32 0.0, %v2841_v21 }
 0x116   : > { %3541 = vst [vmem:[#allocation22_spill] sm:$0xff] %v2883_v44  ;;  %v855_v59 = vsub.f32 %v3542_v52, %v854_v9  ;;  %v2894_v12 = vadd.f32 %v940_v57, %v939_v37  ;;  %v2897_v17 = vsub.f32 %v2424_v36, %v990_v3  ;;  %v874_v31 = vsub.f32 %v2845_v45, %v2851_v54 }
 0x117   : > { %v878_v52 = vadd.f32 %v877_v30, %v876_v20  ;;  %v906_v7 = vsub.f32 %v904_v43, %v905_v46  ;;  %v1012_v48 = vmul.f32 %v2811_v29, %v2776_v55  ;;  %v910_v9 = vadd.f32 %v909_v58, %v908_v42  ;;  %v3545_v42 = vld [vmem:[#allocation35_spill] sm:$0xff] }
 0x118   : > { %3543 = vst [vmem:[#allocation32_spill] sm:$0xff] %v2897_v17  ;;  %v914_v28 = vsub.f32 %v912_v27, %v913_v47  ;;  %v1013_v21 = vmul.f32 %v2834_v35, %v2790_v8  ;;  %v1016_v36 = vmul.f32 %v2834_v35, %v2776_v55  ;;  %v918_v39 = vadd.f32 %v917_v63, %v916_v14  ;;  %v3546_v63 = vld [vmem:[#allocation36_spill] sm:$0xff]  ;;  %v3551_v17 = vld [vmem:[#allocation31_spill] sm:$0xff] }
 0x119   : > { %v996_v57 = vmul.f32 %v2891_v51, %v2776_v55  ;;  %v1017_v45 = vmul.f32 %v2811_v29, %v2790_v8  ;;  %v1020_v54 = vmul.f32 %v2813_v6, %v2776_v55  ;;  %v997_v20 = vmul.f32 %v2894_v12, %v2790_v8 }
 0x11a   : > { %v1014_v30 = vsub.f32 %v1012_v48, %v1013_v21  ;;  %v1021_v37 = vmul.f32 %v2836_v50, %v2790_v8  ;;  %v1024_v24 = vmul.f32 %v2836_v50, %v2776_v55  ;;  %v1000_v14 = vmul.f32 %v2894_v12, %v2776_v55 }
 0x11b   : > { %v1018_v18 = vadd.f32 %v1017_v45, %v1016_v36  ;;  %v1025_v43 = vmul.f32 %v2813_v6, %v2790_v8  ;;  %v1028_v46 = vmul.f32 %v2815_v19, %v2776_v55  ;;  %v1029_v47 = vmul.f32 %v2847_v0, %v2790_v8 }
 0x11c   : > { %v2928_v58 = vsub.f32 %v3545_v42, %v1014_v30  ;;  %v1022_v27 = vsub.f32 %v1020_v54, %v1021_v37  ;;  %v1032_v3 = vmul.f32 %v2847_v0, %v2776_v55  ;;  %v1033_v36 = vmul.f32 %v2815_v19, %v2790_v8 }
 0x11d   : > { %v2935_v48 = vsub.f32 %v3546_v63, %v1018_v18  ;;  %v1026_v21 = vadd.f32 %v1025_v43, %v1024_v24  ;;  %v1036_v45 = vmul.f32 %v2826_v38, %v2776_v55  ;;  %v1030_v30 = vsub.f32 %v1028_v46, %v1029_v47  ;;  %v3549_v46 = vld [vmem:[#allocation40_spill] sm:$0xff] }
 0x11e   : > { %v2941_v5 = vsub.f32 %v851_v26, %v1022_v27  ;;  %v1037_v54 = vmul.f32 %v2857_v10, %v2790_v8  ;;  %v1040_v37 = vmul.f32 %v2857_v10, %v2776_v55  ;;  %v1001_v18 = vmul.f32 %v2891_v51, %v2790_v8 }
 0x11f   : > { %3547 = vst [vmem:[#allocation29_spill] sm:$0xff] %v2935_v48  ;;  %v2949_v42 = vsub.f32 %v855_v59, %v1026_v21  ;;  %v1034_v24 = vadd.f32 %v1033_v36, %v1032_v3  ;;  %v1041_v43 = vmul.f32 %v2826_v38, %v2790_v8  ;;  %v831_v63 = vsub.f32 0.0, %v2794_v49  ;;  %v3553_v49 = vld [vmem:[#allocation34_spill] sm:$0xff] }
 0x120   : > { %v2955_v26 = vsub.f32 %v2747_v15, %v874_v31  ;;  %v2958_v27 = vsub.f32 %v3549_v46, %v1030_v30  ;;  %v1038_v47 = vsub.f32 %v1036_v45, %v1037_v54  ;;  %v3550_v44 = vsub.f32 0.0, %v2740_v40  ;;  %v3554_v48 = vld [vmem:[#allocation42_spill] sm:$0xff] }
 0x121   : > { %3548 = vst [vmem:[#allocation33_spill] sm:$0xff] %v2949_v42  ;;  %v907_v59 = vsub.f32 %v3551_v17, %v906_v7  ;;  %v2965_v21 = vsub.f32 %v863_v60, %v1034_v24  ;;  %v1042_v3 = vadd.f32 %v1041_v43, %v1040_v37  ;;  %v3552_v36 = vsub.f32 0.0, %v2518_v16  ;;  %v3556_v17 = vld [vmem:[#allocation41_spill] sm:$0xff]  ;;  %v3558_v43 = vld [vmem:[#allocation24_spill] sm:$0xff] }
 0x122   : > { %v2962_v62 = vsub.f32 %v3550_v44, %v878_v52  ;;  %v915_v15 = vsub.f32 %v3553_v49, %v914_v28  ;;  %v998_v31 = vsub.f32 %v996_v57, %v997_v20  ;;  %v2973_v30 = vsub.f32 %v3554_v48, %v1038_v47 }
 0x123   : > { %v2969_v42 = vsub.f32 %v3552_v36, %v910_v9  ;;  %v3555_v45 = vsub.f32 0.0, %v2617_v61  ;;  %v1002_v44 = vadd.f32 %v1001_v18, %v1000_v14  ;;  %v3557_v60 = vsub.f32 %v2617_v61, %v3556_v17 }
 0x124   : > { %v1060_v16 = vmul.f32 %v2811_v29, %v2955_v26  ;;  %v927_v7 = vsub.f32 0.0, %v2693_v13  ;;  %v942_v9 = vmul.f32 %v2771_v33, %v2768_v11  ;;  %v1061_v28 = vmul.f32 %v2834_v35, %v2962_v62 }
 0x125   : > { %v2977_v40 = vsub.f32 %v3555_v45, %v918_v39  ;;  %v2982_v52 = vsub.f32 %v3557_v60, %v1042_v3  ;;  %v1064_v39 = vmul.f32 %v2834_v35, %v2955_v26  ;;  %v943_v57 = vmul.f32 %v2782_v41, %v2774_v32 }
 0x126   : > { %v946_v61 = vmul.f32 %v2771_v33, %v2774_v32  ;;  %v1065_v20 = vmul.f32 %v2811_v29, %v2962_v62  ;;  %v1068_v13 = vmul.f32 %v2813_v6, %v2955_v26  ;;  %v3002_v14 = vsub.f32 %v2792_v1, %v998_v31 }
 0x127   : > { %v1062_v48 = vsub.f32 %v1060_v16, %v1061_v28  ;;  %v1069_v54 = vmul.f32 %v2836_v50, %v2962_v62  ;;  %v1072_v37 = vmul.f32 %v2836_v50, %v2955_v26  ;;  %v3008_v18 = vsub.f32 %v831_v63, %v1002_v44  ;;  %v3559_v63 = vld [vmem:[#allocation27_spill] sm:$0xff] }
 0x128   : > { %v3010_v24 = vadd.f32 %v1065_v20, %v1064_v39  ;;  %v1073_v33 = vmul.f32 %v2813_v6, %v2962_v62  ;;  %v1076_v32 = vmul.f32 %v2815_v19, %v2955_v26  ;;  %v1077_v47 = vmul.f32 %v2847_v0, %v2962_v62 }
 0x129   : > { %v3017_v1 = vsub.f32 %v3558_v43, %v1062_v48  ;;  %v1070_v46 = vsub.f32 %v1068_v13, %v1069_v54  ;;  %v1080_v3 = vmul.f32 %v2847_v0, %v2955_v26  ;;  %v1081_v31 = vmul.f32 %v2815_v19, %v2962_v62 }
 0x12a   : > { %v3025_v49 = vadd.f32 %v1073_v33, %v1072_v37  ;;  %v1084_v45 = vmul.f32 %v2826_v38, %v2955_v26  ;;  %v1078_v17 = vsub.f32 %v1076_v32, %v1077_v47  ;;  %v1085_v60 = vmul.f32 %v2857_v10, %v2962_v62 }
 0x12b   : > { %v3031_v44 = vsub.f32 %v907_v59, %v1070_v46  ;;  %v1088_v0 = vmul.f32 %v2857_v10, %v2955_v26  ;;  %v3039_v28 = vadd.f32 %v1081_v31, %v1080_v3  ;;  %v1089_v19 = vmul.f32 %v2826_v38, %v2962_v62  ;;  %v3564_v31 = vld [vmem:[#allocation21_spill] sm:$0xff] }
 0x12c   : > { %v1092_v39 = vmul.f32 %v3002_v14, %v3002_v14  ;;  %v945_v59 = vmul.f32 %v2782_v41, %v2768_v11  ;;  %v3047_v20 = vsub.f32 %v915_v15, %v1078_v17  ;;  %v1086_v13 = vsub.f32 %v1084_v45, %v1085_v60  ;;  %v3560_v41 = vld [vmem:[#allocation23_spill] sm:$0xff] }
 0x12d   : > { %v1093_v10 = vmul.f32 %v3008_v18, %v3008_v18  ;;  %v832_v48 = vmul.f32 %v2703_v22, %v2544_v34  ;;  %v833_v54 = vmul.f32 %v2705_v23, %v2550_v2  ;;  %v1090_v37 = vadd.f32 %v1089_v19, %v1088_v0  ;;  %v3566_v17 = vld [vmem:[#allocation39_spill] sm:$0xff]  ;;  %v3568_v0 = vld [vmem:[#allocation26_spill] sm:$0xff] }
 0x12e   : > { %v836_v33 = vmul.f32 %v2705_v23, %v2544_v34  ;;  %v837_v11 = vmul.f32 %v2703_v22, %v2550_v2  ;;  %v3062_v15 = vsub.f32 %v3560_v41, %v1086_v13  ;;  %v3066_v46 = vsub.f32 %v942_v9, %v943_v57  ;;  %v3565_v34 = vld [vmem:[#allocation45_spill] sm:$0xff]  ;;  %v3571_v13 = vld [vmem:[#allocation38_spill] sm:$0xff] }
 0x12f   : > { %v1094_v32 = vadd.f32 %v1093_v10, %v1092_v39  ;;  %v3064_v43 = vsub.f32 %v927_v7, %v1090_v37  ;;  %v3068_v47 = vadd.f32 %v946_v61, %v945_v59  ;;  %v3563_v3 = vsub.f32 %v2715_v53, %v2583_v4  ;;  %v3569_v7 = vld [vmem:[#allocation43_spill] sm:$0xff]  ;;  %v3570_v53 = vld [vmem:[#allocation37_spill] sm:$0xff] }
 0x130   : > { %3561 = vst [vmem:[#allocation30_spill] sm:$0xff] %v3062_v15  ;;  %v3567_v60 = vsub.f32 %v3565_v34, %v3566_v17  ;;  %v880_v19 = vmul.f32 %v3568_v0, %v2630_v25  ;;  %v881_v9 = vmul.f32 %v3569_v7, %v2638_v56  ;;  %v834_v57 = vsub.f32 %v832_v48, %v833_v54 }
 0x131   : > { %3562 = vst [vmem:[#allocation35_spill] sm:$0xff] %v3064_v43  ;;  %1671 = vrcp.f32 %v1094_v32  ;;  %v657_v45 = vmul.f32 %v3564_v31, %v3563_v3  ;;  %v838_v61 = vadd.f32 %v837_v11, %v836_v33  ;;  %v884_v39 = vmul.f32 %v3569_v7, %v2630_v25 }
 0x132   : > { %v678_v2 = vmul.f32 %v3564_v31, %v3567_v60  ;;  %v885_v4 = vmul.f32 %v3568_v0, %v2638_v56  ;;  %v972_v59 = vmul.f32 %v2891_v51, %v3570_v53  ;;  %v973_v10 = vmul.f32 %v2894_v12, %v3571_v13 }
 0x133   : > { %v976_v37 = vmul.f32 %v2894_v12, %v3570_v53  ;;  %v977_v41 = vmul.f32 %v2891_v51, %v3571_v13  ;;  %v1004_v48 = vmul.f32 %v3066_v46, %v2776_v55  ;;  %v1005_v54 = vmul.f32 %v3068_v47, %v2790_v8 }
 0x134   : > { %v1008_v33 = vmul.f32 %v3068_v47, %v2776_v55  ;;  %v1009_v11 = vmul.f32 %v3066_v46, %v2790_v8  ;;  %v680_v32 = vsub.f32 0.0, %v678_v2  ;;  %v882_v3 = vsub.f32 %v880_v19, %v881_v9 }
 0x135   : > { %v3104_v31 = vmul.f32 %v2703_v22, %v2630_v25  ;;  %v886_v34 = vadd.f32 %v885_v4, %v884_v39  ;;  %v3108_v17 = vmul.f32 %v2705_v23, %v2638_v56  ;;  %v892_v60 = vmul.f32 %v2705_v23, %v2630_v25 }
 0x136   : > { %v893_v55 = vmul.f32 %v2703_v22, %v2638_v56  ;;  %v974_v38 = vsub.f32 %v972_v59, %v973_v10  ;;  %v978_v16 = vadd.f32 %v977_v41, %v976_v37  ;;  %v835_v8 = vsub.f32 %v657_v45, %v834_v57 }
 0x137   : > { %v839_v36 = vsub.f32 %v678_v2, %v838_v61  ;;  %v1006_v19 = vsub.f32 %v1004_v48, %v1005_v54  ;;  %v1010_v9 = vadd.f32 %v1009_v11, %v1008_v33  ;;  %v1044_v43 = vmul.f32 %v2891_v51, %v2955_v26  ;;  %v3573_v11 = vld [vmem:[#allocation33_spill] sm:$0xff] }
 0x138   : > { %v1045_v39 = vmul.f32 %v2894_v12, %v2962_v62  ;;  %v883_v13 = vsub.f32 %v657_v45, %v882_v3  ;;  %v887_v15 = vsub.f32 %v680_v32, %v886_v34  ;;  %v890_v25 = vsub.f32 %v3104_v31, %v3108_v17 }
 0x139   : > { %v3120_v23 = vadd.f32 %v893_v55, %v892_v60  ;;  %v3123_v56 = vsub.f32 %v3568_v0, %v974_v38  ;;  %v3126_v2 = vsub.f32 %v3569_v7, %v978_v16  ;;  %v1007_v59 = vsub.f32 %v835_v8, %v1006_v19 }
 0x13a   : > { %v1011_v10 = vsub.f32 %v839_v36, %v1010_v9  ;;  %v1048_v45 = vmul.f32 %v2894_v12, %v2955_v26  ;;  %v1049_v37 = vmul.f32 %v2891_v51, %v2962_v62  ;;  %v1046_v41 = vsub.f32 %v1044_v43, %v1045_v39  ;;  %v3572_v36 = vld [vmem:[#allocation29_spill] sm:$0xff] }
 0x13b   : > { %v1672_v4 = vpop.eup %1671  ;;  %v1052_v38 = vmul.f32 %v3066_v46, %v2955_v26  ;;  %v1053_v54 = vmul.f32 %v3068_v47, %v2962_v62  ;;  %v1056_v43 = vmul.f32 %v3068_v47, %v2955_v26  ;;  %v1057_v55 = vmul.f32 %v3066_v46, %v2962_v62 }
 0x13c   : > { %v1097_v57 = vmul.f32 %v1672_v4, %v3002_v14  ;;  %v1098_v61 = vmul.f32 %v1672_v4, %v3008_v18  ;;  %v1050_v60 = vadd.f32 %v1049_v37, %v1048_v45 }
 0x13e   : > { %v1099_v0 = vsub.f32 0.0, %v1098_v61  ;;  %v1106_v16 = vmul.f32 %v1097_v57, %v2928_v58  ;;  %v1109_v7 = vmul.f32 %v1097_v57, %v2941_v5  ;;  %v1112_v14 = vmul.f32 %v1097_v57, %v2958_v27 }
 0x13f   : > { %v1115_v18 = vmul.f32 %v1097_v57, %v2973_v30  ;;  %v1119_v48 = vmul.f32 %v1097_v57, %v3572_v36  ;;  %v1122_v4 = vmul.f32 %v1097_v57, %v3573_v11  ;;  %v1128_v62 = vmul.f32 %v1097_v57, %v2982_v52 }
 0x140   : > { %v1107_v33 = vmul.f32 %v1099_v0, %v3572_v36  ;;  %v1110_v32 = vmul.f32 %v1099_v0, %v3573_v11  ;;  %v1113_v3 = vmul.f32 %v1099_v0, %v2965_v21  ;;  %v1116_v31 = vmul.f32 %v1099_v0, %v2982_v52  ;;  %v3574_v52 = vld [vmem:[#allocation25_spill] sm:$0xff] }
 0x141   : > { %v1118_v34 = vmul.f32 %v1099_v0, %v2928_v58  ;;  %v1121_v17 = vmul.f32 %v1099_v0, %v2941_v5  ;;  %v1124_v58 = vmul.f32 %v1099_v0, %v2958_v27  ;;  %v1125_v5 = vmul.f32 %v1097_v57, %v2965_v21 }
 0x142   : > { %v3153_v8 = vsub.f32 %v1106_v16, %v1107_v33  ;;  %v3155_v19 = vsub.f32 %v1109_v7, %v1110_v32  ;;  %v3157_v26 = vsub.f32 %v1112_v14, %v1113_v3  ;;  %v3159_v9 = vsub.f32 %v1115_v18, %v1116_v31 }
 0x143   : > { %v3161_v39 = vadd.f32 %v1119_v48, %v1118_v34  ;;  %v1127_v61 = vmul.f32 %v1099_v0, %v2973_v30  ;;  %v1100_v45 = vmul.f32 %v1097_v57, %v1007_v59  ;;  %v1101_v37 = vmul.f32 %v1099_v0, %v1011_v10 }
 0x144   : > { %v1104_v16 = vmul.f32 %v1097_v57, %v1011_v10  ;;  %v1123_v7 = vadd.f32 %v1122_v4, %v1121_v17  ;;  %v1103_v14 = vmul.f32 %v1099_v0, %v1007_v59  ;;  %v3168_v36 = vadd.f32 %v1125_v5, %v1124_v58  ;;  %v3575_v58 = vld [vmem:[#allocation32_spill] sm:$0xff] }
 0x145   : > { %v3170_v18 = vadd.f32 %v1128_v62, %v1127_v61  ;;  %v1138_v48 = vmul.f32 %v3153_v8, %v3123_v56  ;;  %v1139_v27 = vmul.f32 %v3161_v39, %v3126_v2  ;;  %v1142_v21 = vmul.f32 %v3161_v39, %v3123_v56 }
 0x146   : > { %v1143_v30 = vmul.f32 %v3153_v8, %v3126_v2  ;;  %v891_v57 = vsub.f32 %v3574_v52, %v890_v25  ;;  %v895_v59 = vsub.f32 0.0, %v3120_v23  ;;  %v1047_v10 = vsub.f32 %v883_v13, %v1046_v41  ;;  %v3576_v23 = vld [vmem:[#allocation28_spill] sm:$0xff]  ;;  %v3577_v13 = vld [vmem:[#allocation22_spill] sm:$0xff] }
 0x147   : > { %v1054_v0 = vsub.f32 %v1052_v38, %v1053_v54  ;;  %v1051_v33 = vsub.f32 %v887_v15, %v1050_v60  ;;  %v1058_v11 = vadd.f32 %v1057_v55, %v1056_v43  ;;  %v1140_v32 = vsub.f32 %v1138_v48, %v1139_v27 }
 0x148   : > { %v1144_v3 = vadd.f32 %v1143_v30, %v1142_v21  ;;  %v3182_v31 = vsub.f32 %v1100_v45, %v1101_v37  ;;  %v3184_v34 = vadd.f32 %v1104_v16, %v1103_v14  ;;  %v1154_v17 = vmul.f32 %v3153_v8, %v2891_v51 }
 0x149   : > { %v1155_v4 = vmul.f32 %v3161_v39, %v2894_v12  ;;  %v3191_v25 = vsub.f32 %v3575_v58, %v1140_v32  ;;  %v3578_v41 = vsub.f32 %v3576_v23, %v3577_v13  ;;  %v1158_v38 = vmul.f32 %v3161_v39, %v2891_v51 }
 0x14a   : > { %v1055_v54 = vsub.f32 %v891_v57, %v1054_v0  ;;  %v1159_v60 = vmul.f32 %v3153_v8, %v2894_v12  ;;  %v1162_v55 = vmul.f32 %v3155_v19, %v2891_v51  ;;  %v1059_v5 = vsub.f32 %v895_v59, %v1058_v11 }
 0x14b   : > { %v3196_v15 = vsub.f32 %v3578_v41, %v1144_v3  ;;  %v1156_v43 = vsub.f32 %v1154_v17, %v1155_v4  ;;  %v1163_v61 = vmul.f32 %v1123_v7, %v2894_v12  ;;  %v1166_v62 = vmul.f32 %v1123_v7, %v2891_v51 }
 0x14c   : > { %v1167_v45 = vmul.f32 %v3155_v19, %v2894_v12  ;;  %v3211_v16 = vadd.f32 %v1159_v60, %v1158_v38  ;;  %v1170_v14 = vmul.f32 %v3182_v31, %v1047_v10  ;;  %v1171_v48 = vmul.f32 %v3184_v34, %v1051_v33 }
 0x14d   : > { %v3209_v37 = vsub.f32 %v2811_v29, %v1156_v43  ;;  %v1164_v27 = vsub.f32 %v1162_v55, %v1163_v61  ;;  %v1174_v30 = vmul.f32 %v3184_v34, %v1047_v10  ;;  %v1175_v52 = vmul.f32 %v3182_v31, %v1051_v33 }
 0x14e   : > { %v3215_v21 = vadd.f32 %v1167_v45, %v1166_v62  ;;  %v1161_v57 = vsub.f32 %v2834_v35, %v3211_v16  ;;  %v1172_v59 = vsub.f32 %v1170_v14, %v1171_v48  ;;  %v1178_v29 = vmul.f32 %v3153_v8, %v1047_v10 }
 0x14f   : > { %v1179_v0 = vmul.f32 %v3161_v39, %v1051_v33  ;;  %v3224_v11 = vsub.f32 %v2813_v6, %v1164_v27  ;;  %v1176_v3 = vadd.f32 %v1175_v52, %v1174_v30  ;;  %v1182_v17 = vmul.f32 %v3161_v39, %v1047_v10 }
 0x150   : > { %v1169_v32 = vsub.f32 %v2836_v50, %v3215_v21  ;;  %v1173_v4 = vsub.f32 %v1055_v54, %v1172_v59  ;;  %v1183_v23 = vmul.f32 %v3153_v8, %v1051_v33  ;;  %v1186_v13 = vmul.f32 %v3155_v19, %v1047_v10 }
 0x151   : > { %v1180_v58 = vsub.f32 %v1178_v29, %v1179_v0  ;;  %v1177_v41 = vsub.f32 %v1059_v5, %v1176_v3  ;;  %v1187_v38 = vmul.f32 %v1123_v7, %v1051_v33  ;;  %v1190_v43 = vmul.f32 %v1123_v7, %v1047_v10 }
 0x152   : > { %v1191_v60 = vmul.f32 %v3155_v19, %v1051_v33  ;;  %v1184_v55 = vadd.f32 %v1183_v23, %v1182_v17  ;;  %v1194_v61 = vmul.f32 %v3157_v26, %v1047_v10  ;;  %v1195_v62 = vmul.f32 %v3168_v36, %v1051_v33 }
 0x153   : > { %v3233_v6 = vsub.f32 %v3017_v1, %v1180_v58  ;;  %v1188_v45 = vsub.f32 %v1186_v13, %v1187_v38  ;;  %v1198_v14 = vmul.f32 %v3168_v36, %v1047_v10  ;;  %v1199_v48 = vmul.f32 %v3157_v26, %v1051_v33  ;;  %v3582_v38 = vld [vmem:[#allocation30_spill] sm:$0xff] }
 0x154   : > { %v1192_v54 = vadd.f32 %v1191_v60, %v1190_v43  ;;  %v3579_v5 = vsub.f32 %v3559_v63, %v3010_v24  ;;  %v1196_v27 = vsub.f32 %v1194_v61, %v1195_v62  ;;  %v1202_v19 = vmul.f32 %v3159_v9, %v1047_v10  ;;  %v3583_v43 = vld [vmem:[#allocation38_spill] sm:$0xff] }
 0x155   : > { %v1203_v1 = vmul.f32 %v3170_v18, %v1051_v33  ;;  %v1189_v30 = vsub.f32 %v3031_v44, %v1188_v45  ;;  %v3580_v52 = vsub.f32 %v2969_v42, %v3025_v49  ;;  %v1200_v29 = vadd.f32 %v1199_v48, %v1198_v14 }
 0x156   : > { %v1185_v7 = vsub.f32 %v3579_v5, %v1184_v55  ;;  %v1206_v0 = vmul.f32 %v3170_v18, %v1047_v10  ;;  %v1197_v3 = vsub.f32 %v3047_v20, %v1196_v27  ;;  %v1207_v24 = vmul.f32 %v3159_v9, %v1051_v33  ;;  %v3584_v33 = vld [vmem:[#allocation35_spill] sm:$0xff]  ;;  %v3585_v27 = vld [vmem:[#allocation44_spill] sm:$0xff] }
 0x157   : > { %v1193_v59 = vsub.f32 %v3580_v52, %v1192_v54  ;;  %v1204_v17 = vsub.f32 %v1202_v19, %v1203_v1  ;;  %v1210_v63 = vmul.f32 %v1173_v4, %v1173_v4  ;;  %v3581_v58 = vsub.f32 %v2977_v40, %v3039_v28 }
 0x158   : > { %v1211_v13 = vmul.f32 %v1177_v41, %v1177_v41  ;;  %v980_v44 = vmul.f32 %v3066_v46, %v3570_v53  ;;  %v1208_v49 = vadd.f32 %v1207_v24, %v1206_v0  ;;  %v981_v18 = vmul.f32 %v3068_v47, %v3583_v43 }
 0x159   : > { %v1201_v23 = vsub.f32 %v3581_v58, %v1200_v29  ;;  %v1205_v42 = vsub.f32 %v3582_v38, %v1204_v17  ;;  %v984_v20 = vmul.f32 %v3068_v47, %v3570_v53  ;;  %v985_v9 = vmul.f32 %v3066_v46, %v3583_v43 }
 0x15a   : > { %v1212_v10 = vadd.f32 %v1211_v13, %v1210_v63  ;;  %v1209_v40 = vsub.f32 %v3584_v33, %v1208_v49  ;;  %v982_v28 = vsub.f32 %v980_v44, %v981_v18  ;;  %v1130_v55 = vmul.f32 %v3182_v31, %v3123_v56 }
 0x15b   : > { %v986_v60 = vadd.f32 %v985_v9, %v984_v20  ;;  %v1131_v61 = vmul.f32 %v3184_v34, %v3126_v2  ;;  %v1134_v62 = vmul.f32 %v3184_v34, %v3123_v56  ;;  %v1135_v53 = vmul.f32 %v3182_v31, %v3126_v2 }
 0x15c   : > { %1673 = vrcp.f32 %v1212_v10  ;;  %v1146_v45 = vmul.f32 %v3182_v31, %v2891_v51  ;;  %v1147_v54 = vmul.f32 %v3184_v34, %v2894_v12  ;;  %v1150_v14 = vmul.f32 %v3184_v34, %v2891_v51 }
 0x15d   : > { %v1151_v48 = vmul.f32 %v3182_v31, %v2894_v12  ;;  %v983_v5 = vsub.f32 %v2703_v22, %v982_v28  ;;  %v987_v19 = vsub.f32 %v3585_v27, %v986_v60  ;;  %v1132_v56 = vsub.f32 %v1130_v55, %v1131_v61 }
 0x15e   : > { %v1136_v1 = vadd.f32 %v1135_v53, %v1134_v62  ;;  %v1148_v52 = vsub.f32 %v1146_v45, %v1147_v54 }
 0x15f   : > { %v1152_v2 = vadd.f32 %v1151_v48, %v1150_v14  ;;  %v1133_v24 = vsub.f32 %v983_v5, %v1132_v56 }
 0x160   : > { %v1137_v63 = vsub.f32 %v987_v19, %v1136_v1  ;;  %v1149_v58 = vsub.f32 %v3066_v46, %v1148_v52 }
 0x161   : > { %v1153_v51 = vsub.f32 %v3068_v47, %v1152_v2 }
 0x166   : > { %v1674_v29 = vpop.eup %1673 }
 0x167   : > { %v1215_v0 = vmul.f32 %v1674_v29, %v1173_v4  ;;  %v1216_v17 = vmul.f32 %v1674_v29, %v1177_v41 }
 0x169   : > { %v1217_v13 = vsub.f32 0.0, %v1216_v17  ;;  %v1218_v12 = vmul.f32 %v1215_v0, %v3233_v6  ;;  %v1221_v44 = vmul.f32 %v1215_v0, %v1189_v30  ;;  %v1224_v22 = vmul.f32 %v1215_v0, %v1197_v3 }
 0x16a   : > { %v3285_v38 = vmul.f32 %v1215_v0, %v1205_v42  ;;  %v1231_v49 = vmul.f32 %v1215_v0, %v1185_v7  ;;  %v1234_v43 = vmul.f32 %v1215_v0, %v1193_v59  ;;  %v1237_v18 = vmul.f32 %v1215_v0, %v1201_v23 }
 0x16b   : > { %v1219_v20 = vmul.f32 %v1217_v13, %v1185_v7  ;;  %v1222_v9 = vmul.f32 %v1217_v13, %v1193_v59  ;;  %v1225_v4 = vmul.f32 %v1217_v13, %v1201_v23  ;;  %v1228_v41 = vmul.f32 %v1217_v13, %v1209_v40 }
 0x16c   : > { %v1230_v10 = vmul.f32 %v1217_v13, %v3233_v6  ;;  %v1233_v33 = vmul.f32 %v1217_v13, %v1189_v30  ;;  %v1236_v46 = vmul.f32 %v1217_v13, %v1197_v3  ;;  %v1239_v28 = vmul.f32 %v1217_v13, %v1205_v42 }
 0x16d   : > { %v3288_v47 = vsub.f32 %v1218_v12, %v1219_v20  ;;  %v1223_v60 = vsub.f32 %v1221_v44, %v1222_v9  ;;  %v1226_v55 = vsub.f32 %v1224_v22, %v1225_v4  ;;  %v1229_v61 = vsub.f32 %v3285_v38, %v1228_v41 }
 0x16e   : > { %v3291_v62 = vadd.f32 %v1231_v49, %v1230_v10  ;;  %v1235_v53 = vadd.f32 %v1234_v43, %v1233_v33  ;;  %v1238_v45 = vadd.f32 %v1237_v18, %v1236_v46  ;;  %v1240_v54 = vmul.f32 %v1215_v0, %v1209_v40 }
 0x16f   : > { %v1242_v7 = vmul.f32 %v3288_v47, %v1133_v24  ;;  %v1247_v59 = vmul.f32 %v3288_v47, %v1137_v63  ;;  %v1250_v6 = vmul.f32 %v3288_v47, %v1149_v58  ;;  %v1255_v30 = vmul.f32 %v3288_v47, %v1153_v51 }
 0x170   : > { %v1241_v3 = vadd.f32 %v1240_v54, %v1239_v28  ;;  %v1243_v23 = vmul.f32 %v3291_v62, %v1137_v63  ;;  %v1246_v42 = vmul.f32 %v3291_v62, %v1133_v24  ;;  %v1251_v14 = vmul.f32 %v3291_v62, %v1153_v51 }
 0x171   : > { %v1254_v48 = vmul.f32 %v3291_v62, %v1149_v58  ;;  %v1258_v5 = vmul.f32 %v1223_v60, %v1149_v58  ;;  %v1259_v27 = vmul.f32 %v1235_v53, %v1153_v51  ;;  %v1262_v40 = vmul.f32 %v1235_v53, %v1149_v58 }
 0x172   : > { %v1244_v19 = vsub.f32 %v1242_v7, %v1243_v23  ;;  %v1248_v56 = vadd.f32 %v1247_v59, %v1246_v42  ;;  %v1252_v1 = vsub.f32 %v1250_v6, %v1251_v14  ;;  %v1263_v52 = vmul.f32 %v1223_v60, %v1153_v51 }
 0x173   : > { %v1256_v2 = vadd.f32 %v1255_v30, %v1254_v48  ;;  %v1260_v29 = vsub.f32 %v1258_v5, %v1259_v27  ;;  %v1266_v0 = vmul.f32 %v3288_v47, %v3182_v31  ;;  %v1267_v17 = vmul.f32 %v3291_v62, %v3184_v34 }
 0x174   : > { %v1245_v24 = vsub.f32 %v3191_v25, %v1244_v19  ;;  %v1249_v63 = vsub.f32 %v3196_v15, %v1248_v56  ;;  %v1253_v13 = vsub.f32 %v3209_v37, %v1252_v1  ;;  %v1264_v12 = vadd.f32 %v1263_v52, %v1262_v40 }
 0x175   : > { %v1257_v58 = vsub.f32 %v1161_v57, %v1256_v2  ;;  %v1261_v51 = vsub.f32 %v3224_v11, %v1260_v29  ;;  %v1268_v44 = vsub.f32 %v1266_v0, %v1267_v17  ;;  %v1270_v22 = vmul.f32 %v3291_v62, %v3182_v31 }
 0x176   : > { %v1265_v38 = vsub.f32 %v1169_v32, %v1264_v12  ;;  %v1271_v25 = vmul.f32 %v3288_v47, %v3184_v34  ;;  %v1274_v15 = vmul.f32 %v1226_v55, %v3182_v31  ;;  %v1275_v37 = vmul.f32 %v1238_v45, %v3184_v34  ;;  %v1678_v12 = vld [vmem:[%s2133_s25] sm:$0xff] }
 0x177   : > { %v1269_v35 = vsub.f32 %v3153_v8, %v1268_v44  ;;  %v1278_v16 = vmul.f32 %v1238_v45, %v3182_v31  ;;  %v1279_v57 = vmul.f32 %v1226_v55, %v3184_v34  ;;  %v1282_v11 = vadd.f32 %v1261_v51, %v1245_v24  ;;  %v1679_v44 = vld [vmem:[%s2126_s30 + $0x8] sm:$0xff] }
 0x178   : > { %v1272_v49 = vadd.f32 %v1271_v25, %v1270_v22  ;;  %v1276_v43 = vsub.f32 %v1274_v15, %v1275_v37  ;;  %v1283_v18 = vadd.f32 %v1265_v38, %v1249_v63  ;;  %v1680_v38 = vld [vmem:[%s2133_s25 + $0x8] sm:$0xff] }
 0x179   : > { %v1280_v20 = vadd.f32 %v1279_v57, %v1278_v16  ;;  %v1681_v57 = vld [vmem:[%s2126_s30 + $0x10] sm:$0xff] }
 0x17a   : > { %v1273_v50 = vsub.f32 %v3161_v39, %v1272_v49  ;;  %v1277_v21 = vsub.f32 %v3157_v26, %v1276_v43  ;;  %v1682_v49 = vld [vmem:[%s2133_s25 + $0x10] sm:$0xff] }
 0x17b   : > { %v1281_v32 = vsub.f32 %v3168_v36, %v1280_v20 }
 0x17c   : > { %v1284_v9 = vadd.f32 %v1282_v11, %v1277_v21 }
 0x17d   : > { %v1285_v4 = vadd.f32 %v1283_v18, %v1281_v32 }
 0x17e   : > { %v1286_v41 = vadd.f32 %v1284_v9, %v1229_v61  ;;  %v1683_v9 = vld [vmem:[%s2126_s30 + $0x18] sm:$0xff] }
 0x17f   : > { %v1287_v10 = vadd.f32 %v1285_v4, %v1241_v3 }
 0x180   : > { %v1288_v8 = vadd.f32 1e-08, %v1286_v41  ;;  %v1684_v41 = vld [vmem:[%s2133_s25 + $0x18] sm:$0xff] }
 0x181   : > { %v1290_v33 = vmul.f32 %v1287_v10, %v1287_v10  ;;  %v1295_v31 = vmul.f32 %v1287_v10, %v1249_v63  ;;  %v1299_v46 = vmul.f32 %v1287_v10, %v1245_v24  ;;  %v1303_v34 = vmul.f32 %v1287_v10, %v1257_v58 }
 0x182   : > { %v1289_v28 = vmul.f32 %v1288_v8, %v1288_v8  ;;  %v1294_v60 = vmul.f32 %v1288_v8, %v1245_v24  ;;  %v1298_v55 = vmul.f32 %v1288_v8, %v1249_v63  ;;  %v1302_v53 = vmul.f32 %v1288_v8, %v1253_v13 }
 0x183   : > { %v1306_v45 = vmul.f32 %v1288_v8, %v1257_v58  ;;  %v1307_v54 = vmul.f32 %v1287_v10, %v1253_v13  ;;  %v1310_v39 = vmul.f32 %v1288_v8, %v1269_v35  ;;  %v1311_v7 = vmul.f32 %v1287_v10, %v1273_v50  ;;  %v1677_v13 = vld [vmem:[%s2126_s30] sm:$0xff] }
 0x184   : > { %v1291_v26 = vadd.f32 %v1290_v33, %v1289_v28  ;;  %v1296_v59 = vadd.f32 %v1295_v31, %v1294_v60  ;;  %v1300_v36 = vsub.f32 %v1298_v55, %v1299_v46  ;;  %v1304_v6 = vadd.f32 %v1303_v34, %v1302_v53 }
 0x185   : > { %v1308_v30 = vsub.f32 %v1306_v45, %v1307_v54  ;;  %v1312_v61 = vadd.f32 %v1311_v7, %v1310_v39  ;;  %v1314_v3 = vmul.f32 %v1288_v8, %v1273_v50  ;;  %v1315_v23 = vmul.f32 %v1287_v10, %v1269_v35 }
 0x186   : > { %1675 = vrcp.f32 %v1291_v26  ;;  %v1318_v42 = vmul.f32 %v1288_v8, %v3288_v47  ;;  %v1319_v14 = vmul.f32 %v1287_v10, %v3291_v62  ;;  %v1322_v48 = vmul.f32 %v1288_v8, %v3291_v62 }
 0x187   : > { %v1316_v5 = vsub.f32 %v1314_v3, %v1315_v23  ;;  %v1323_v27 = vmul.f32 %v1287_v10, %v3288_v47 }
 0x188   : > { %v1320_v40 = vadd.f32 %v1319_v14, %v1318_v42 }
 0x189   : > { %v1324_v19 = vsub.f32 %v1322_v48, %v1323_v27 }
 0x190   : > { %v1676_v56 = vpop.eup %1675 }
 0x191   : > { %v1297_v1 = vmul.f32 %v1676_v56, %v1296_v59  ;;  %v1301_v52 = vmul.f32 %v1676_v56, %v1300_v36  ;;  %v1305_v2 = vmul.f32 %v1676_v56, %v1304_v6  ;;  %v1309_v29 = vmul.f32 %v1676_v56, %v1308_v30 }
 0x192   : > { %v1313_v0 = vmul.f32 %v1676_v56, %v1312_v61  ;;  %v1317_v17 = vmul.f32 %v1676_v56, %v1316_v5  ;;  %v1321_v24 = vmul.f32 %v1676_v56, %v1320_v40  ;;  %v1325_v63 = vmul.f32 %v1676_v56, %v1324_v19 }
 0x193   : > { %v1326_v62 = vmul.f32 %v1677_v13, %v1297_v1  ;;  %v1327_v58 = vmul.f32 %v1678_v12, %v1301_v52  ;;  %v1329_v47 = vmul.f32 %v1678_v12, %v1297_v1  ;;  %v1330_v51 = vmul.f32 %v1677_v13, %v1301_v52 }
 0x194   : > { %v1332_v22 = vmul.f32 %v1679_v44, %v1305_v2  ;;  %v1333_v25 = vmul.f32 %v1680_v38, %v1309_v29  ;;  %v1335_v15 = vmul.f32 %v1680_v38, %v1305_v2  ;;  %v1336_v37 = vmul.f32 %v1679_v44, %v1309_v29 }
 0x195   : > { %v1328_v35 = vadd.f32 %v1327_v58, %v1326_v62  ;;  %v1331_v16 = vsub.f32 %v1329_v47, %v1330_v51  ;;  %v1340_v11 = vmul.f32 %v1681_v57, %v1313_v0  ;;  %v1341_v43 = vmul.f32 %v1682_v49, %v1317_v17 }
 0x196   : > { %v1334_v18 = vadd.f32 %v1333_v25, %v1332_v22  ;;  %v1337_v20 = vsub.f32 %v1335_v15, %v1336_v37  ;;  %v1343_v50 = vmul.f32 %v1682_v49, %v1313_v0  ;;  %v1344_v21 = vmul.f32 %v1681_v57, %v1317_v17 }
 0x197   : > { %v1342_v32 = vadd.f32 %v1341_v43, %v1340_v11  ;;  %v1348_v4 = vmul.f32 %v1683_v9, %v1321_v24  ;;  %v1349_v10 = vmul.f32 %v1684_v41, %v1325_v63  ;;  %v1351_v8 = vmul.f32 %v1684_v41, %v1321_v24 }
 0x198   : > { %v1338_v33 = vadd.f32 %v1334_v18, %v1328_v35  ;;  %v1339_v31 = vadd.f32 %v1337_v20, %v1331_v16  ;;  %v1345_v46 = vsub.f32 %v1343_v50, %v1344_v21  ;;  %v1352_v34 = vmul.f32 %v1683_v9, %v1325_v63 }
 0x199   : > { %v1350_v28 = vadd.f32 %v1349_v10, %v1348_v4 }
 0x19a   : > { %v1346_v60 = vadd.f32 %v1342_v32, %v1338_v33  ;;  %v1347_v55 = vadd.f32 %v1345_v46, %v1339_v31  ;;  %v1353_v53 = vsub.f32 %v1351_v8, %v1352_v34 }
 0x19c   : > { %v1354_v45 = vadd.f32 %v1350_v28, %v1346_v60  ;;  %v1355_v54 = vadd.f32 %v1353_v53, %v1347_v55 }
 0x19e   : > { %1356 = vst.msk [vmem:[%s318_s27] sm:$0xff] %vm327_vm0, %v1354_v45  ;;  %1357 = vst.msk [vmem:[%s325_s9] sm:$0xff] %vm327_vm0, %v1355_v54 }
 0x19f   : > { %1788 = shalt.err (!%p1785_p13)
}
 0x1a0   : > { %s1789_s15 = scalar_lea.hbm %s3345_s11, 128  ;;  %s1793_s8 = scalar_lea.hbm %s3428_s3, 256 }
 0x1a1   : > { %p1790_p11 = scmp.ne.s32.totalorder %s3345_s11, %s1789_s15  ;;  %p1794_p7 = scmp.lt.u32.totalorder %s3345_s11, %s3428_s3 }
 0x1a2   : > { %p1795_p3 = scmp.lt.u32.totalorder %s1793_s8, %s1789_s15  ;;  %p1797_p0 = scmp.lt.u32.totalorder %s1789_s15, %s3345_s11 }
 0x1a3   : > { %p1791_p2 = pnand %p1790_p11, %p3586_p10 }
 0x1a4   : > { %p1796_p4 = por %p1795_p3, %p1794_p7 }
 0x1a5   : > { %p1792_p5 = pneg %p1791_p2 }
 0x1a6   : > { %p1798_p8 = por %p1797_p0, %p1796_p4 }
 0x1a8   : > { %p1799_p9 = pnand %p1798_p8, %p1792_p5 }
 0x1aa   : > { %1802 = shalt.err (!%p1799_p9)
}
 0x1ab   : > { %1590 = dma.vmem_to_hbm [thread:$0]  (%p3586_p10), %s3347_s24, 128, %s3345_s11, %s1359_s23  }
 0x1ac   : > { %s1364_s13 = scalar_lea.sflag [#allocation10], %s2122_s0  ;;  %s1803_s14 = scalar_lea.vmem %s3354_s7, 128 }
 0x1ad   : > { %p1804_p12 = scmp.ne.s32.totalorder %s3354_s7, %s1803_s14  ;;  %s1901_s21 = smov [#allocation9]  }
 0x1ae   : > { %s1807_s27 = sshll.u32 %s1901_s21, 4  ;;  %s1808_s27 = int_to_ptr.vmem [resolvable:$false] %s1807_s27 }
 0x1af   : > { %p1805_p1 = pnand %p1804_p12, %p3586_p10  ;;  %s1809_s9 = scalar_lea.vmem %s1808_s27, 256 }
 0x1b0   : > { %p1810_p13 = scmp.lt.s32.totalorder %s3354_s7, %s1808_s27  ;;  %p1811_p11 = scmp.lt.s32.totalorder %s1809_s9, %s1803_s14 }
 0x1b1   : > { %p1806_p6 = pneg %p1805_p1 }
 0x1b2   : > { %p1812_p2 = por %p1811_p11, %p1810_p13 }
 0x1b4   : > { %p1813_p5 = pnand %p1812_p2, %p1806_p6 }
 0x1b6   : > { %1816 = shalt.err (!%p1813_p5)
}
 0x1b7   : > { %s1817_s0 = scalar_lea.hbm %s3352_s29, 128  ;;  %s1821_s1 = scalar_lea.hbm %s3429_s4, 256 }
 0x1b8   : > { %p1818_p7 = scmp.ne.s32.totalorder %s3352_s29, %s1817_s0  ;;  %p1822_p0 = scmp.lt.u32.totalorder %s3352_s29, %s3429_s4 }
 0x1b9   : > { %p1823_p8 = scmp.lt.u32.totalorder %s1821_s1, %s1817_s0  ;;  %p1825_p12 = scmp.lt.u32.totalorder %s1817_s0, %s3352_s29 }
 0x1ba   : > { %p1819_p3 = pnand %p1818_p7, %p3586_p10 }
 0x1bb   : > { %p1824_p9 = por %p1823_p8, %p1822_p0 }
 0x1bc   : > { %p1820_p4 = pneg %p1819_p3 }
 0x1bd   : > { %p1826_p1 = por %p1825_p12, %p1824_p9 }
 0x1bf   : > { %p1827_p6 = pnand %p1826_p1, %p1820_p4 }
 0x1c1   : > { %1830 = shalt.err (!%p1827_p6)
}
 0x1c2   : > { %1591 = dma.vmem_to_hbm [thread:$0]  (%p3586_p10), %s3354_s7, 128, %s3352_s29, %s1364_s13  }
 0x1c3 PF: > { %s3587_s18 = sld [smem:[#allocation15_spill]]  ;;  %s3588_s23 = sld [smem:[#allocation20_spill]] }
 0x1c4   : > { %s3589_s5 = sld [smem:[#allocation17_spill]] }
 0x1c9   : > { %s1404_s10 = sand.u32 1, %s3587_s18   ;;  %p3590_p13 = scmp.ne.s32.totalorder %s3588_s23, 0 }
 0x1ca   : > { %p3591_p11 = scmp.ge.s32.totalorder %s3589_s5, 2  ;;  %s1405_s12 = scalar_lea.sflag [#allocation4], %s1404_s10 }
 0x1cc   : > { %p1605_p2 = pnand %p3591_p11, %p3590_p13 }
 0x1ce   : > { %1864 = dma.done.wait (!%p1605_p2), %s1405_s12, 128  }
 0x1cf   : > { %1866 = vsyncadd (!%p1605_p2), %s1405_s12, 4294967168  ;;  %s1414_s17 = scalar_lea.sflag [#allocation10], %s1404_s10 }
 0x1d0   : > { %1868 = dma.done.wait (!%p1605_p2), %s1414_s17, 128  }
 0x1d1   : > { %1870 = vsyncadd (!%p1605_p2), %s1414_s17, 4294967168  ;;  %s27_s20 = sadd.s32 1, %s3589_s5   ;;  %s3592_s28 = sld [smem:[#allocation16_spill]] }
 0x1d2   : > { %p24_p5 = scmp.ge.s32.totalorder %s27_s20, 4   ;;  %s3593_s17 = sld [smem:[#allocation19_spill]] }
 0x1d3   : > { %s3594_s7 = sld [smem:[#allocation18_spill]]  ;;  %s3595_s15 = smov %s1877_s16 }
 0x1d4   : > { %s3597_s18 = smov %s1889_s19  ;;  %26 = sbr.rel (!%p24_p5) target bundleno = 13 (0xd), region = 124 }
 0x1d7   : > { %s3596_s16 = smov %s3592_s28 }
 0x1d9   : > { %s3598_s19 = smov %s3594_s7 }
 0x1db   :  { %1419 = vsyncpa [#allocation3], 1 }
 0x1dc   :  { %1421 = vsyncpa [#allocation3 + $0x1], 1 }
 0x1dd   :  { %1422 = vsyncpa [#allocation6], 1 }
 0x1de   :  { %1424 = vsyncpa [#allocation6 + $0x1], 1 }
 0x1df   :  { %1425 = vsyncpa [#allocation4], 1 }
 0x1e0   :  { %1427 = vsyncpa [#allocation4 + $0x1], 1 }
 0x1e1   :  { %1428 = vsyncpa [#allocation10], 1 }
 0x1e2   :  { %1430 = vsyncpa [#allocation10 + $0x1], 1 }

</bundles_post_ra>
